<compile_context>
chip_gen: v7x
topology: tpu7x:2x2x1
jax: 0.10.0
libtpu: 0.0.40
codegen_flags: <defaults>
</compile_context>

<pallas_src>
import jax
import jax.numpy as jnp
from jax.experimental import pallas as pl
from jax.experimental.pallas import tpu as pltpu


def _state_encoder_kernel(x_ref,
                          w1f, b1f,            # fused layer 1: [D, 2*H1], [1, 2*H1]
                          hw2, hb2, hw3, hb3,  # head MLP layers 2, 3
                          dw2, db2, dw3, db3,  # dep  MLP layers 2, 3
                          out_ref):            # [TB, V, V, 2*E]
    tb, V, D = x_ref.shape
    H1 = hw2.shape[0]
    E = hw3.shape[1]

    # Flatten the batch block into the matmul M dimension: [TB*V, D].
    x = x_ref[...].reshape(tb * V, D)

    def mxu(a, w_ref):
        w = w_ref[...]
        # If weights are bf16, feed the MXU bf16 operands but accumulate in f32.
        return jnp.dot(a.astype(w.dtype), w, preferred_element_type=jnp.float32)

    # Fused layer 1 (both MLPs share the same input x). Bias add / ReLU stay f32.
    h1 = jnp.maximum(mxu(x, w1f) + b1f[...], 0.0)            # [TB*V, 2*H1]
    h_head = h1[:, :H1]                                       # lane-aligned slices
    h_dep = h1[:, H1:]

    def tail(h, w2, b2, w3, b3):
        h = jnp.maximum(mxu(h, w2) + b2[...], 0.0)
        return mxu(h, w3) + b3[...]

    wh = tail(h_head, hw2, hb2, hw3, hb3).reshape(tb, V, E)   # head embeddings
    wd = tail(h_dep, dw2, db2, dw3, db3).reshape(tb, V, E)    # dep embeddings

    # out[b, h, d, :E] = wh[b, h]   (head_ids = idx // V)
    # out[b, h, d, E:] = wd[b, d]   (dep_ids  = idx %  V)
    # Both stores hit lane offsets that are multiples of 128 -> unmasked vst; no
    # concatenate and no [V*V, 2E] temporary is materialized.
    out_ref[:, :, :, :E] = jnp.broadcast_to(wh[:, :, None, :], (tb, V, V, E))
    out_ref[:, :, :, E:] = jnp.broadcast_to(wd[:, None, :, :], (tb, V, V, E))


def state_encoder_forward(word_embeddings, head_params, dep_params, num_variables,
                          *, use_bf16_weights=False, batch_block=None):
    """word_embeddings: [B, V, D] float32 (V == num_variables).

    head_params / dep_params: [w1, b1, w2, b2, w3, b3]; weights stored [in, out],
    biases stored [1, out].
    """
    B, V, D = word_embeddings.shape
    assert V <= num_variables, "Number of word is too large"
    # TODO(synk): the PyTorch module also allows seq_len < num_variables and an
    # adjacency / label-embedding path; this kernel implements the default
    # (adjacency=None, label_embedding_dim=0) path with seq_len == num_variables.
    assert V == num_variables, "kernel assumes seq_len == num_variables"

    hw1, hb1, hw2, hb2, hw3, hb3 = head_params
    dw1, db1, dw2, db2, dw3, db3 = dep_params
    E = hw3.shape[1]

    # Fuse the shared-input layer 1 of both MLPs into one [D, 2*H1] matmul.
    w1f = jnp.concatenate([hw1, dw1], axis=1)
    b1f = jnp.concatenate([hb1, db1], axis=1)

    wdt = jnp.bfloat16 if use_bf16_weights else jnp.float32
    params = [w1f.astype(wdt), b1f.astype(jnp.float32),
              hw2.astype(wdt), hb2.astype(jnp.float32),
              hw3.astype(wdt), hb3.astype(jnp.float32),
              dw2.astype(wdt), db2.astype(jnp.float32),
              dw3.astype(wdt), db3.astype(jnp.float32)]

    # Batch-block size: target ~256 matmul rows per grid step (fills the v6e/v7x
    # 256-wide MXU; >=128 already saturates a v5e pass), but keep at least two
    # parallel grid steps when the batch is big enough (v7x has 2 TensorCores).
    if batch_block is None:
        tb = max(1, min(B, -(-256 // V)))
        if B // tb < 2 and B * V >= 256:
            tb = max(1, B // 2)
        while B % tb:                      # keep blocks evenly dividing the batch
            tb -= 1
    else:
        tb = batch_block
        assert B % tb == 0

    def w_spec(shape):
        return pl.BlockSpec(shape, lambda b, _n=len(shape): (0,) * _n)

    in_specs = [pl.BlockSpec((tb, V, D), lambda b: (b, 0, 0))]
    in_specs += [w_spec(p.shape) for p in params]

    out = pl.pallas_call(
        _state_encoder_kernel,
        out_shape=jax.ShapeDtypeStruct((B, V, V, 2 * E), jnp.float32),
        grid_spec=pltpu.PrefetchScalarGridSpec(
            num_scalar_prefetch=0,
            grid=(B // tb,),
            in_specs=in_specs,
            out_specs=pl.BlockSpec((tb, V, V, 2 * E), lambda b: (b, 0, 0, 0)),
        ),
        compiler_params=pltpu.CompilerParams(
            dimension_semantics=("parallel",)),
    )(word_embeddings, *params)

    # Free metadata reshape back to the module's [B, V*V, 2E] layout.
    return out.reshape(B, V * V, 2 * E)


def _init_mlp_params(key, dims):
    """Deterministic xavier-uniform-ish init for Linear layers (weights [in, out])."""
    params = []
    for i in range(len(dims) - 1):
        key, kw = jax.random.split(key)
        fan_in, fan_out = dims[i], dims[i + 1]
        bound = (6.0 / (fan_in + fan_out)) ** 0.5
        w = jax.random.uniform(kw, (fan_in, fan_out), jnp.float32, -bound, bound)
        b = jnp.zeros((1, fan_out), jnp.float32)  # 2D for TPU-friendly layout
        params += [w, b]
    return params


def _reference_forward(x, head_params, dep_params, V):
    def mlp(x, p):
        h = jax.nn.relu(x @ p[0] + p[1][0])
        h = jax.nn.relu(h @ p[2] + p[3][0])
        return h @ p[4] + p[5][0]
    wh = mlp(x, head_params)
    wd = mlp(x, dep_params)
    idx = jnp.arange(V * V)
    return jnp.concatenate([wh[:, idx // V], wd[:, idx % V]], axis=-1)


if __name__ == "__main__":
    # Small, tile-friendly shapes consistent with the module's structure; batch is
    # large enough to exercise the batch-blocked grid (TB=16 -> 2 grid steps).
    B = 32                # batch
    num_variables = 8     # V
    word_dim = 256        # word_embedding_dim
    hidden_layers = [256, 128]
    node_dim = 128        # node_embedding_dim
    # label_embedding_dim = 0 (module default) -> label concat is a no-op.

    key = jax.random.PRNGKey(0)
    kx, kh, kd = jax.random.split(key, 3)

    word_embeddings = jax.random.normal(kx, (B, num_variables, word_dim), jnp.float32)
    dims = [word_dim] + hidden_layers + [node_dim]
    head_params = _init_mlp_params(kh, dims)
    dep_params = _init_mlp_params(kd, dims)

    # f32 path (bit-faithful to the PyTorch module).
    out = state_encoder_forward(word_embeddings, head_params, dep_params, num_variables)
    out = jax.block_until_ready(out)

    ref = _reference_forward(word_embeddings, head_params, dep_params, num_variables)
    assert out.shape == (B, num_variables ** 2, 2 * node_dim), out.shape
    assert jnp.allclose(out, ref, atol=1e-4, rtol=1e-4), "mismatch vs JAX reference (f32)"

    # bf16-weight fast path (v6e/v7x MXU), f32 accumulation -> looser tolerance.
    out_bf16 = state_encoder_forward(word_embeddings, head_params, dep_params,
                                     num_variables, use_bf16_weights=True)
    out_bf16 = jax.block_until_ready(out_bf16)
    assert out_bf16.shape == out.shape
    assert jnp.allclose(out_bf16, ref, atol=1e-1, rtol=1e-1), "mismatch vs JAX reference (bf16)"

    print("KERNEL_OK")
</pallas_src>

<mosaic_0001>
module attributes {stable_mosaic.version = 11 : i64} {
  func.func @_state_encoder_kernel(%arg0: i32, %arg1: memref<16x8x256xf32, #tpu.memory_space<vmem>>, %arg2: memref<256x512xf32, #tpu.memory_space<vmem>>, %arg3: memref<1x512xf32, #tpu.memory_space<vmem>>, %arg4: memref<256x128xf32, #tpu.memory_space<vmem>>, %arg5: memref<1x128xf32, #tpu.memory_space<vmem>>, %arg6: memref<128x128xf32, #tpu.memory_space<vmem>>, %arg7: memref<1x128xf32, #tpu.memory_space<vmem>>, %arg8: memref<256x128xf32, #tpu.memory_space<vmem>>, %arg9: memref<1x128xf32, #tpu.memory_space<vmem>>, %arg10: memref<128x128xf32, #tpu.memory_space<vmem>>, %arg11: memref<1x128xf32, #tpu.memory_space<vmem>>, %arg12: memref<16x8x8x256xf32, #tpu.memory_space<vmem>>) attributes {dimension_semantics = [#tpu.dimension_semantics<parallel>], iteration_bounds = array<i64: 2>, scalar_prefetch = 0 : i64, scratch_operands = 0 : i64, tpu.core_type = #tpu.core_type<tc>, window_params = [{transform_indices = @transform_0, window_bounds = array<i64: 16, 8, 256>}, {pipeline_mode = #tpu.pipeline_mode<synchronous>, transform_indices = @transform_1, window_bounds = array<i64: 256, 512>}, {pipeline_mode = #tpu.pipeline_mode<synchronous>, transform_indices = @transform_2, window_bounds = array<i64: 1, 512>}, {pipeline_mode = #tpu.pipeline_mode<synchronous>, transform_indices = @transform_3, window_bounds = array<i64: 256, 128>}, {pipeline_mode = #tpu.pipeline_mode<synchronous>, transform_indices = @transform_4, window_bounds = array<i64: 1, 128>}, {pipeline_mode = #tpu.pipeline_mode<synchronous>, transform_indices = @transform_5, window_bounds = array<i64: 128, 128>}, {pipeline_mode = #tpu.pipeline_mode<synchronous>, transform_indices = @transform_6, window_bounds = array<i64: 1, 128>}, {pipeline_mode = #tpu.pipeline_mode<synchronous>, transform_indices = @transform_7, window_bounds = array<i64: 256, 128>}, {pipeline_mode = #tpu.pipeline_mode<synchronous>, transform_indices = @transform_8, window_bounds = array<i64: 1, 128>}, {pipeline_mode = #tpu.pipeline_mode<synchronous>, transform_indices = @transform_9, window_bounds = array<i64: 128, 128>}, {pipeline_mode = #tpu.pipeline_mode<synchronous>, transform_indices = @transform_10, window_bounds = array<i64: 1, 128>}, {transform_indices = @transform_11, window_bounds = array<i64: 16, 8, 8, 256>}]} {
    %c0 = arith.constant 0 : index
    %c0_0 = arith.constant 0 : index
    %c0_1 = arith.constant 0 : index
    %0 = vector.load %arg1[%c0, %c0_0, %c0_1] : memref<16x8x256xf32, #tpu.memory_space<vmem>>, vector<16x8x256xf32>
    %1 = vector.shape_cast %0 : vector<16x8x256xf32> to vector<128x256xf32>
    %c0_2 = arith.constant 0 : index
    %c0_3 = arith.constant 0 : index
    %2 = vector.load %arg2[%c0_2, %c0_3] : memref<256x512xf32, #tpu.memory_space<vmem>>, vector<256x512xf32>
    %cst = arith.constant dense<0.000000e+00> : vector<128x512xf32>
    %3 = tpu.matmul %1, %2, %cst {dimension_numbers = #tpu.dot_dimension_numbers<[1], [0], [0], [1], [0, 0, 1, 1], [], []>} : vector<128x256xf32>, vector<256x512xf32>, vector<128x512xf32> -> vector<128x512xf32>
    %c0_4 = arith.constant 0 : index
    %c0_5 = arith.constant 0 : index
    %4 = vector.load %arg3[%c0_4, %c0_5] : memref<1x512xf32, #tpu.memory_space<vmem>>, vector<1x512xf32>
    %5 = vector.broadcast %4 : vector<1x512xf32> to vector<128x512xf32>
    %6 = arith.addf %3, %5 : vector<128x512xf32>
    %cst_6 = arith.constant 0.000000e+00 : f32
    %7 = vector.broadcast %cst_6 : f32 to vector<128x512xf32>
    %8 = arith.maximumf %6, %7 : vector<128x512xf32>
    %9 = vector.extract_strided_slice %8 {offsets = [0, 0], sizes = [128, 256], strides = [1, 1]} : vector<128x512xf32> to vector<128x256xf32>
    %10 = vector.extract_strided_slice %8 {offsets = [0, 256], sizes = [128, 256], strides = [1, 1]} : vector<128x512xf32> to vector<128x256xf32>
    %c0_7 = arith.constant 0 : index
    %c0_8 = arith.constant 0 : index
    %11 = vector.load %arg4[%c0_7, %c0_8] : memref<256x128xf32, #tpu.memory_space<vmem>>, vector<256x128xf32>
    %cst_9 = arith.constant dense<0.000000e+00> : vector<128x128xf32>
    %12 = tpu.matmul %9, %11, %cst_9 {dimension_numbers = #tpu.dot_dimension_numbers<[1], [0], [0], [1], [0, 0, 1, 1], [], []>} : vector<128x256xf32>, vector<256x128xf32>, vector<128x128xf32> -> vector<128x128xf32>
    %c0_10 = arith.constant 0 : index
    %c0_11 = arith.constant 0 : index
    %13 = vector.load %arg5[%c0_10, %c0_11] : memref<1x128xf32, #tpu.memory_space<vmem>>, vector<1x128xf32>
    %14 = vector.broadcast %13 : vector<1x128xf32> to vector<128x128xf32>
    %15 = arith.addf %12, %14 : vector<128x128xf32>
    %cst_12 = arith.constant 0.000000e+00 : f32
    %16 = vector.broadcast %cst_12 : f32 to vector<128x128xf32>
    %17 = arith.maximumf %15, %16 : vector<128x128xf32>
    %c0_13 = arith.constant 0 : index
    %c0_14 = arith.constant 0 : index
    %18 = vector.load %arg6[%c0_13, %c0_14] : memref<128x128xf32, #tpu.memory_space<vmem>>, vector<128x128xf32>
    %cst_15 = arith.constant dense<0.000000e+00> : vector<128x128xf32>
    %19 = tpu.matmul %17, %18, %cst_15 {dimension_numbers = #tpu.dot_dimension_numbers<[1], [0], [0], [1], [0, 0, 1, 1], [], []>} : vector<128x128xf32>, vector<128x128xf32>, vector<128x128xf32> -> vector<128x128xf32>
    %c0_16 = arith.constant 0 : index
    %c0_17 = arith.constant 0 : index
    %20 = vector.load %arg7[%c0_16, %c0_17] : memref<1x128xf32, #tpu.memory_space<vmem>>, vector<1x128xf32>
    %21 = vector.broadcast %20 : vector<1x128xf32> to vector<128x128xf32>
    %22 = arith.addf %19, %21 : vector<128x128xf32>
    %23 = vector.shape_cast %22 : vector<128x128xf32> to vector<16x8x128xf32>
    %c0_18 = arith.constant 0 : index
    %c0_19 = arith.constant 0 : index
    %24 = vector.load %arg8[%c0_18, %c0_19] : memref<256x128xf32, #tpu.memory_space<vmem>>, vector<256x128xf32>
    %cst_20 = arith.constant dense<0.000000e+00> : vector<128x128xf32>
    %25 = tpu.matmul %10, %24, %cst_20 {dimension_numbers = #tpu.dot_dimension_numbers<[1], [0], [0], [1], [0, 0, 1, 1], [], []>} : vector<128x256xf32>, vector<256x128xf32>, vector<128x128xf32> -> vector<128x128xf32>
    %c0_21 = arith.constant 0 : index
    %c0_22 = arith.constant 0 : index
    %26 = vector.load %arg9[%c0_21, %c0_22] : memref<1x128xf32, #tpu.memory_space<vmem>>, vector<1x128xf32>
    %27 = vector.broadcast %26 : vector<1x128xf32> to vector<128x128xf32>
    %28 = arith.addf %25, %27 : vector<128x128xf32>
    %cst_23 = arith.constant 0.000000e+00 : f32
    %29 = vector.broadcast %cst_23 : f32 to vector<128x128xf32>
    %30 = arith.maximumf %28, %29 : vector<128x128xf32>
    %c0_24 = arith.constant 0 : index
    %c0_25 = arith.constant 0 : index
    %31 = vector.load %arg10[%c0_24, %c0_25] : memref<128x128xf32, #tpu.memory_space<vmem>>, vector<128x128xf32>
    %cst_26 = arith.constant dense<0.000000e+00> : vector<128x128xf32>
    %32 = tpu.matmul %30, %31, %cst_26 {dimension_numbers = #tpu.dot_dimension_numbers<[1], [0], [0], [1], [0, 0, 1, 1], [], []>} : vector<128x128xf32>, vector<128x128xf32>, vector<128x128xf32> -> vector<128x128xf32>
    %c0_27 = arith.constant 0 : index
    %c0_28 = arith.constant 0 : index
    %33 = vector.load %arg11[%c0_27, %c0_28] : memref<1x128xf32, #tpu.memory_space<vmem>>, vector<1x128xf32>
    %34 = vector.broadcast %33 : vector<1x128xf32> to vector<128x128xf32>
    %35 = arith.addf %32, %34 : vector<128x128xf32>
    %36 = vector.shape_cast %35 : vector<128x128xf32> to vector<16x8x128xf32>
    %37 = vector.shape_cast %23 : vector<16x8x128xf32> to vector<16x8x1x128xf32>
    %38 = vector.shape_cast %37 : vector<16x8x1x128xf32> to vector<16x8x1x128xf32>
    %39 = vector.broadcast %38 : vector<16x8x1x128xf32> to vector<16x8x8x128xf32>
    %c0_29 = arith.constant 0 : index
    %c0_30 = arith.constant 0 : index
    %c0_31 = arith.constant 0 : index
    %c0_32 = arith.constant 0 : index
    %40 = vector.load %arg12[%c0_29, %c0_30, %c0_31, %c0_32] : memref<16x8x8x256xf32, #tpu.memory_space<vmem>>, vector<16x8x8x128xf32>
    tpu.vector_store %arg12[%c0_29, %c0_30, %c0_31, %c0_32], %39 {strides = array<i32>} : memref<16x8x8x256xf32, #tpu.memory_space<vmem>>, vector<16x8x8x128xf32>,
    %41 = vector.shape_cast %36 : vector<16x8x128xf32> to vector<16x1x8x128xf32>
    %42 = vector.shape_cast %41 : vector<16x1x8x128xf32> to vector<16x1x8x128xf32>
    %43 = vector.broadcast %42 : vector<16x1x8x128xf32> to vector<16x8x8x128xf32>
    %c0_33 = arith.constant 0 : index
    %c0_34 = arith.constant 0 : index
    %c0_35 = arith.constant 0 : index
    %c128 = arith.constant 128 : index
    %44 = vector.load %arg12[%c0_33, %c0_34, %c0_35, %c128] : memref<16x8x8x256xf32, #tpu.memory_space<vmem>>, vector<16x8x8x128xf32>
    tpu.vector_store %arg12[%c0_33, %c0_34, %c0_35, %c128], %43 {strides = array<i32>} : memref<16x8x8x256xf32, #tpu.memory_space<vmem>>, vector<16x8x8x128xf32>,
    return
  }
  func.func @transform_0(%arg0: i32) -> (i32, i32, i32) {
    %c0_i32 = arith.constant 0 : i32
    %c0_i32_0 = arith.constant 0 : i32
    %c0_i32_1 = arith.constant 0 : i32
    return %arg0, %c0_i32, %c0_i32_0 : i32, i32, i32
  }
  func.func @transform_1(%arg0: i32) -> (i32, i32) {
    %c0_i32 = arith.constant 0 : i32
    %c0_i32_0 = arith.constant 0 : i32
    %c0_i32_1 = arith.constant 0 : i32
    return %c0_i32, %c0_i32_0 : i32, i32
  }
  func.func @transform_2(%arg0: i32) -> (i32, i32) {
    %c0_i32 = arith.constant 0 : i32
    %c0_i32_0 = arith.constant 0 : i32
    %c0_i32_1 = arith.constant 0 : i32
    return %c0_i32, %c0_i32_0 : i32, i32
  }
  func.func @transform_3(%arg0: i32) -> (i32, i32) {
    %c0_i32 = arith.constant 0 : i32
    %c0_i32_0 = arith.constant 0 : i32
    %c0_i32_1 = arith.constant 0 : i32
    return %c0_i32, %c0_i32_0 : i32, i32
  }
  func.func @transform_4(%arg0: i32) -> (i32, i32) {
    %c0_i32 = arith.constant 0 : i32
    %c0_i32_0 = arith.constant 0 : i32
    %c0_i32_1 = arith.constant 0 : i32
    return %c0_i32, %c0_i32_0 : i32, i32
  }
  func.func @transform_5(%arg0: i32) -> (i32, i32) {
    %c0_i32 = arith.constant 0 : i32
    %c0_i32_0 = arith.constant 0 : i32
    %c0_i32_1 = arith.constant 0 : i32
    return %c0_i32, %c0_i32_0 : i32, i32
  }
  func.func @transform_6(%arg0: i32) -> (i32, i32) {
    %c0_i32 = arith.constant 0 : i32
    %c0_i32_0 = arith.constant 0 : i32
    %c0_i32_1 = arith.constant 0 : i32
    return %c0_i32, %c0_i32_0 : i32, i32
  }
  func.func @transform_7(%arg0: i32) -> (i32, i32) {
    %c0_i32 = arith.constant 0 : i32
    %c0_i32_0 = arith.constant 0 : i32
    %c0_i32_1 = arith.constant 0 : i32
    return %c0_i32, %c0_i32_0 : i32, i32
  }
  func.func @transform_8(%arg0: i32) -> (i32, i32) {
    %c0_i32 = arith.constant 0 : i32
    %c0_i32_0 = arith.constant 0 : i32
    %c0_i32_1 = arith.constant 0 : i32
    return %c0_i32, %c0_i32_0 : i32, i32
  }
  func.func @transform_9(%arg0: i32) -> (i32, i32) {
    %c0_i32 = arith.constant 0 : i32
    %c0_i32_0 = arith.constant 0 : i32
    %c0_i32_1 = arith.constant 0 : i32
    return %c0_i32, %c0_i32_0 : i32, i32
  }
  func.func @transform_10(%arg0: i32) -> (i32, i32) {
    %c0_i32 = arith.constant 0 : i32
    %c0_i32_0 = arith.constant 0 : i32
    %c0_i32_1 = arith.constant 0 : i32
    return %c0_i32, %c0_i32_0 : i32, i32
  }
  func.func @transform_11(%arg0: i32) -> (i32, i32, i32, i32) {
    %c0_i32 = arith.constant 0 : i32
    %c0_i32_0 = arith.constant 0 : i32
    %c0_i32_1 = arith.constant 0 : i32
    %c0_i32_2 = arith.constant 0 : i32
    return %arg0, %c0_i32, %c0_i32_0, %c0_i32_1 : i32, i32, i32, i32
  }
}

</mosaic_0001>

<bundles_post_ra>
// kernel: tpu_custom_call.1
= control target key start
LH: loop header
LB: loop body
LE: loop exit
PB: predicated region body
PF: predicated region fallthrough
CT: control target
= control target key end

     0   :  { %s6389_s0 = inlined_call_operand.hbm [shape: f32[32,8,256], index: 0, kind: input, shape index: {}]   ;;  %s6390_s1 = inlined_call_operand.hbm [shape: f32[256,512], index: 1, kind: input, shape index: {}]   ;;  %s6391_s2 = inlined_call_operand.hbm [shape: f32[1,512], index: 2, kind: input, shape index: {}]   ;;  %s6392_s3 = inlined_call_operand.hbm [shape: f32[256,128], index: 3, kind: input, shape index: {}]   ;;  %s6393_s4 = inlined_call_operand.hbm [shape: f32[1,128], index: 4, kind: input, shape index: {}]   ;;  %s6394_s5 = inlined_call_operand.hbm [shape: f32[128,128], index: 5, kind: input, shape index: {}]   ;;  %s6395_s6 = inlined_call_operand.hbm [shape: f32[1,128], index: 6, kind: input, shape index: {}]   ;;  %s6396_s7 = inlined_call_operand.hbm [shape: f32[256,128], index: 7, kind: input, shape index: {}]   ;;  %s6397_s8 = inlined_call_operand.hbm [shape: f32[1,128], index: 8, kind: input, shape index: {}]   ;;  %s6398_s9 = inlined_call_operand.hbm [shape: f32[128,128], index: 9, kind: input, shape index: {}]   ;;  %s6399_s10 = inlined_call_operand.hbm [shape: f32[1,128], index: 10, kind: input, shape index: {}]   ;;  %s6400_s11 = inlined_call_operand.hbm [shape: f32[32,8,8,256], index: 11, kind: output, shape index: {}]  }
   0x1   :  { %6407 = sst [smem:[#allocation29_spill]] %s6389_s0 }
   0x2   :  { %6408 = sst [smem:[#allocation30_spill]] %s6390_s1 }
   0x3   :  { %6409 = sst [smem:[#allocation31_spill]] %s6400_s11 }
   0x4   :  { %16 = vsyncpa [#allocation3], 0 }
   0x5   :  { %18 = vsyncpa [#allocation3 + $0x1], 0 }
   0x6   :  { %19 = vsyncpa [#allocation6], 0 }
   0x7   :  { %20 = vsyncpa [#allocation9], 0 }
   0x8   :  { %21 = vsyncpa [#allocation12], 0 }
   0x9   :  { %22 = vsyncpa [#allocation15], 0 }
   0xa   :  { %23 = vsyncpa [#allocation18], 0 }
   0xb   :  { %24 = vsyncpa [#allocation4], 0 }
   0xc   :  { %26 = vsyncpa [#allocation4 + $0x1], 0  ;;  %s4997_s17 = smov 0   ;;  %s4999_s18 = smov 0  }
   0xd   :  { %s5001_s19 = smov 0   ;;  %s5003_s20 = smov 0  }
   0xe LB: > { %s4916_s21 = smov [#allocation5]   ;;  %s5018_s23 = sadd.s32 4294967295, %s4914_s20   ;;  %s4914_s20 = sphi %s5003_s20, %s6441_s20   ;;  %s4910_s19 = sphi %s5001_s19, %s6440_s19   ;;  %s4906_s18 = sphi %s4999_s18, %s6439_s18   ;;  %s4902_s17 = sphi %s4997_s17, %s6438_s17  }
   0xf   : > { %s311_s22 = sshll.u32 %s4916_s21, 4  ;;  %p3727_p0 = scmp.ge.s32.totalorder %s4914_s20, 1  ;;  %s5023_s22 = int_to_ptr.vmem [resolvable:$true] %s311_s22 }
  0x10   : > { %p6404_p1 = scmp.eq.s32.totalorder %s5018_s23, 0  ;;  %p299_p2 = scmp.lt.s32.totalorder %s4914_s20, 3 }
  0x11   : > { %s4917_s25 = smov [#allocation8]   ;;  %s4918_s28 = smov [#allocation11]  }
  0x12   : > { %p5025_p3 = pnand %p3727_p0, %p299_p2  ;;  %s335_s26 = sshll.u32 %s4917_s25, 4  ;;  %s5038_s26 = int_to_ptr.vmem [resolvable:$true] %s335_s26 }
  0x13   : > { %s5040_s29 = sshll.u32 %s4918_s28, 4  ;;  %s6413_s1 = sld [smem:[#allocation30_spill]]  ;;  %s360_s29 = int_to_ptr.vmem [resolvable:$true] %s5040_s29 }
  0x14   : > { %s6410_s24 = scalar_select %p5025_p3, 1, 0 }
  0x15   : > { %p4406_p5 = pneg %p5025_p3 }
  0x16   : > { %6411 = sst [smem:[#allocation28_spill]] %s6410_s24 }
  0x17   : > { %p5034_p6 = pnand %p4406_p5, %p6404_p1 }
  0x19   : > { %s4518_s13 = scalar_lea.hbm %s6413_s1, 16384  ;;  %p5050_p8 = pneg %p5034_p6 }
  0x1a   : > { %p4519_p7 = scmp.ne.s32.totalorder %s6413_s1, %s4518_s13  ;;  %p4525_p11 = scmp.lt.u32.totalorder %s4518_s13, %s6413_s1 }
  0x1c   : > { %p4521_p9 = pnand %p5050_p8, %p4519_p7 }
  0x1e   : > { %p4522_p10 = pneg %p4521_p9 }
  0x20   : > { %p4527_p12 = pnand %p4525_p11, %p4522_p10 }
  0x22   : > { %4530 = shalt.err (!%p4527_p12)
}
  0x23   : > { %s4531_s28 = scalar_lea.vmem %s5023_s22, 16384  ;;  %p4539_p5 = scmp.lt.s32.totalorder %s5023_s22, %s5023_s22 }
  0x24   : > { %p4532_p13 = scmp.ne.s32.totalorder %s5023_s22, %s4531_s28  ;;  %p4540_p4 = scmp.lt.s32.totalorder %s4531_s28, %s4531_s28 }
  0x26   : > { %p4534_p0 = pnand %p4532_p13, %p5050_p8  ;;  %p4541_p7 = por %p4540_p4, %p4539_p5 }
  0x28   : > { %p4535_p2 = pneg %p4534_p0 }
  0x2a   : > { %p4542_p9 = pnand %p4541_p7, %p4535_p2 }
  0x2c   : > { %4545 = shalt.err (!%p4542_p9)
}
  0x2d   : > { %s4919_s30 = smov 512   ;;  %s4920_s12 = smov 32  }
  0x2e   : > { %4409 = dma.hbm_to_vmem [thread:$0]  (!%p5034_p6), %s6413_s1, 16384, %s5023_s22, [#allocation6], %s4919_s30, %s4919_s30, %s4920_s12  }
  0x2f   : > { %s4546_s25 = scalar_lea.hbm %s6392_s3, 4096 }
  0x30   : > { %p4547_p4 = scmp.ne.s32.totalorder %s6392_s3, %s4546_s25  ;;  %p4553_p12 = scmp.lt.u32.totalorder %s4546_s25, %s6392_s3 }
  0x32   : > { %p4549_p10 = pnand %p4547_p4, %p5050_p8 }
  0x34   : > { %p4550_p11 = pneg %p4549_p10 }
  0x36   : > { %p4555_p13 = pnand %p4553_p12, %p4550_p11 }
  0x38   : > { %4558 = shalt.err (!%p4555_p13)
}
  0x39   : > { %s4559_s22 = scalar_lea.vmem %s5038_s26, 4096  ;;  %p4567_p7 = scmp.lt.s32.totalorder %s5038_s26, %s5038_s26 }
  0x3a   : > { %p4560_p0 = scmp.ne.s32.totalorder %s5038_s26, %s4559_s22  ;;  %p4568_p9 = scmp.lt.s32.totalorder %s4559_s22, %s4559_s22 }
  0x3c   : > { %p4562_p2 = pnand %p4560_p0, %p5050_p8  ;;  %p4569_p4 = por %p4568_p9, %p4567_p7 }
  0x3e   : > { %p4563_p5 = pneg %p4562_p2 }
  0x40   : > { %p4570_p10 = pnand %p4569_p4, %p4563_p5 }
  0x42   : > { %4573 = shalt.err (!%p4570_p10)
}
  0x43   : > { %s4921_s11 = smov 128   ;;  %s4922_s0 = smov 8  }
  0x44   : > { %4415 = dma.hbm_to_vmem [thread:$0]  (!%p5034_p6), %s6392_s3, 4096, %s5038_s26, [#allocation9], %s4921_s11, %s4921_s11, %s4922_s0  }
  0x45   : > { %s4574_s14 = scalar_lea.hbm %s6394_s5, 2048 }
  0x46   : > { %p4575_p11 = scmp.ne.s32.totalorder %s6394_s5, %s4574_s14  ;;  %p4581_p0 = scmp.lt.u32.totalorder %s4574_s14, %s6394_s5 }
  0x48   : > { %p4577_p12 = pnand %p4575_p11, %p5050_p8 }
  0x4a   : > { %p4578_p13 = pneg %p4577_p12 }
  0x4c   : > { %p4583_p2 = pnand %p4581_p0, %p4578_p13 }
  0x4e   : > { %4586 = shalt.err (!%p4583_p2)
}
  0x4f   : > { %s4587_s22 = scalar_lea.vmem %s360_s29, 2048  ;;  %p4595_p4 = scmp.lt.s32.totalorder %s360_s29, %s360_s29 }
  0x50   : > { %p4588_p5 = scmp.ne.s32.totalorder %s360_s29, %s4587_s22  ;;  %p4596_p10 = scmp.lt.s32.totalorder %s4587_s22, %s4587_s22 }
  0x52   : > { %p4590_p7 = pnand %p4588_p5, %p5050_p8  ;;  %p4597_p1 = por %p4596_p10, %p4595_p4 }
  0x54   : > { %p4591_p9 = pneg %p4590_p7 }
  0x56   : > { %p4598_p3 = pnand %p4597_p1, %p4591_p9 }
  0x58   : > { %4601 = shalt.err (!%p4598_p3)
}
  0x59   : > { %4421 = dma.hbm_to_vmem [thread:$0]  (!%p5034_p6), %s6394_s5, 2048, %s360_s29, [#allocation12], %s4921_s11, %s4921_s11, %s4922_s0  }
  0x5a   : > { %s4923_s30 = smov [#allocation14]   ;;  %s4924_s13 = smov [#allocation17]  }
  0x5b   : > { %s383_s12 = sshll.u32 %s4923_s30, 4  ;;  %s407_s14 = sshll.u32 %s4924_s13, 4  ;;  %s384_s12 = int_to_ptr.vmem [resolvable:$true] %s383_s12  ;;  %s408_s14 = int_to_ptr.vmem [resolvable:$true] %s407_s14 }
  0x5c   : > { %s4602_s25 = scalar_lea.hbm %s6396_s7, 4096 }
  0x5d   : > { %p4603_p1 = scmp.ne.s32.totalorder %s6396_s7, %s4602_s25  ;;  %p4609_p12 = scmp.lt.u32.totalorder %s4602_s25, %s6396_s7 }
  0x5f   : > { %p4605_p3 = pnand %p4603_p1, %p5050_p8 }
  0x61   : > { %p4606_p11 = pneg %p4605_p3 }
  0x63   : > { %p4611_p13 = pnand %p4609_p12, %p4606_p11 }
  0x65   : > { %4614 = shalt.err (!%p4611_p13)
}
  0x66   : > { %s4615_s29 = scalar_lea.vmem %s384_s12, 4096  ;;  %p4623_p7 = scmp.lt.s32.totalorder %s384_s12, %s384_s12 }
  0x67   : > { %p4616_p0 = scmp.ne.s32.totalorder %s384_s12, %s4615_s29  ;;  %p4624_p9 = scmp.lt.s32.totalorder %s4615_s29, %s4615_s29 }
  0x69   : > { %p4618_p2 = pnand %p4616_p0, %p5050_p8  ;;  %p4625_p4 = por %p4624_p9, %p4623_p7 }
  0x6b   : > { %p4619_p5 = pneg %p4618_p2 }
  0x6d   : > { %p4626_p10 = pnand %p4625_p4, %p4619_p5 }
  0x6f   : > { %4629 = shalt.err (!%p4626_p10)
}
  0x70   : > { %4427 = dma.hbm_to_vmem [thread:$0]  (!%p5034_p6), %s6396_s7, 4096, %s384_s12, [#allocation15], %s4921_s11, %s4921_s11, %s4922_s0  }
  0x71   : > { %s4630_s15 = scalar_lea.hbm %s6398_s9, 2048 }
  0x72   : > { %p4631_p1 = scmp.ne.s32.totalorder %s6398_s9, %s4630_s15  ;;  %p4637_p12 = scmp.lt.u32.totalorder %s4630_s15, %s6398_s9 }
  0x74   : > { %p4633_p3 = pnand %p4631_p1, %p5050_p8 }
  0x76   : > { %p4634_p11 = pneg %p4633_p3 }
  0x78   : > { %p4639_p13 = pnand %p4637_p12, %p4634_p11 }
  0x7a   : > { %4642 = shalt.err (!%p4639_p13)
}
  0x7b   : > { %s4643_s26 = scalar_lea.vmem %s408_s14, 2048  ;;  %p4651_p7 = scmp.lt.s32.totalorder %s408_s14, %s408_s14 }
  0x7c   : > { %p4644_p0 = scmp.ne.s32.totalorder %s408_s14, %s4643_s26  ;;  %p4652_p9 = scmp.lt.s32.totalorder %s4643_s26, %s4643_s26 }
  0x7e   : > { %p4646_p2 = pnand %p4644_p0, %p5050_p8  ;;  %p4653_p4 = por %p4652_p9, %p4651_p7 }
  0x80   : > { %p4647_p5 = pneg %p4646_p2 }
  0x82   : > { %p4654_p10 = pnand %p4653_p4, %p4647_p5 }
  0x84   : > { %4657 = shalt.err (!%p4654_p10)
}
  0x85   : > { %4433 = dma.hbm_to_vmem [thread:$0]  (!%p5034_p6), %s6398_s9, 2048, %s408_s14, [#allocation18], %s4921_s11, %s4921_s11, %s4922_s0  }
  0x86   : > { %s4925_s1 = smov [#allocation7]   ;;  %s4926_s30 = smov [#allocation10]  }
  0x87   : > { %s325_s24 = sshll.u32 %s4925_s1, 4  ;;  %s349_s13 = sshll.u32 %s4926_s30, 4  ;;  %s326_s24 = int_to_ptr.vmem [resolvable:$true] %s325_s24  ;;  %s350_s13 = int_to_ptr.vmem [resolvable:$true] %s349_s13 }
  0x88   : > { %s4658_s25 = scalar_lea.hbm %s6391_s2, 64 }
  0x89   : > { %p4659_p1 = scmp.ne.s32.totalorder %s6391_s2, %s4658_s25  ;;  %p4665_p12 = scmp.lt.u32.totalorder %s4658_s25, %s6391_s2 }
  0x8b   : > { %p4661_p3 = pnand %p4659_p1, %p5050_p8 }
  0x8d   : > { %p4662_p11 = pneg %p4661_p3 }
  0x8f   : > { %p4667_p13 = pnand %p4665_p12, %p4662_p11 }
  0x91   : > { %4670 = shalt.err (!%p4667_p13)
}
  0x92   : > { %s4671_s11 = scalar_lea.vmem %s326_s24, 64  ;;  %p4679_p7 = scmp.lt.s32.totalorder %s326_s24, %s326_s24 }
  0x93   : > { %p4672_p0 = scmp.ne.s32.totalorder %s326_s24, %s4671_s11  ;;  %p4680_p9 = scmp.lt.s32.totalorder %s4671_s11, %s4671_s11 }
  0x95   : > { %p4674_p2 = pnand %p4672_p0, %p5050_p8  ;;  %p4681_p4 = por %p4680_p9, %p4679_p7 }
  0x97   : > { %p4675_p5 = pneg %p4674_p2 }
  0x99   : > { %p4682_p10 = pnand %p4681_p4, %p4675_p5 }
  0x9b   : > { %4685 = shalt.err (!%p4682_p10)
}
  0x9c   : > { %4412 = dma.hbm_to_vmem [thread:$0]  (!%p5034_p6), %s6391_s2, 64, %s326_s24, [#allocation6]  }
  0x9d   : > { %s4686_s30 = scalar_lea.hbm %s6393_s4, 16 }
  0x9e   : > { %p4687_p1 = scmp.ne.s32.totalorder %s6393_s4, %s4686_s30  ;;  %p4693_p12 = scmp.lt.u32.totalorder %s4686_s30, %s6393_s4 }
  0xa0   : > { %p4689_p3 = pnand %p4687_p1, %p5050_p8 }
  0xa2   : > { %p4690_p11 = pneg %p4689_p3 }
  0xa4   : > { %p4695_p13 = pnand %p4693_p12, %p4690_p11 }
  0xa6   : > { %4698 = shalt.err (!%p4695_p13)
}
  0xa7   : > { %s4699_s22 = scalar_lea.vmem %s350_s13, 16  ;;  %s4706_s24 = scalar_lea.vmem %s350_s13, 32 }
  0xa8   : > { %p4700_p0 = scmp.ne.s32.totalorder %s350_s13, %s4699_s22  ;;  %p4707_p7 = scmp.lt.s32.totalorder %s350_s13, %s350_s13 }
  0xa9   : > { %p4708_p9 = scmp.lt.s32.totalorder %s4706_s24, %s4699_s22 }
  0xaa   : > { %p4702_p2 = pnand %p4700_p0, %p5050_p8 }
  0xab   : > { %p4709_p4 = por %p4708_p9, %p4707_p7 }
  0xac   : > { %p4703_p5 = pneg %p4702_p2 }
  0xae   : > { %p4710_p10 = pnand %p4709_p4, %p4703_p5 }
  0xb0   : > { %4713 = shalt.err (!%p4710_p10)
}
  0xb1   : > { %4418 = dma.hbm_to_vmem [thread:$0]  (!%p5034_p6), %s6393_s4, 16, %s350_s13, [#allocation9]  }
  0xb2   : > { %s4927_s11 = smov [#allocation13]   ;;  %s4928_s14 = smov [#allocation16]  }
  0xb3   : > { %s373_s0 = sshll.u32 %s4927_s11, 4  ;;  %s397_s29 = sshll.u32 %s4928_s14, 4  ;;  %s374_s0 = int_to_ptr.vmem [resolvable:$true] %s373_s0  ;;  %s398_s29 = int_to_ptr.vmem [resolvable:$true] %s397_s29 }
  0xb4   : > { %s4714_s15 = scalar_lea.hbm %s6395_s6, 16 }
  0xb5   : > { %p4715_p1 = scmp.ne.s32.totalorder %s6395_s6, %s4714_s15  ;;  %p4721_p12 = scmp.lt.u32.totalorder %s4714_s15, %s6395_s6 }
  0xb7   : > { %p4717_p3 = pnand %p4715_p1, %p5050_p8 }
  0xb9   : > { %p4718_p11 = pneg %p4717_p3 }
  0xbb   : > { %p4723_p13 = pnand %p4721_p12, %p4718_p11 }
  0xbd   : > { %4726 = shalt.err (!%p4723_p13)
}
  0xbe   : > { %s4727_s13 = scalar_lea.vmem %s374_s0, 16  ;;  %s4734_s24 = scalar_lea.vmem %s374_s0, 32 }
  0xbf   : > { %p4728_p0 = scmp.ne.s32.totalorder %s374_s0, %s4727_s13  ;;  %p4735_p7 = scmp.lt.s32.totalorder %s374_s0, %s374_s0 }
  0xc0   : > { %p4736_p9 = scmp.lt.s32.totalorder %s4734_s24, %s4727_s13 }
  0xc1   : > { %p4730_p2 = pnand %p4728_p0, %p5050_p8 }
  0xc2   : > { %p4737_p4 = por %p4736_p9, %p4735_p7 }
  0xc3   : > { %p4731_p5 = pneg %p4730_p2 }
  0xc5   : > { %p4738_p10 = pnand %p4737_p4, %p4731_p5 }
  0xc7   : > { %4741 = shalt.err (!%p4738_p10)
}
  0xc8   : > { %4424 = dma.hbm_to_vmem [thread:$0]  (!%p5034_p6), %s6395_s6, 16, %s374_s0, [#allocation12]  }
  0xc9   : > { %s4742_s1 = scalar_lea.hbm %s6397_s8, 16 }
  0xca   : > { %p4743_p1 = scmp.ne.s32.totalorder %s6397_s8, %s4742_s1  ;;  %p4749_p12 = scmp.lt.u32.totalorder %s4742_s1, %s6397_s8 }
  0xcc   : > { %p4745_p3 = pnand %p4743_p1, %p5050_p8 }
  0xce   : > { %p4746_p11 = pneg %p4745_p3 }
  0xd0   : > { %p4751_p13 = pnand %p4749_p12, %p4746_p11 }
  0xd2   : > { %4754 = shalt.err (!%p4751_p13)
}
  0xd3   : > { %s4755_s28 = scalar_lea.vmem %s398_s29, 16  ;;  %s4762_s0 = scalar_lea.vmem %s398_s29, 32 }
  0xd4   : > { %p4756_p0 = scmp.ne.s32.totalorder %s398_s29, %s4755_s28  ;;  %p4763_p7 = scmp.lt.s32.totalorder %s398_s29, %s398_s29 }
  0xd5   : > { %p4764_p9 = scmp.lt.s32.totalorder %s4762_s0, %s4755_s28 }
  0xd6   : > { %p4758_p2 = pnand %p4756_p0, %p5050_p8 }
  0xd7   : > { %p4765_p4 = por %p4764_p9, %p4763_p7 }
  0xd8   : > { %p4759_p5 = pneg %p4758_p2 }
  0xda   : > { %p4766_p10 = pnand %p4765_p4, %p4759_p5 }
  0xdc   : > { %4769 = shalt.err (!%p4766_p10)
}
  0xdd   : > { %4430 = dma.hbm_to_vmem [thread:$0]  (!%p5034_p6), %s6397_s8, 16, %s398_s29, [#allocation15]  }
  0xde   : > { %s4929_s24 = smov [#allocation19]   ;;  %s4770_s14 = scalar_lea.hbm %s6399_s10, 16 }
  0xdf   : > { %s421_s26 = sshll.u32 %s4929_s24, 4  ;;  %p4771_p1 = scmp.ne.s32.totalorder %s6399_s10, %s4770_s14  ;;  %s422_s26 = int_to_ptr.vmem [resolvable:$true] %s421_s26 }
  0xe0   : > { %p4777_p12 = scmp.lt.u32.totalorder %s4770_s14, %s6399_s10 }
  0xe1   : > { %p4773_p3 = pnand %p4771_p1, %p5050_p8 }
  0xe3   : > { %p4774_p11 = pneg %p4773_p3 }
  0xe5   : > { %p4779_p13 = pnand %p4777_p12, %p4774_p11 }
  0xe7   : > { %4782 = shalt.err (!%p4779_p13)
}
  0xe8   : > { %s4783_s29 = scalar_lea.vmem %s422_s26, 16  ;;  %s4790_s25 = scalar_lea.vmem %s422_s26, 32 }
  0xe9   : > { %p4784_p0 = scmp.ne.s32.totalorder %s422_s26, %s4783_s29  ;;  %p4791_p7 = scmp.lt.s32.totalorder %s422_s26, %s422_s26 }
  0xea   : > { %p4792_p9 = scmp.lt.s32.totalorder %s4790_s25, %s4783_s29 }
  0xeb   : > { %p4786_p2 = pnand %p4784_p0, %p5050_p8 }
  0xec   : > { %p4793_p4 = por %p4792_p9, %p4791_p7 }
  0xed   : > { %p4787_p5 = pneg %p4786_p2 }
  0xef   : > { %p4794_p10 = pnand %p4793_p4, %p4787_p5 }
  0xf1   : > { %4797 = shalt.err (!%p4794_p10)
}
  0xf2   : > { %4436 = dma.hbm_to_vmem [thread:$0]  (!%p5034_p6), %s6399_s10, 16, %s422_s26, [#allocation18]  }
  0xf3   : > { %s3726_s16 = sadd.s32 4294967294, %s4914_s20   ;;  %s5253_s27 = sadd.s32 1, %s4914_s20  }
  0xf4   : > { %s36_s22 = ssub.s32 %s4914_s20, %s5253_s27  ;;  %s39_s13 = sadd.s32 1, %s4910_s19 }
  0xf5   : > { %p37_p8 = scmp.eq.s32.totalorder %s36_s22, 0  ;;  %p46_p1 = scmp.ne.s32.totalorder %s4910_s19, %s4906_s18 }
  0xf6   : > { %p47_p3 = scmp.eq.s32.totalorder %s4914_s20, 0  ;;  %p52_p11 = scmp.ne.s32.totalorder %s4906_s18, %s4902_s17 }
  0xf7   : > { %s5264_s24 = scalar_select %p37_p8, %s4910_s19, %s39_s13  }
  0xf8   : > { %p5266_p12 = por %p47_p3, %p46_p1  ;;  %p6416_p13 = scmp.eq.s32.totalorder %s5018_s23, 0 }
  0xf9   : > { %p286_p0 = scmp.eq.s32.totalorder %s5018_s23, 1  ;;  %p292_p2 = scmp.eq.s32.totalorder %s3726_s16, 1 }
  0xfa   : > { %p5272_p6 = por %p6416_p13, %p52_p11  ;;  %p4455_p5 = scmp.lt.s32.totalorder %s4914_s20, 2 }
  0xfb   : > { %s432_s11 = sand.u32 1, %s4910_s19   ;;  %p5279_p7 = por %p286_p0, %p46_p1 }
  0xfc   : > { %p5283_p9 = por %p292_p2, %p52_p11  ;;  %s3739_s30 = sshll.u32 %s432_s11, 8 }
  0xfd   : > { %s6418_s14 = scalar_select %p5279_p7, 1, 0 }
  0xfe   : > { %s6419_s1 = scalar_select %p5283_p9, 1, 0 }
  0xff   : > { %s3767_s15 = sshll.u32 %s4914_s20, 12  ;;  %s6420_s25 = sld [smem:[#allocation29_spill]] }
 0x100   : > { %s436_s0 = scalar_lea.vmem [#allocation2], %s3739_s30  ;;  %p5297_p4 = pnand %p4455_p5, %p5266_p12 }
 0x101   : > { %s444_s16 = sshll.u32 %s436_s0, 4  ;;  %s5301_s13 = scalar_lea.sflag [#allocation3], %s432_s11  ;;  %s5293_s16 = int_to_ptr.vmem [resolvable:$true] %s444_s16 }
 0x102   : > { %p4800_p8 = pneg %p5297_p4 }
 0x105   : > { %s5291_s28 = scalar_lea.hbm %s6420_s25, %s3767_s15  ;;  %s4803_s12 = scalar_lea.hbm %s6420_s25, 8192 }
 0x106   : > { %s4798_s21 = scalar_lea.hbm %s5291_s28, 4096  ;;  %p4804_p11 = scmp.lt.u32.totalorder %s5291_s28, %s6420_s25 }
 0x107   : > { %p4799_p10 = scmp.ne.s32.totalorder %s5291_s28, %s4798_s21  ;;  %p4805_p12 = scmp.lt.u32.totalorder %s4803_s12, %s4798_s21 }
 0x108   : > { %p4807_p0 = scmp.lt.u32.totalorder %s4798_s21, %s5291_s28 }
 0x109   : > { %p4801_p1 = pnand %p4800_p8, %p4799_p10  ;;  %p4806_p13 = por %p4805_p12, %p4804_p11 }
 0x10b   : > { %p4802_p3 = pneg %p4801_p1  ;;  %p4808_p2 = por %p4807_p0, %p4806_p13 }
 0x10d   : > { %p4809_p5 = pnand %p4808_p2, %p4802_p3 }
 0x10f   : > { %4812 = shalt.err (!%p4809_p5)
}
 0x110   : > { %s4813_s11 = scalar_lea.vmem %s5293_s16, 4096  ;;  %s4930_s30 = smov [#allocation2]  }
 0x111   : > { %p4814_p10 = scmp.ne.s32.totalorder %s5293_s16, %s4813_s11  ;;  %s4818_s15 = sshll.u32 %s4930_s30, 4  ;;  %s4819_s15 = int_to_ptr.vmem [resolvable:$false] %s4818_s15 }
 0x112   : > { %s4820_s29 = scalar_lea.vmem %s4819_s15, 8192  ;;  %p4821_p7 = scmp.lt.s32.totalorder %s5293_s16, %s4819_s15 }
 0x113   : > { %p4816_p1 = pnand %p4814_p10, %p4800_p8  ;;  %p4822_p11 = scmp.lt.s32.totalorder %s4820_s29, %s4813_s11 }
 0x115   : > { %p4817_p9 = pneg %p4816_p1  ;;  %p4823_p12 = por %p4822_p11, %p4821_p7 }
 0x117   : > { %p4824_p13 = pnand %p4823_p12, %p4817_p9 }
 0x119   : > { %4827 = shalt.err (!%p4824_p13)
}
 0x11a   : > { %s4931_s21 = smov 256   ;;  %s4932_s12 = smov 16  }
 0x11b   : > { %4440 = dma.hbm_to_vmem [thread:$0]  (!%p5297_p4), %s5291_s28, 4096, %s5293_s16, %s5301_s13, %s4931_s21, %s4931_s21, %s4932_s12  }
 0x11c   : > { %s6422_s0 = sld [smem:[#allocation28_spill]] }
 0x122   : > { %p6423_p8 = scmp.ne.s32.totalorder %s6422_s0, 0 }
 0x123   : > { %s5332_s30 = sand.u32 (!%p6423_p8), 1, %s4906_s18  }
 0x124   : > { %456 = sbr.rel (%p6423_p8) target bundleno = 1435 (0x59b), region = 64  ;;  %s3744_s11 = sshll.u32 (!%p6423_p8), %s5332_s30, 8 }
 0x125   : > { %s459_s15 = scalar_lea.sflag (!%p6423_p8), [#allocation3], %s5332_s30  ;;  %s5336_s29 = scalar_lea.vmem (!%p6423_p8), [#allocation2], %s3744_s11 }
 0x12b   : > { %4873 = dma.done.wait (%p5272_p6), %s459_s15, 4096  }
 0x12c   : > { %4875 = vsyncadd (%p5272_p6), %s459_s15, 4294963200  ;;  %p6424_p7 = scmp.eq.s32.totalorder %s5018_s23, 0 }
 0x12e   : > { %4877 = dma.done.wait (%p6424_p7), [#allocation6], 16448   ;;  %p6425_p9 = pmov %p6424_p7 }
 0x12f   : > { %p6426_p4 = pmov %p6424_p7 }
 0x130   : > { %4879 = vsyncadd (%p6425_p9), [#allocation6], 4294950848 }
 0x131   : > { %4881 = dma.done.wait (%p6426_p4), [#allocation9], 4112   ;;  %p6427_p3 = pmov %p6426_p4 }
 0x133   : > { %4883 = vsyncadd (%p6427_p3), [#allocation9], 4294963184  ;;  %p6428_p0 = pmov %p6427_p3 }
 0x135   : > { %4885 = dma.done.wait (%p6428_p0), [#allocation12], 2064   ;;  %p6429_p2 = pmov %p6428_p0 }
 0x136   : > { %p6430_p6 = pmov %p6428_p0 }
 0x137   : > { %4887 = vsyncadd (%p6429_p2), [#allocation12], 4294965232 }
 0x138   : > { %4889 = dma.done.wait (%p6430_p6), [#allocation15], 4112   ;;  %p6431_p5 = pmov %p6428_p0 }
 0x139   : > { %p6432_p10 = pmov %p6428_p0 }
 0x13a   : > { %4891 = vsyncadd (%p6431_p5), [#allocation15], 4294963184 }
 0x13b   : > { %4893 = dma.done.wait (%p6432_p10), [#allocation18], 2064   ;;  %p6433_p1 = pmov %p6428_p0 }
 0x13c   : > { %v576_v0 = vld [vmem:[#allocation5 + $0x8] sm:$0xff]  ;;  %v575_v2 = vld [vmem:[#allocation5] sm:$0xff]  ;;  %s3755_s26 = sshll.u32 %s5332_s30, 11  ;;  %s3769_s16 = sshll.u32 %s5018_s23, 15 }
 0x13d   : > { %4895 = vsyncadd (%p6433_p1), [#allocation18], 4294965232  ;;  %v580_v1 = vld [vmem:[#allocation5 + $0x28] sm:$0xff]  ;;  %v579_v4 = vld [vmem:[#allocation5 + $0x20] sm:$0xff]  ;;  %s5742_s28 = scalar_lea.vmem [#allocation20], %s3755_s26  ;;  %s6434_s12 = sld [smem:[#allocation31_spill]] }
 0x13e   : > { %v4106_v3 = vpack.c.bf16 %v580_v1, %v576_v0  ;;  %v584_v5 = vld [vmem:[#allocation5 + $0x48] sm:$0xff]  ;;  %v4108_v7 = vpack.c.bf16 %v579_v4, %v575_v2  ;;  %v583_v9 = vld [vmem:[#allocation5 + $0x40] sm:$0xff]  ;;  %s3558_s22 = sshll.u32 %s5742_s28, 4  ;;  %s3544_s23 = scalar_lea.sflag [#allocation4], %s5332_s30  ;;  %s6328_s22 = int_to_ptr.vmem [resolvable:$true] %s3558_s22 }
 0x13f   : > { %v588_v6 = vld [vmem:[#allocation5 + $0x68] sm:$0xff]  ;;  %v587_v10 = vld [vmem:[#allocation5 + $0x60] sm:$0xff]  ;;  %s4828_s11 = scalar_lea.vmem %s6328_s22, 32768  ;;  %p6435_p12 = scmp.ne.s32.totalorder %s6418_s14, 0 }
 0x140   : > { %v4110_v8 = vpack.c.bf16 %v588_v6, %v584_v5  ;;  %v592_v11 = vld [vmem:[#allocation5 + $0x88] sm:$0xff]  ;;  %4107 = vmatprep.subr.bf16.mxu0 %v4106_v3  ;;  %v4112_v13 = vpack.c.bf16 %v587_v10, %v583_v9  ;;  %v591_v15 = vld [vmem:[#allocation5 + $0x80] sm:$0xff]  ;;  %p4829_p11 = scmp.ne.s32.totalorder %s6328_s22, %s4828_s11  ;;  %s4934_s15 = smov [#allocation20]  }
 0x141   : > { %v596_v12 = vld [vmem:[#allocation5 + $0xa8] sm:$0xff]  ;;  %4109 = vmatpush1.bf16.msra.mxu0 %v4108_v7  ;;  %v595_v16 = vld [vmem:[#allocation5 + $0xa0] sm:$0xff] }
 0x142   : > { %4111 = vmatprep.subr.bf16.mxu0 %v4110_v8  ;;  %v4114_v14 = vpack.c.bf16 %v596_v12, %v592_v11  ;;  %v600_v17 = vld [vmem:[#allocation5 + $0xc8] sm:$0xff]  ;;  %v4116_v19 = vpack.c.bf16 %v595_v16, %v591_v15  ;;  %v599_v21 = vld [vmem:[#allocation5 + $0xc0] sm:$0xff]  ;;  %p4830_p13 = pnand %p4829_p11, %p6435_p12 }
 0x143   : > { %v604_v18 = vld [vmem:[#allocation5 + $0xe8] sm:$0xff]  ;;  %v603_v22 = vld [vmem:[#allocation5 + $0xe0] sm:$0xff]  ;;  %s6326_s0 = scalar_lea.hbm %s6434_s12, %s3769_s16 }
 0x144   : > { %v4118_v20 = vpack.c.bf16 %v604_v18, %v600_v17  ;;  %v608_v23 = vld [vmem:[#allocation5 + $0x108] sm:$0xff]  ;;  %v4120_v25 = vpack.c.bf16 %v603_v22, %v599_v21  ;;  %v607_v27 = vld [vmem:[#allocation5 + $0x100] sm:$0xff]  ;;  %p4831_p8 = pneg %p4830_p13 }
 0x145   : > { %4113 = vmatpush1.bf16.msra.mxu0 %v4112_v13  ;;  %v612_v24 = vld [vmem:[#allocation5 + $0x128] sm:$0xff]  ;;  %v611_v28 = vld [vmem:[#allocation5 + $0x120] sm:$0xff] }
 0x146   : > { %4115 = vmatprep.subr.bf16.mxu0 %v4114_v14  ;;  %v4122_v26 = vpack.c.bf16 %v612_v24, %v608_v23  ;;  %v616_v29 = vld [vmem:[#allocation5 + $0x148] sm:$0xff]  ;;  %v4124_v31 = vpack.c.bf16 %v611_v28, %v607_v27  ;;  %v615_v33 = vld [vmem:[#allocation5 + $0x140] sm:$0xff] }
 0x147   : > { %v620_v30 = vld [vmem:[#allocation5 + $0x168] sm:$0xff]  ;;  %v619_v34 = vld [vmem:[#allocation5 + $0x160] sm:$0xff] }
 0x148   : > { %v4126_v32 = vpack.c.bf16 %v620_v30, %v616_v29  ;;  %v624_v35 = vld [vmem:[#allocation5 + $0x188] sm:$0xff]  ;;  %v4128_v37 = vpack.c.bf16 %v619_v34, %v615_v33  ;;  %v623_v39 = vld [vmem:[#allocation5 + $0x180] sm:$0xff] }
 0x149   : > { %4117 = vmatpush1.bf16.msra.mxu0 %v4116_v19  ;;  %v628_v36 = vld [vmem:[#allocation5 + $0x1a8] sm:$0xff]  ;;  %v627_v40 = vld [vmem:[#allocation5 + $0x1a0] sm:$0xff] }
 0x14a   : > { %4119 = vmatprep.subr.bf16.mxu0 %v4118_v20  ;;  %v4130_v38 = vpack.c.bf16 %v628_v36, %v624_v35  ;;  %v544_v41 = vld [vmem:[%s5336_s29 + $0x8] sm:$0xff]  ;;  %v4132_v44 = vpack.c.bf16 %v627_v40, %v623_v39  ;;  %v631_v46 = vld [vmem:[#allocation5 + $0x1c0] sm:$0xff] }
 0x14b   : > { %v632_v42 = vld [vmem:[#allocation5 + $0x1c8] sm:$0xff]  ;;  %789 = vmatprep.mubr.f32.mxu0 %v544_v41  ;;  %950 = vmatprep.mubr.f32.mxu1 %v544_v41  ;;  %v635_v47 = vld [vmem:[#allocation5 + $0x1e0] sm:$0xff] }
 0x14c   : > { %v636_v43 = vld [vmem:[#allocation5 + $0x1e8] sm:$0xff]  ;;  %v4136_v50 = vpack.c.bf16 %v635_v47, %v631_v46  ;;  %v639_v52 = vld [vmem:[#allocation5 + $0x200] sm:$0xff] }
 0x14d   : > { %4121 = vmatpush1.bf16.msra.mxu0 %v4120_v25  ;;  %v4134_v45 = vpack.c.bf16 %v636_v43, %v632_v42  ;;  %v640_v48 = vld [vmem:[#allocation5 + $0x208] sm:$0xff]  ;;  %v643_v53 = vld [vmem:[#allocation5 + $0x220] sm:$0xff]  ;;  %v5367_v42 = vld [vmem:[%s5336_s29 + $0x18] sm:$0xff] }
 0x14e   : > { %4123 = vmatprep.subr.bf16.mxu0 %v4122_v26  ;;  %v644_v49 = vld [vmem:[#allocation5 + $0x228] sm:$0xff]  ;;  %v4140_v56 = vpack.c.bf16 %v643_v53, %v639_v52  ;;  %v647_v58 = vld [vmem:[#allocation5 + $0x240] sm:$0xff] }
 0x14f   : > { %v4138_v51 = vpack.c.bf16 %v644_v49, %v640_v48  ;;  %v648_v54 = vld [vmem:[#allocation5 + $0x248] sm:$0xff]  ;;  %v651_v59 = vld [vmem:[#allocation5 + $0x260] sm:$0xff]  ;;  %v5372_v48 = vld [vmem:[%s5336_s29 + $0x10] sm:$0xff] }
 0x150   : > { %v652_v55 = vld [vmem:[#allocation5 + $0x268] sm:$0xff]  ;;  %v4144_v62 = vpack.c.bf16 %v651_v59, %v647_v58  ;;  %v655_v0 = vld [vmem:[#allocation5 + $0x280] sm:$0xff]  ;;  %v5383_v58 = vld [vmem:[%s5336_s29 + $0x38] sm:$0xff] }
 0x151   : > { %4125 = vmatpush1.bf16.msra.mxu0 %v4124_v31  ;;  %v4142_v57 = vpack.c.bf16 %v652_v55, %v648_v54  ;;  %v656_v60 = vld [vmem:[#allocation5 + $0x288] sm:$0xff]  ;;  %v659_v1 = vld [vmem:[#allocation5 + $0x2a0] sm:$0xff]  ;;  %v1133_v54 = vld [vmem:[#allocation8 + $0xb0] sm:$0xff] }
 0x152   : > { %4127 = vmatprep.subr.bf16.mxu0 %v4126_v32  ;;  %v660_v61 = vld [vmem:[#allocation5 + $0x2a8] sm:$0xff]  ;;  %v4148_v4 = vpack.c.bf16 %v659_v1, %v655_v0  ;;  %v663_v6 = vld [vmem:[#allocation5 + $0x2c0] sm:$0xff]  ;;  %v5388_v0 = vld [vmem:[%s5336_s29 + $0x30] sm:$0xff] }
 0x153   : > { %v4146_v63 = vpack.c.bf16 %v660_v61, %v656_v60  ;;  %v664_v2 = vld [vmem:[#allocation5 + $0x2c8] sm:$0xff]  ;;  %v667_v7 = vld [vmem:[#allocation5 + $0x2e0] sm:$0xff]  ;;  %v1117_v60 = vld [vmem:[#allocation8 + $0x30] sm:$0xff] }
 0x154   : > { %v668_v3 = vld [vmem:[#allocation5 + $0x2e8] sm:$0xff]  ;;  %v4152_v10 = vpack.c.bf16 %v667_v7, %v663_v6  ;;  %v671_v12 = vld [vmem:[#allocation5 + $0x300] sm:$0xff]  ;;  %v1137_v6 = vld [vmem:[#allocation8 + $0xd0] sm:$0xff] }
 0x155   : > { %4129 = vmatpush1.bf16.msra.mxu0 %v4128_v37  ;;  %v4150_v5 = vpack.c.bf16 %v668_v3, %v664_v2  ;;  %v672_v8 = vld [vmem:[#allocation5 + $0x308] sm:$0xff]  ;;  %v675_v13 = vld [vmem:[#allocation5 + $0x320] sm:$0xff] }
 0x156   : > { %4131 = vmatprep.subr.bf16.mxu0 %v4130_v38  ;;  %v676_v9 = vld [vmem:[#allocation5 + $0x328] sm:$0xff]  ;;  %v4156_v16 = vpack.c.bf16 %v675_v13, %v671_v12  ;;  %v679_v18 = vld [vmem:[#allocation5 + $0x340] sm:$0xff]  ;;  %v1129_v38 = vld [vmem:[#allocation8 + $0x90] sm:$0xff] }
 0x157   : > { %v4154_v11 = vpack.c.bf16 %v676_v9, %v672_v8  ;;  %v680_v14 = vld [vmem:[#allocation5 + $0x348] sm:$0xff]  ;;  %v683_v19 = vld [vmem:[#allocation5 + $0x360] sm:$0xff]  ;;  %v1121_v12 = vld [vmem:[#allocation8 + $0x50] sm:$0xff] }
 0x158   : > { %v684_v15 = vld [vmem:[#allocation5 + $0x368] sm:$0xff]  ;;  %v4160_v22 = vpack.c.bf16 %v683_v19, %v679_v18  ;;  %v687_v24 = vld [vmem:[#allocation5 + $0x380] sm:$0xff] }
 0x159   : > { %4133 = vmatpush1.bf16.msra.mxu0 %v4132_v44  ;;  %v4158_v17 = vpack.c.bf16 %v684_v15, %v680_v14  ;;  %v688_v20 = vld [vmem:[#allocation5 + $0x388] sm:$0xff]  ;;  %v691_v25 = vld [vmem:[#allocation5 + $0x3a0] sm:$0xff]  ;;  %v1113_v44 = vld [vmem:[#allocation8 + $0x10] sm:$0xff] }
 0x15a   : > { %4135 = vmatprep.subr.bf16.mxu0 %v4134_v45  ;;  %v692_v21 = vld [vmem:[#allocation5 + $0x3a8] sm:$0xff]  ;;  %v4164_v28 = vpack.c.bf16 %v691_v25, %v687_v24  ;;  %v695_v30 = vld [vmem:[#allocation5 + $0x3c0] sm:$0xff] }
 0x15b   : > { %v4162_v23 = vpack.c.bf16 %v692_v21, %v688_v20  ;;  %v696_v26 = vld [vmem:[#allocation5 + $0x3c8] sm:$0xff]  ;;  %v699_v31 = vld [vmem:[#allocation5 + $0x3e0] sm:$0xff] }
 0x15c   : > { %v700_v27 = vld [vmem:[#allocation5 + $0x3e8] sm:$0xff]  ;;  %v4168_v34 = vpack.c.bf16 %v699_v31, %v695_v30  ;;  %v1130_v39 = vld [vmem:[#allocation8 + $0x98] sm:$0xff]  ;;  %v5420_v30 = vld [vmem:[%s5336_s29 + $0x70] sm:$0xff] }
 0x15d   : > { %4137 = vmatpush1.bf16.msra.mxu0 %v4136_v50  ;;  %v4166_v29 = vpack.c.bf16 %v700_v27, %v696_v26  ;;  %v1127_v32 = vld [vmem:[#allocation8 + $0x80] sm:$0xff]  ;;  %v1128_v33 = vld [vmem:[#allocation8 + $0x88] sm:$0xff]  ;;  %v4238_v43 = vpack.c.bf16 %v1130_v39, %v1129_v38  ;;  %v1114_v45 = vld [vmem:[#allocation8 + $0x18] sm:$0xff] }
 0x15e   : > { %4139 = vmatprep.subr.bf16.mxu0 %v4138_v51  ;;  %v4234_v35 = vpack.c.bf16 %v1128_v33, %v1127_v32  ;;  %v1111_v36 = vld [vmem:[#allocation8] sm:$0xff]  ;;  %v1112_v37 = vld [vmem:[#allocation8 + $0x8] sm:$0xff]  ;;  %v4240_v49 = vpack.c.bf16 %v1114_v45, %v1113_v44  ;;  %v1134_v55 = vld [vmem:[#allocation8 + $0xb8] sm:$0xff] }
 0x15f   : > { %v5364_v40 = vld [vmem:[%s5336_s29] sm:$0xff]  ;;  %v4236_v41 = vpack.c.bf16 %v1112_v37, %v1111_v36  ;;  %v1132_v47 = vld [vmem:[#allocation8 + $0xa8] sm:$0xff]  ;;  %v4246_v59 = vpack.c.bf16 %v1134_v55, %v1133_v54  ;;  %v5415_v26 = vld [vmem:[%s5336_s29 + $0x78] sm:$0xff] }
 0x160   : > { %v1131_v46 = vld [vmem:[#allocation8 + $0xa0] sm:$0xff]  ;;  %v1116_v53 = vld [vmem:[#allocation8 + $0x28] sm:$0xff]  ;;  %v1118_v61 = vld [vmem:[#allocation8 + $0x38] sm:$0xff] }
 0x161   : > { %4141 = vmatpush1.bf16.msra.mxu0 %v4140_v56  ;;  %v5375_v50 = vld [vmem:[%s5336_s29 + $0x28] sm:$0xff]  ;;  %v4242_v51 = vpack.c.bf16 %v1132_v47, %v1131_v46  ;;  %v5380_v56 = vld [vmem:[%s5336_s29 + $0x20] sm:$0xff]  ;;  %v4248_v1 = vpack.c.bf16 %v1118_v61, %v1117_v60  ;;  %v5447_v38 = vld [vmem:[%s5336_s29 + $0xb8] sm:$0xff] }
 0x162   : > { %4143 = vmatprep.subr.bf16.mxu0 %v4142_v57  ;;  %v1115_v52 = vld [vmem:[#allocation8 + $0x20] sm:$0xff]  ;;  %v1138_v7 = vld [vmem:[#allocation8 + $0xd8] sm:$0xff]  ;;  %v1140_v15 = vld [vmem:[#allocation8 + $0xe8] sm:$0xff] }
 0x163   : > { %v4244_v57 = vpack.c.bf16 %v1116_v53, %v1115_v52  ;;  %v5391_v2 = vld [vmem:[%s5336_s29 + $0x48] sm:$0xff]  ;;  %v5396_v8 = vld [vmem:[%s5336_s29 + $0x40] sm:$0xff]  ;;  %v5452_v39 = vld [vmem:[%s5336_s29 + $0xb0] sm:$0xff] }
 0x164   : > { %v1122_v13 = vld [vmem:[#allocation8 + $0x58] sm:$0xff]  ;;  %v1139_v14 = vld [vmem:[#allocation8 + $0xe0] sm:$0xff]  ;;  %v1124_v21 = vld [vmem:[#allocation8 + $0x68] sm:$0xff] }
 0x165   : > { %4145 = vmatpush1.bf16.msra.mxu0 %v4144_v62  ;;  %v1135_v62 = vld [vmem:[#allocation8 + $0xc0] sm:$0xff]  ;;  %v4258_v19 = vpack.c.bf16 %v1140_v15, %v1139_v14  ;;  %v5463_v44 = vld [vmem:[%s5336_s29 + $0xd8] sm:$0xff]  ;;  %v5468_v45 = vld [vmem:[%s5336_s29 + $0xd0] sm:$0xff] }
 0x166   : > { %4147 = vmatprep.subr.bf16.mxu0 %v4146_v63  ;;  %v1136_v63 = vld [vmem:[#allocation8 + $0xc8] sm:$0xff]  ;;  %v1123_v20 = vld [vmem:[#allocation8 + $0x60] sm:$0xff]  ;;  %v578_v52 = vld [vmem:[#allocation5 + $0x18] sm:$0xff] }
 0x167   : > { %v4250_v3 = vpack.c.bf16 %v1136_v63, %v1135_v62  ;;  %v5407_v18 = vld [vmem:[%s5336_s29 + $0x68] sm:$0xff]  ;;  %v5412_v24 = vld [vmem:[%s5336_s29 + $0x60] sm:$0xff]  ;;  %v4260_v25 = vpack.c.bf16 %v1124_v21, %v1123_v20  ;;  %v582_v53 = vld [vmem:[#allocation5 + $0x38] sm:$0xff] }
 0x168   : > { %v5423_v32 = vld [vmem:[%s5336_s29 + $0x88] sm:$0xff]  ;;  %v5428_v33 = vld [vmem:[%s5336_s29 + $0x80] sm:$0xff]  ;;  %v4170_v54 = vpack.c.bf16 %v582_v53, %v578_v52  ;;  %v577_v55 = vld [vmem:[#allocation5 + $0x10] sm:$0xff] }
 0x169   : > { %4149 = vmatpush1.bf16.msra.mxu0 %v4148_v4  ;;  %v1119_v4 = vld [vmem:[#allocation8 + $0x40] sm:$0xff]  ;;  %v586_v60 = vld [vmem:[#allocation5 + $0x58] sm:$0xff]  ;;  %v585_v63 = vld [vmem:[#allocation5 + $0x50] sm:$0xff] }
 0x16a   : > { %4151 = vmatprep.subr.bf16.mxu0 %v4150_v5  ;;  %v1120_v5 = vld [vmem:[#allocation8 + $0x48] sm:$0xff]  ;;  %v5444_v37 = vld [vmem:[%s5336_s29 + $0xa0] sm:$0xff]  ;;  %4171 = vmatprep.subr.bf16.mxu1 %v4170_v54  ;;  %v590_v61 = vld [vmem:[#allocation5 + $0x78] sm:$0xff] }
 0x16b   : > { %v4252_v9 = vpack.c.bf16 %v1120_v5, %v1119_v4  ;;  %v5439_v36 = vld [vmem:[%s5336_s29 + $0xa8] sm:$0xff]  ;;  %v5476_v47 = vld [vmem:[%s5336_s29 + $0xe0] sm:$0xff]  ;;  %v4174_v62 = vpack.c.bf16 %v590_v61, %v586_v60  ;;  %v594_v4 = vld [vmem:[#allocation5 + $0x98] sm:$0xff] }
 0x16c   : > { %v5471_v46 = vld [vmem:[%s5336_s29 + $0xe8] sm:$0xff]  ;;  %v598_v5 = vld [vmem:[#allocation5 + $0xb8] sm:$0xff]  ;;  %v601_v15 = vld [vmem:[#allocation5 + $0xd0] sm:$0xff] }
 0x16d   : > { %4153 = vmatpush1.bf16.msra.mxu0 %v4152_v10  ;;  %v5399_v10 = vld [vmem:[%s5336_s29 + $0x58] sm:$0xff]  ;;  %v617_v52 = vld [vmem:[#allocation5 + $0x150] sm:$0xff] }
 0x16e   : > { %4155 = vmatprep.subr.bf16.mxu0 %v4154_v11  ;;  %v4254_v11 = vpack.c.bf16 %v1138_v7, %v1137_v6  ;;  %v4178_v6 = vpack.c.bf16 %v598_v5, %v594_v4  ;;  %v593_v7 = vld [vmem:[#allocation5 + $0x90] sm:$0xff]  ;;  %v610_v20 = vld [vmem:[#allocation5 + $0x118] sm:$0xff] }
 0x16f   : > { %v614_v21 = vld [vmem:[#allocation5 + $0x138] sm:$0xff]  ;;  %v621_v53 = vld [vmem:[#allocation5 + $0x170] sm:$0xff] }
 0x170   : > { %v4192_v54 = vpack.c.bf16 %v621_v53, %v617_v52  ;;  %v625_v60 = vld [vmem:[#allocation5 + $0x190] sm:$0xff]  ;;  %v666_v52 = vld [vmem:[#allocation5 + $0x2d8] sm:$0xff] }
 0x171   : > { %4157 = vmatpush1.bf16.msra.mxu0 %v4156_v16  ;;  %v5404_v16 = vld [vmem:[%s5336_s29 + $0x50] sm:$0xff]  ;;  %v670_v53 = vld [vmem:[#allocation5 + $0x2f8] sm:$0xff] }
 0x172   : > { %4159 = vmatprep.subr.bf16.mxu0 %v4158_v17  ;;  %v4256_v17 = vpack.c.bf16 %v1122_v13, %v1121_v12  ;;  %v602_v12 = vld [vmem:[#allocation5 + $0xd8] sm:$0xff]  ;;  %v629_v61 = vld [vmem:[#allocation5 + $0x1b0] sm:$0xff] }
 0x173   : > { %v606_v13 = vld [vmem:[#allocation5 + $0xf8] sm:$0xff]  ;;  %v633_v4 = vld [vmem:[#allocation5 + $0x1d0] sm:$0xff] }
 0x174   : > { %v4182_v14 = vpack.c.bf16 %v606_v13, %v602_v12  ;;  %v637_v5 = vld [vmem:[#allocation5 + $0x1f0] sm:$0xff] }
 0x175   : > { %4161 = vmatpush1.bf16.msra.mxu0 %v4160_v22  ;;  %v1141_v22 = vld [vmem:[#allocation8 + $0xf0] sm:$0xff] }
 0x176   : > { %4163 = vmatprep.subr.bf16.mxu0 %v4162_v23  ;;  %v1142_v23 = vld [vmem:[#allocation8 + $0xf8] sm:$0xff]  ;;  %v641_v12 = vld [vmem:[#allocation5 + $0x210] sm:$0xff] }
 0x177   : > { %v4262_v27 = vpack.c.bf16 %v1142_v23, %v1141_v22  ;;  %v4186_v22 = vpack.c.bf16 %v614_v21, %v610_v20  ;;  %v609_v23 = vld [vmem:[#allocation5 + $0x110] sm:$0xff] }
 0x178   : > { %v645_v13 = vld [vmem:[#allocation5 + $0x230] sm:$0xff] }
 0x179   : > { %4165 = vmatpush1.bf16.msra.mxu0 %v4164_v28  ;;  %v1125_v28 = vld [vmem:[#allocation8 + $0x70] sm:$0xff] }
 0x17a   : > { %4167 = vmatprep.subr.bf16.mxu0 %v4166_v29  ;;  %v1126_v29 = vld [vmem:[#allocation8 + $0x78] sm:$0xff]  ;;  %v649_v20 = vld [vmem:[#allocation5 + $0x250] sm:$0xff] }
 0x17b   : > { %v4264_v31 = vpack.c.bf16 %v1126_v29, %v1125_v28  ;;  %v618_v28 = vld [vmem:[#allocation5 + $0x158] sm:$0xff]  ;;  %v653_v21 = vld [vmem:[#allocation5 + $0x270] sm:$0xff] }
 0x17c   : > { %v622_v29 = vld [vmem:[#allocation5 + $0x178] sm:$0xff] }
 0x17d   : > { %4169 = vmatpush1.bf16.msra.mxu0 %v4168_v34  ;;  %v5431_v34 = vld [vmem:[%s5336_s29 + $0x98] sm:$0xff] }
 0x17e   : > { %4235 = vmatprep.subr.bf16.mxu0 %v4234_v35  ;;  %v5436_v35 = vld [vmem:[%s5336_s29 + $0x90] sm:$0xff] }
 0x180   : > { %790 = vmatmul.mubr.f32.vlgmr.msra.gmra.mrb[0].mxu0 %v5364_v40 }
 0x181   : > { %795 = vmatprep.mubr.f32.mxu0 %v5367_v42  ;;  %4237 = vmatpush3.bf16.msra.mxu0 %v4236_v41  ;;  %v5455_v41 = vld [vmem:[%s5336_s29 + $0xc8] sm:$0xff] }
 0x182   : > { %4239 = vmatprep.subr.bf16.mxu0 %v4238_v43  ;;  %v5460_v43 = vld [vmem:[%s5336_s29 + $0xc0] sm:$0xff] }
 0x184   : > { %796 = vmatmul.mubr.f32.gmra.mrb[2].mxu0 %v5372_v48 }
 0x185   : > { %801 = vmatprep.mubr.f32.mxu0 %v5375_v50  ;;  %4241 = vmatpush3.bf16.msra.mxu0 %v4240_v49  ;;  %v5479_v49 = vld [vmem:[%s5336_s29 + $0xf8] sm:$0xff] }
 0x186   : > { %4243 = vmatprep.subr.bf16.mxu0 %v4242_v51  ;;  %v5484_v51 = vld [vmem:[%s5336_s29 + $0xf0] sm:$0xff]  ;;  %s4832_s29 = sshll.u32 %s4934_s15, 4  ;;  %s4833_s29 = int_to_ptr.vmem [resolvable:$false] %s4832_s29 }
 0x187   : > { %s4834_s26 = scalar_lea.vmem %s4833_s29, 65536  ;;  %p4835_p7 = scmp.lt.s32.totalorder %s6328_s22, %s4833_s29 }
 0x188   : > { %802 = vmatmul.mubr.f32.gmra.mrb[4].mxu0 %v5380_v56  ;;  %p4836_p9 = scmp.lt.s32.totalorder %s4834_s26, %s4828_s11 }
 0x189   : > { %807 = vmatprep.mubr.f32.mxu0 %v5383_v58  ;;  %4245 = vmatpush3.bf16.msra.mxu0 %v4244_v57  ;;  %v581_v57 = vld [vmem:[#allocation5 + $0x30] sm:$0xff] }
 0x18a   : > { %4247 = vmatprep.subr.bf16.mxu0 %v4246_v59  ;;  %v4172_v59 = vpack.c.bf16 %v581_v57, %v577_v55  ;;  %v626_v55 = vld [vmem:[#allocation5 + $0x198] sm:$0xff]  ;;  %p4837_p4 = por %p4836_p9, %p4835_p7 }
 0x18b   : > { %v630_v57 = vld [vmem:[#allocation5 + $0x1b8] sm:$0xff] }
 0x18c   : > { %808 = vmatmul.mubr.f32.gmra.mrb[6].mxu0 %v5388_v0  ;;  %4173 = vmatpush1.bf16.msra.mxu1 %v4172_v59  ;;  %v4194_v59 = vpack.c.bf16 %v630_v57, %v626_v55  ;;  %v665_v55 = vld [vmem:[#allocation5 + $0x2d0] sm:$0xff]  ;;  %p4838_p3 = pnand %p4837_p4, %p4831_p8 }
 0x18d   : > { %813 = vmatprep.mubr.f32.mxu0 %v5391_v2  ;;  %4249 = vmatpush3.bf16.msra.mxu0 %v4248_v1  ;;  %v589_v1 = vld [vmem:[#allocation5 + $0x70] sm:$0xff] }
 0x18e   : > { %4251 = vmatprep.subr.bf16.mxu0 %v4250_v3  ;;  %v4176_v3 = vpack.c.bf16 %v589_v1, %v585_v63  ;;  %4175 = vmatprep.subr.bf16.mxu1 %v4174_v62  ;;  %v4196_v62 = vpack.c.bf16 %v629_v61, %v625_v60  ;;  %v634_v63 = vld [vmem:[#allocation5 + $0x1d8] sm:$0xff]  ;;  %v669_v57 = vld [vmem:[#allocation5 + $0x2f0] sm:$0xff] }
 0x18f   : > { %v638_v1 = vld [vmem:[#allocation5 + $0x1f8] sm:$0xff] }
 0x190   : > { %814 = vmatmul.mubr.f32.gmra.mrb[8].mxu0 %v5396_v8  ;;  %4177 = vmatpush1.bf16.msra.mxu1 %v4176_v3  ;;  %v4198_v3 = vpack.c.bf16 %v638_v1, %v634_v63  ;;  %v674_v60 = vld [vmem:[#allocation5 + $0x318] sm:$0xff]  ;;  %v673_v63 = vld [vmem:[#allocation5 + $0x310] sm:$0xff] }
 0x191   : > { %819 = vmatprep.mubr.f32.mxu0 %v5399_v10  ;;  %4253 = vmatpush3.bf16.msra.mxu0 %v4252_v9  ;;  %v597_v9 = vld [vmem:[#allocation5 + $0xb0] sm:$0xff]  ;;  %v678_v61 = vld [vmem:[#allocation5 + $0x338] sm:$0xff] }
 0x192   : > { %4255 = vmatprep.subr.bf16.mxu0 %v4254_v11  ;;  %v4180_v11 = vpack.c.bf16 %v597_v9, %v593_v7  ;;  %4179 = vmatprep.subr.bf16.mxu1 %v4178_v6  ;;  %v4200_v6 = vpack.c.bf16 %v637_v5, %v633_v4  ;;  %v642_v7 = vld [vmem:[#allocation5 + $0x218] sm:$0xff]  ;;  %v677_v1 = vld [vmem:[#allocation5 + $0x330] sm:$0xff] }
 0x193   : > { %v646_v9 = vld [vmem:[#allocation5 + $0x238] sm:$0xff] }
 0x194   : > { %820 = vmatmul.mubr.f32.gmra.mrb[10].mxu0 %v5404_v16  ;;  %4181 = vmatpush1.bf16.msra.mxu1 %v4180_v11  ;;  %v4202_v11 = vpack.c.bf16 %v646_v9, %v642_v7  ;;  %v682_v4 = vld [vmem:[#allocation5 + $0x358] sm:$0xff]  ;;  %v681_v7 = vld [vmem:[#allocation5 + $0x350] sm:$0xff] }
 0x195   : > { %825 = vmatprep.mubr.f32.mxu0 %v5407_v18  ;;  %4257 = vmatpush3.bf16.msra.mxu0 %v4256_v17  ;;  %v605_v17 = vld [vmem:[#allocation5 + $0xf0] sm:$0xff]  ;;  %v686_v5 = vld [vmem:[#allocation5 + $0x378] sm:$0xff] }
 0x196   : > { %4259 = vmatprep.subr.bf16.mxu0 %v4258_v19  ;;  %v4184_v19 = vpack.c.bf16 %v605_v17, %v601_v15  ;;  %4183 = vmatprep.subr.bf16.mxu1 %v4182_v14  ;;  %v4204_v14 = vpack.c.bf16 %v645_v13, %v641_v12  ;;  %v650_v15 = vld [vmem:[#allocation5 + $0x258] sm:$0xff]  ;;  %v685_v9 = vld [vmem:[#allocation5 + $0x370] sm:$0xff] }
 0x197   : > { %v654_v17 = vld [vmem:[#allocation5 + $0x278] sm:$0xff] }
 0x198   : > { %826 = vmatmul.mubr.f32.gmra.mrb[12].mxu0 %v5412_v24  ;;  %4185 = vmatpush1.bf16.msra.mxu1 %v4184_v19  ;;  %v4206_v19 = vpack.c.bf16 %v654_v17, %v650_v15  ;;  %v690_v12 = vld [vmem:[#allocation5 + $0x398] sm:$0xff]  ;;  %v689_v15 = vld [vmem:[#allocation5 + $0x390] sm:$0xff] }
 0x199   : > { %831 = vmatprep.mubr.f32.mxu0 %v5415_v26  ;;  %4261 = vmatpush3.bf16.msra.mxu0 %v4260_v25  ;;  %v613_v25 = vld [vmem:[#allocation5 + $0x130] sm:$0xff]  ;;  %v694_v13 = vld [vmem:[#allocation5 + $0x3b8] sm:$0xff] }
 0x19a   : > { %4263 = vmatprep.subr.bf16.mxu0 %v4262_v27  ;;  %v4188_v27 = vpack.c.bf16 %v613_v25, %v609_v23  ;;  %4187 = vmatprep.subr.bf16.mxu1 %v4186_v22  ;;  %v4208_v22 = vpack.c.bf16 %v653_v21, %v649_v20  ;;  %v658_v23 = vld [vmem:[#allocation5 + $0x298] sm:$0xff]  ;;  %v693_v17 = vld [vmem:[#allocation5 + $0x3b0] sm:$0xff] }
 0x19b   : > { %v662_v25 = vld [vmem:[#allocation5 + $0x2b8] sm:$0xff] }
 0x19c   : > { %832 = vmatmul.mubr.f32.gmra.mrb[14].mxu0 %v5420_v30  ;;  %4189 = vmatpush1.bf16.msra.mxu1 %v4188_v27  ;;  %v4210_v27 = vpack.c.bf16 %v662_v25, %v658_v23  ;;  %v698_v20 = vld [vmem:[#allocation5 + $0x3d8] sm:$0xff]  ;;  %v697_v23 = vld [vmem:[#allocation5 + $0x3d0] sm:$0xff] }
 0x19d   : > { %837 = vmatprep.mubr.f32.mxu0 %v5423_v32  ;;  %4265 = vmatpush3.bf16.msra.mxu0 %v4264_v31  ;;  %v4190_v31 = vpack.c.bf16 %v622_v29, %v618_v28  ;;  %v657_v28 = vld [vmem:[#allocation5 + $0x290] sm:$0xff]  ;;  %v702_v21 = vld [vmem:[#allocation5 + $0x3f8] sm:$0xff] }
 0x19e   : > { %v661_v29 = vld [vmem:[#allocation5 + $0x2b0] sm:$0xff] }
 0x19f   : > { %4191 = vmatprep.subr.bf16.mxu1 %v4190_v31  ;;  %v4212_v31 = vpack.c.bf16 %v661_v29, %v657_v28  ;;  %v701_v25 = vld [vmem:[#allocation5 + $0x3f0] sm:$0xff]  ;;  %v1311_v28 = vld [vmem:[#allocation11] sm:$0xff] }
 0x1a0   : > { %838 = vmatmul.mubr.f32.gmra.mrb[16].mxu0 %v5428_v33  ;;  %4193 = vmatpush1.bf16.msra.mxu1 %v4192_v54  ;;  %v4214_v54 = vpack.c.bf16 %v670_v53, %v666_v52  ;;  %v1312_v29 = vld [vmem:[#allocation11 + $0x8] sm:$0xff]  ;;  %v1314_v53 = vld [vmem:[#allocation11 + $0x18] sm:$0xff] }
 0x1a1   : > { %843 = vmatprep.mubr.f32.mxu0 %v5431_v34  ;;  %4195 = vmatprep.subr.bf16.mxu1 %v4194_v59  ;;  %v4216_v59 = vpack.c.bf16 %v669_v57, %v665_v55  ;;  %v4266_v52 = vpack.c.bf16 %v1312_v29, %v1311_v28  ;;  %v1315_v55 = vld [vmem:[#allocation11 + $0x20] sm:$0xff]  ;;  %v1316_v57 = vld [vmem:[#allocation11 + $0x28] sm:$0xff] }
 0x1a4   : > { %844 = vmatmul.mubr.f32.gmra.mrb[18].mxu0 %v5436_v35  ;;  %4197 = vmatpush1.bf16.msra.mxu1 %v4196_v62  ;;  %v4218_v62 = vpack.c.bf16 %v678_v61, %v674_v60  ;;  %v1317_v60 = vld [vmem:[#allocation11 + $0x30] sm:$0xff]  ;;  %v1318_v61 = vld [vmem:[#allocation11 + $0x38] sm:$0xff] }
 0x1a5   : > { %849 = vmatprep.mubr.f32.mxu0 %v5439_v36  ;;  %4199 = vmatprep.subr.bf16.mxu1 %v4198_v3  ;;  %v4220_v3 = vpack.c.bf16 %v677_v1, %v673_v63  ;;  %v1319_v63 = vld [vmem:[#allocation11 + $0x40] sm:$0xff]  ;;  %v1320_v1 = vld [vmem:[#allocation11 + $0x48] sm:$0xff] }
 0x1a8   : > { %850 = vmatmul.mubr.f32.gmra.mrb[20].mxu0 %v5444_v37  ;;  %4201 = vmatpush1.bf16.msra.mxu1 %v4200_v6  ;;  %v4222_v6 = vpack.c.bf16 %v686_v5, %v682_v4 }
 0x1a9   : > { %855 = vmatprep.mubr.f32.mxu0 %v5447_v38  ;;  %4203 = vmatprep.subr.bf16.mxu1 %v4202_v11  ;;  %v4224_v11 = vpack.c.bf16 %v685_v9, %v681_v7 }
 0x1ac   : > { %856 = vmatmul.mubr.f32.gmra.mrb[22].mxu0 %v5452_v39  ;;  %4205 = vmatpush1.bf16.msra.mxu1 %v4204_v14  ;;  %v4226_v14 = vpack.c.bf16 %v694_v13, %v690_v12 }
 0x1ad   : > { %861 = vmatprep.mubr.f32.mxu0 %v5455_v41  ;;  %4207 = vmatprep.subr.bf16.mxu1 %v4206_v19  ;;  %v4228_v19 = vpack.c.bf16 %v693_v17, %v689_v15 }
 0x1b0   : > { %862 = vmatmul.mubr.f32.gmra.mrb[24].mxu0 %v5460_v43  ;;  %4209 = vmatpush1.bf16.msra.mxu1 %v4208_v22  ;;  %v4230_v22 = vpack.c.bf16 %v702_v21, %v698_v20 }
 0x1b1   : > { %867 = vmatprep.mubr.f32.mxu0 %v5463_v44  ;;  %4211 = vmatprep.subr.bf16.mxu1 %v4210_v27  ;;  %v4232_v27 = vpack.c.bf16 %v701_v25, %v697_v23 }
 0x1b4   : > { %868 = vmatmul.mubr.f32.gmra.mrb[26].mxu0 %v5468_v45  ;;  %4213 = vmatpush1.bf16.msra.mxu1 %v4212_v31  ;;  %v1313_v31 = vld [vmem:[#allocation11 + $0x10] sm:$0xff] }
 0x1b5   : > { %873 = vmatprep.mubr.f32.mxu0 %v5471_v46  ;;  %4215 = vmatprep.subr.bf16.mxu1 %v4214_v54  ;;  %v4270_v54 = vpack.c.bf16 %v1314_v53, %v1313_v31 }
 0x1b8   : > { %874 = vmatmul.mubr.f32.gmra.mrb[28].mxu0 %v5476_v47  ;;  %4217 = vmatpush1.bf16.msra.mxu1 %v4216_v59  ;;  %v4274_v59 = vpack.c.bf16 %v1316_v57, %v1315_v55 }
 0x1b9   : > { %879 = vmatprep.mubr.f32.mxu0 %v5479_v49  ;;  %4219 = vmatprep.subr.bf16.mxu1 %v4218_v62  ;;  %v4278_v62 = vpack.c.bf16 %v1318_v61, %v1317_v60 }
 0x1bc   : > { %880 = vmatmul.mubr.f32.gmra.mrb[30].mxu0 %v5484_v51  ;;  %4221 = vmatpush1.bf16.msra.mxu1 %v4220_v3 }
 0x1bd   : > { %4223 = vmatprep.subr.bf16.mxu1 %v4222_v6 }
 0x1c0   : > { %4225 = vmatpush1.bf16.msra.mxu1 %v4224_v11 }
 0x1c1   : > { %4227 = vmatprep.subr.bf16.mxu1 %v4226_v14 }
 0x1c4   : > { %4229 = vmatpush1.bf16.msra.mxu1 %v4228_v19 }
 0x1c5   : > { %4231 = vmatprep.subr.bf16.mxu1 %v4230_v22 }
 0x1c8   : > { %4233 = vmatpush1.bf16.msra.mxu1 %v4232_v27 }
 0x1c9   : > { %4267 = vmatprep.subr.bf16.mxu1 %v4266_v52 }
 0x1cb   : > { %951 = vmatmul.mubr.f32.vlgmr.msra.gmra.mrb[0].mxu1 %v5364_v40  ;;  %v4282_v40 = vpack.c.bf16 %v1320_v1, %v1319_v63 }
 0x1cc   : > { %956 = vmatprep.mubr.f32.mxu1 %v5367_v42  ;;  %4269 = vmatpush3.bf16.msra.mxu1 %v4266_v52  ;;  %v705_v42 = vlaneseq }
 0x1cd   : > { %4271 = vmatprep.subr.bf16.mxu1 %v4270_v54 }
 0x1cf   : > { %957 = vmatmul.mubr.f32.gmra.mrb[2].mxu1 %v5372_v48  ;;  %v5511_v48 = vshrl.u32 %v705_v42, 7 }
 0x1d0   : > { %962 = vmatprep.mubr.f32.mxu1 %v5375_v50  ;;  %4273 = vmatpush3.bf16.msra.mxu1 %v4270_v54 }
 0x1d1   : > { %4275 = vmatprep.subr.bf16.mxu1 %v4274_v59  ;;  %v5516_v50 = vsub.s32 0, %v5511_v48 }
 0x1d3   : > { %963 = vmatmul.mubr.f32.gmra.mrb[4].mxu1 %v5380_v56  ;;  %v5518_v56 = vld [vmem:[#allocation7] sm:$0xf] }
 0x1d4   : > { %968 = vmatprep.mubr.f32.mxu1 %v5383_v58  ;;  %4277 = vmatpush3.bf16.msra.mxu1 %v4274_v59  ;;  %v711_v58 = vsub.s32 1, %v5511_v48 }
 0x1d5   : > { %4279 = vmatprep.subr.bf16.mxu1 %v4278_v62 }
 0x1d7   : > { %969 = vmatmul.mubr.f32.gmra.mrb[6].mxu1 %v5388_v0  ;;  %v5525_v0 = vrot.slane %v5518_v56, %v5516_v50 }
 0x1d8   : > { %974 = vmatprep.mubr.f32.mxu1 %v5391_v2  ;;  %4281 = vmatpush3.bf16.msra.mxu1 %v4278_v62  ;;  %v5528_v2 = vrot.slane %v5518_v56, %v711_v58 }
 0x1d9   : > { %4283 = vmatprep.subr.bf16.mxu1 %v4282_v40 }
 0x1db   : > { %975 = vmatmul.mubr.f32.gmra.mrb[8].mxu1 %v5396_v8 }
 0x1dc   : > { %980 = vmatprep.mubr.f32.mxu1 %v5399_v10  ;;  %4285 = vmatpush3.bf16.msra.mxu1 %v4282_v40 }
 0x1df   : > { %981 = vmatmul.mubr.f32.gmra.mrb[10].mxu1 %v5404_v16 }
 0x1e0   : > { %986 = vmatprep.mubr.f32.mxu1 %v5407_v18 }
 0x1e3   : > { %987 = vmatmul.mubr.f32.gmra.mrb[12].mxu1 %v5412_v24 }
 0x1e4   : > { %992 = vmatprep.mubr.f32.mxu1 %v5415_v26 }
 0x1e7   : > { %993 = vmatmul.mubr.f32.gmra.mrb[14].mxu1 %v5420_v30 }
 0x1e8   : > { %998 = vmatprep.mubr.f32.mxu1 %v5423_v32 }
 0x1eb   : > { %999 = vmatmul.mubr.f32.gmra.mrb[16].mxu1 %v5428_v33 }
 0x1ec   : > { %1004 = vmatprep.mubr.f32.mxu1 %v5431_v34 }
 0x1ef   : > { %1005 = vmatmul.mubr.f32.gmra.mrb[18].mxu1 %v5436_v35 }
 0x1f0   : > { %1010 = vmatprep.mubr.f32.mxu1 %v5439_v36 }
 0x1f3   : > { %1011 = vmatmul.mubr.f32.gmra.mrb[20].mxu1 %v5444_v37 }
 0x1f4   : > { %1016 = vmatprep.mubr.f32.mxu1 %v5447_v38 }
 0x1f7   : > { %1017 = vmatmul.mubr.f32.gmra.mrb[22].mxu1 %v5452_v39 }
 0x1f8   : > { %1022 = vmatprep.mubr.f32.mxu1 %v5455_v41 }
 0x1fb   : > { %1023 = vmatmul.mubr.f32.gmra.mrb[24].mxu1 %v5460_v43 }
 0x1fc   : > { %1028 = vmatprep.mubr.f32.mxu1 %v5463_v44 }
 0x1ff   : > { %1029 = vmatmul.mubr.f32.gmra.mrb[26].mxu1 %v5468_v45 }
 0x200   : > { %1034 = vmatprep.mubr.f32.mxu1 %v5471_v46 }
 0x203   : > { %1035 = vmatmul.mubr.f32.gmra.mrb[28].mxu1 %v5476_v47 }
 0x204   : > { %1040 = vmatprep.mubr.f32.mxu1 %v5479_v49 }
 0x207   : > { %1041 = vmatmul.mubr.f32.gmra.mrb[30].mxu1 %v5484_v51 }
 0x253   : > { %v791_v8 = vpop.f32.mrb[0].mxu0 }
 0x254   : > { %v792_v10 = vadd.f32 %v791_v8, %v5525_v0  ;;  %v793_v16 = vpop.f32.mrb[1].mxu0 }
 0x255   : > { %v794_v18 = vadd.f32 %v793_v16, %v5528_v2 }
 0x256   : > { %v1047_v30 = vmax.f32 %v792_v10, 0.0 }
 0x257   : > { %v1048_v24 = vmax.f32 %v794_v18, 0.0  ;;  %v797_v26 = vpop.f32.mrb[2].mxu0 }
 0x258   : > { %v798_v32 = vadd.f32 %v797_v26, %v5525_v0  ;;  %v799_v33 = vpop.f32.mrb[3].mxu0 }
 0x259   : > { %v800_v34 = vadd.f32 %v799_v33, %v5528_v2  ;;  %1214 = vmatprep.mubr.f32.mxu0 %v1048_v24 }
 0x25a   : > { %1215 = vmatmul.mubr.f32.vlgmr.msra.gmra.mrb[32].mxu0 %v1047_v30  ;;  %v1051_v37 = vmax.f32 %v798_v32, 0.0 }
 0x25b   : > { %v1052_v35 = vmax.f32 %v800_v34, 0.0  ;;  %v803_v36 = vpop.f32.mrb[4].mxu0 }
 0x25c   : > { %v804_v38 = vadd.f32 %v803_v36, %v5525_v0  ;;  %v805_v39 = vpop.f32.mrb[5].mxu0 }
 0x25d   : > { %v806_v41 = vadd.f32 %v805_v39, %v5528_v2  ;;  %1219 = vmatprep.mubr.f32.mxu0 %v1052_v35 }
 0x25e   : > { %1220 = vmatmul.mubr.f32.gmra.mrb[34].mxu0 %v1051_v37  ;;  %v1055_v45 = vmax.f32 %v804_v38, 0.0 }
 0x25f   : > { %v1056_v43 = vmax.f32 %v806_v41, 0.0  ;;  %v809_v44 = vpop.f32.mrb[6].mxu0 }
 0x260   : > { %v810_v46 = vadd.f32 %v809_v44, %v5525_v0  ;;  %v811_v47 = vpop.f32.mrb[7].mxu0 }
 0x261   : > { %v812_v49 = vadd.f32 %v811_v47, %v5528_v2  ;;  %1224 = vmatprep.mubr.f32.mxu0 %v1056_v43 }
 0x262   : > { %1225 = vmatmul.mubr.f32.gmra.mrb[36].mxu0 %v1055_v45  ;;  %v1059_v4 = vmax.f32 %v810_v46, 0.0 }
 0x263   : > { %v1060_v51 = vmax.f32 %v812_v49, 0.0  ;;  %v815_v3 = vpop.f32.mrb[8].mxu0 }
 0x264   : > { %v816_v5 = vadd.f32 %v815_v3, %v5525_v0  ;;  %v817_v6 = vpop.f32.mrb[9].mxu0 }
 0x265   : > { %v818_v7 = vadd.f32 %v817_v6, %v5528_v2  ;;  %1229 = vmatprep.mubr.f32.mxu0 %v1060_v51 }
 0x266   : > { %1230 = vmatmul.mubr.f32.gmra.mrb[38].mxu0 %v1059_v4  ;;  %v1063_v12 = vmax.f32 %v816_v5, 0.0 }
 0x267   : > { %v1064_v9 = vmax.f32 %v818_v7, 0.0  ;;  %v821_v11 = vpop.f32.mrb[10].mxu0 }
 0x268   : > { %v822_v13 = vadd.f32 %v821_v11, %v5525_v0  ;;  %v823_v14 = vpop.f32.mrb[11].mxu0 }
 0x269   : > { %v824_v15 = vadd.f32 %v823_v14, %v5528_v2  ;;  %1234 = vmatprep.mubr.f32.mxu0 %v1064_v9 }
 0x26a   : > { %1235 = vmatmul.mubr.f32.gmra.mrb[40].mxu0 %v1063_v12  ;;  %v1067_v20 = vmax.f32 %v822_v13, 0.0 }
 0x26b   : > { %v1068_v17 = vmax.f32 %v824_v15, 0.0  ;;  %v827_v19 = vpop.f32.mrb[12].mxu0 }
 0x26c   : > { %v828_v21 = vadd.f32 %v827_v19, %v5525_v0  ;;  %v829_v22 = vpop.f32.mrb[13].mxu0 }
 0x26d   : > { %v830_v23 = vadd.f32 %v829_v22, %v5528_v2  ;;  %1239 = vmatprep.mubr.f32.mxu0 %v1068_v17  ;;  %v1322_v22 = vld [vmem:[#allocation11 + $0x58] sm:$0xff] }
 0x26e   : > { %1240 = vmatmul.mubr.f32.gmra.mrb[42].mxu0 %v1067_v20  ;;  %v1071_v28 = vmax.f32 %v828_v21, 0.0  ;;  %v1321_v21 = vld [vmem:[#allocation11 + $0x50] sm:$0xff] }
 0x26f   : > { %v1072_v25 = vmax.f32 %v830_v23, 0.0  ;;  %v833_v27 = vpop.f32.mrb[14].mxu0  ;;  %v4286_v23 = vpack.c.bf16 %v1322_v22, %v1321_v21 }
 0x270   : > { %v834_v29 = vadd.f32 %v833_v27, %v5525_v0  ;;  %v835_v31 = vpop.f32.mrb[15].mxu0  ;;  %v1324_v27 = vld [vmem:[#allocation11 + $0x68] sm:$0xff] }
 0x271   : > { %v836_v52 = vadd.f32 %v835_v31, %v5528_v2  ;;  %1244 = vmatprep.mubr.f32.mxu0 %v1072_v25  ;;  %4287 = vmatprep.subr.bf16.mxu1 %v4286_v23  ;;  %v1323_v25 = vld [vmem:[#allocation11 + $0x60] sm:$0xff] }
 0x272   : > { %1245 = vmatmul.mubr.f32.gmra.mrb[44].mxu0 %v1071_v28  ;;  %v1075_v55 = vmax.f32 %v834_v29, 0.0  ;;  %4289 = vmatpush3.bf16.msra.mxu1 %v4286_v23  ;;  %v4290_v28 = vpack.c.bf16 %v1324_v27, %v1323_v25  ;;  %v1326_v29 = vld [vmem:[#allocation11 + $0x78] sm:$0xff] }
 0x273   : > { %v1076_v53 = vmax.f32 %v836_v52, 0.0  ;;  %v839_v54 = vpop.f32.mrb[16].mxu0  ;;  %v1496_v52 = vld [vmem:[#allocation14 + $0x88] sm:$0xff]  ;;  %v1481_v25 = vld [vmem:[#allocation14 + $0x10] sm:$0xff]  ;;  %v1482_v27 = vld [vmem:[#allocation14 + $0x18] sm:$0xff] }
 0x274   : > { %v840_v57 = vadd.f32 %v839_v54, %v5525_v0  ;;  %v841_v59 = vpop.f32.mrb[17].mxu0  ;;  %4291 = vmatprep.subr.bf16.mxu1 %v4290_v28 }
 0x275   : > { %v842_v60 = vadd.f32 %v841_v59, %v5528_v2  ;;  %1249 = vmatprep.mubr.f32.mxu0 %v1076_v53 }
 0x276   : > { %1250 = vmatmul.mubr.f32.gmra.mrb[46].mxu0 %v1075_v55  ;;  %v1079_v63 = vmax.f32 %v840_v57, 0.0  ;;  %4293 = vmatpush3.bf16.msra.mxu1 %v4290_v28  ;;  %v1499_v28 = vld [vmem:[#allocation14 + $0xa0] sm:$0xff] }
 0x277   : > { %v1080_v61 = vmax.f32 %v842_v60, 0.0  ;;  %v845_v62 = vpop.f32.mrb[18].mxu0 }
 0x278   : > { %v846_v1 = vadd.f32 %v845_v62, %v5525_v0  ;;  %v847_v40 = vpop.f32.mrb[19].mxu0 }
 0x279   : > { %v848_v42 = vadd.f32 %v847_v40, %v5528_v2  ;;  %1254 = vmatprep.mubr.f32.mxu0 %v1080_v61 }
 0x27a   : > { %1255 = vmatmul.mubr.f32.gmra.mrb[48].mxu0 %v1079_v63  ;;  %v1083_v10 = vmax.f32 %v846_v1, 0.0 }
 0x27b   : > { %v1084_v58 = vmax.f32 %v848_v42, 0.0  ;;  %v851_v8 = vpop.f32.mrb[20].mxu0 }
 0x27c   : > { %v852_v16 = vadd.f32 %v851_v8, %v5525_v0  ;;  %v853_v18 = vpop.f32.mrb[21].mxu0 }
 0x27d   : > { %v854_v24 = vadd.f32 %v853_v18, %v5528_v2  ;;  %1259 = vmatprep.mubr.f32.mxu0 %v1084_v58 }
 0x27e   : > { %1260 = vmatmul.mubr.f32.gmra.mrb[50].mxu0 %v1083_v10  ;;  %v1087_v32 = vmax.f32 %v852_v16, 0.0 }
 0x27f   : > { %v1088_v26 = vmax.f32 %v854_v24, 0.0  ;;  %v857_v30 = vpop.f32.mrb[22].mxu0 }
 0x280   : > { %v858_v33 = vadd.f32 %v857_v30, %v5525_v0  ;;  %v859_v34 = vpop.f32.mrb[23].mxu0 }
 0x281   : > { %v860_v35 = vadd.f32 %v859_v34, %v5528_v2  ;;  %1264 = vmatprep.mubr.f32.mxu0 %v1088_v26 }
 0x282   : > { %1265 = vmatmul.mubr.f32.gmra.mrb[52].mxu0 %v1087_v32  ;;  %v1091_v38 = vmax.f32 %v858_v33, 0.0 }
 0x283   : > { %v1092_v36 = vmax.f32 %v860_v35, 0.0  ;;  %v863_v37 = vpop.f32.mrb[24].mxu0 }
 0x284   : > { %v864_v39 = vadd.f32 %v863_v37, %v5525_v0  ;;  %v865_v41 = vpop.f32.mrb[25].mxu0 }
 0x285   : > { %v866_v43 = vadd.f32 %v865_v41, %v5528_v2  ;;  %1269 = vmatprep.mubr.f32.mxu0 %v1092_v36 }
 0x286   : > { %1270 = vmatmul.mubr.f32.gmra.mrb[54].mxu0 %v1091_v38  ;;  %v1095_v46 = vmax.f32 %v864_v39, 0.0 }
 0x287   : > { %v1096_v44 = vmax.f32 %v866_v43, 0.0  ;;  %v869_v45 = vpop.f32.mrb[26].mxu0 }
 0x288   : > { %v870_v47 = vadd.f32 %v869_v45, %v5525_v0  ;;  %v871_v49 = vpop.f32.mrb[27].mxu0 }
 0x289   : > { %v872_v51 = vadd.f32 %v871_v49, %v5528_v2  ;;  %1274 = vmatprep.mubr.f32.mxu0 %v1096_v44  ;;  %v5629_v49 = vld [vmem:[#allocation10] ss:$0 sm:$0xff] }
 0x28a   : > { %1275 = vmatmul.mubr.f32.gmra.mrb[56].mxu0 %v1095_v46  ;;  %v1099_v5 = vmax.f32 %v870_v47, 0.0 }
 0x28b   : > { %v1100_v3 = vmax.f32 %v872_v51, 0.0  ;;  %v875_v4 = vpop.f32.mrb[28].mxu0 }
 0x28c   : > { %v876_v6 = vadd.f32 %v875_v4, %v5525_v0  ;;  %v877_v7 = vpop.f32.mrb[29].mxu0 }
 0x28d   : > { %v878_v9 = vadd.f32 %v877_v7, %v5528_v2  ;;  %1279 = vmatprep.mubr.f32.mxu0 %v1100_v3 }
 0x28e   : > { %1280 = vmatmul.mubr.f32.gmra.mrb[58].mxu0 %v1099_v5  ;;  %v1103_v13 = vmax.f32 %v876_v6, 0.0 }
 0x28f   : > { %v1104_v11 = vmax.f32 %v878_v9, 0.0  ;;  %v881_v12 = vpop.f32.mrb[30].mxu0 }
 0x290   : > { %v882_v14 = vadd.f32 %v881_v12, %v5525_v0  ;;  %v883_v15 = vpop.f32.mrb[31].mxu0  ;;  %v1325_v0 = vld [vmem:[#allocation11 + $0x70] sm:$0xff] }
 0x291   : > { %v884_v17 = vadd.f32 %v883_v15, %v5528_v2  ;;  %1284 = vmatprep.mubr.f32.mxu0 %v1104_v11  ;;  %v4294_v31 = vpack.c.bf16 %v1326_v29, %v1325_v0  ;;  %v1495_v2 = vld [vmem:[#allocation14 + $0x80] sm:$0xff]  ;;  %v1480_v12 = vld [vmem:[#allocation14 + $0x8] sm:$0xff] }
 0x292   : > { %1285 = vmatmul.mubr.f32.gmra.mrb[60].mxu0 %v1103_v13  ;;  %v1107_v20 = vmax.f32 %v882_v14, 0.0  ;;  %v4298_v53 = vpack.c.bf16 %v1496_v52, %v1495_v2  ;;  %v1479_v11 = vld [vmem:[#allocation14] sm:$0xff]  ;;  %v1497_v13 = vld [vmem:[#allocation14 + $0x90] sm:$0xff]  ;;  %v1498_v14 = vld [vmem:[#allocation14 + $0x98] sm:$0xff]  ;;  %v4304_v52 = vpack.c.bf16 %v1482_v27, %v1481_v25 }
 0x293   : > { %v1108_v19 = vmax.f32 %v884_v17, 0.0  ;;  %4295 = vmatprep.subr.bf16.mxu1 %v4294_v31  ;;  %v4302_v23 = vpack.c.bf16 %v1498_v14, %v1497_v13  ;;  %v1500_v0 = vld [vmem:[#allocation14 + $0xa8] sm:$0xff] }
 0x294   : > { %4297 = vmatpush3.bf16.msra.mxu1 %v4294_v31 }
 0x295   : > { %1289 = vmatprep.mubr.f32.mxu0 %v1108_v19  ;;  %4299 = vmatprep.subr.bf16.mxu1 %v4298_v53 }
 0x296   : > { %1290 = vmatmul.mubr.f32.gmra.mrb[62].mxu0 %v1107_v20  ;;  %v4300_v20 = vpack.c.bf16 %v1480_v12, %v1479_v11 }
 0x29e   : > { %v5565_v54 = vpop.f32.mrb[0].mxu1 }
 0x29f   : > { %v5567_v55 = vpop.f32.mrb[1].mxu1 }
 0x2a2   : > { %v5569_v57 = vpop.f32.mrb[2].mxu1 }
 0x2a3   : > { %v5571_v59 = vpop.f32.mrb[3].mxu1 }
 0x2a6   : > { %v5573_v60 = vpop.f32.mrb[4].mxu1 }
 0x2a7   : > { %v5575_v61 = vpop.f32.mrb[5].mxu1 }
 0x2aa   : > { %v5577_v62 = vpop.f32.mrb[6].mxu1 }
 0x2ab   : > { %v5579_v63 = vpop.f32.mrb[7].mxu1 }
 0x2ae   : > { %v5581_v1 = vpop.f32.mrb[8].mxu1 }
 0x2af   : > { %v5583_v40 = vpop.f32.mrb[9].mxu1 }
 0x2b2   : > { %v5585_v42 = vpop.f32.mrb[10].mxu1 }
 0x2b3   : > { %v5587_v58 = vpop.f32.mrb[11].mxu1 }
 0x2b6   : > { %v5589_v8 = vpop.f32.mrb[12].mxu1 }
 0x2b7   : > { %v5591_v10 = vpop.f32.mrb[13].mxu1 }
 0x2ba   : > { %v5593_v16 = vpop.f32.mrb[14].mxu1 }
 0x2bb   : > { %v5595_v18 = vpop.f32.mrb[15].mxu1 }
 0x2be   : > { %v5597_v24 = vpop.f32.mrb[16].mxu1 }
 0x2bf   : > { %v5599_v26 = vpop.f32.mrb[17].mxu1 }
 0x2c2   : > { %v5601_v30 = vpop.f32.mrb[18].mxu1 }
 0x2c3   : > { %v5603_v32 = vpop.f32.mrb[19].mxu1 }
 0x2c6   : > { %v5605_v33 = vpop.f32.mrb[20].mxu1 }
 0x2c7   : > { %v5607_v34 = vpop.f32.mrb[21].mxu1 }
 0x2ca   : > { %v5609_v35 = vpop.f32.mrb[22].mxu1 }
 0x2cb   : > { %v5611_v36 = vpop.f32.mrb[23].mxu1 }
 0x2ce   : > { %v5613_v37 = vpop.f32.mrb[24].mxu1 }
 0x2cf   : > { %v5615_v38 = vpop.f32.mrb[25].mxu1 }
 0x2d2   : > { %v5617_v39 = vpop.f32.mrb[26].mxu1 }
 0x2d3   : > { %v5619_v41 = vpop.f32.mrb[27].mxu1 }
 0x2d6   : > { %v5621_v43 = vpop.f32.mrb[28].mxu1 }
 0x2d7   : > { %v5623_v44 = vpop.f32.mrb[29].mxu1 }
 0x2da   : > { %v5625_v45 = vpop.f32.mrb[30].mxu1 }
 0x2db   : > { %v5627_v46 = vpop.f32.mrb[31].mxu1 }
 0x32d   : > { %v3802_v47 = vpop.f32.mrb[32].mxu0 }
 0x32e   : > { %v3803_v51 = vpop.f32.mrb[33].mxu0 }
 0x32f   : > { %v3804_v3 = vadd.f32 %v3803_v51, %v3802_v47  ;;  %v4306_v51 = vpack.c.bf16 %v1500_v0, %v1499_v28 }
 0x331   : > { %v1217_v4 = vadd.f32 %v3804_v3, %v5629_v49  ;;  %v3805_v5 = vpop.f32.mrb[34].mxu0  ;;  %v1483_v3 = vld [vmem:[#allocation14 + $0x20] sm:$0xff] }
 0x332   : > { %v3806_v6 = vpop.f32.mrb[35].mxu0 }
 0x333   : > { %v1295_v7 = vmax.f32 %v1217_v4, 0.0  ;;  %v3807_v9 = vadd.f32 %v3806_v6, %v3805_v5  ;;  %v1484_v4 = vld [vmem:[#allocation14 + $0x28] sm:$0xff]  ;;  %v1501_v5 = vld [vmem:[#allocation14 + $0xb0] sm:$0xff]  ;;  %v1502_v6 = vld [vmem:[#allocation14 + $0xb8] sm:$0xff] }
 0x334   : > { %v4308_v12 = vpack.c.bf16 %v1484_v4, %v1483_v3 }
 0x335   : > { %v1222_v15 = vadd.f32 %v3807_v9, %v5629_v49  ;;  %v3808_v17 = vpop.f32.mrb[36].mxu0  ;;  %4026 = vmatprep.mubr.f32.mxu1 %v1295_v7 }
 0x336   : > { %v3809_v19 = vpop.f32.mrb[37].mxu0 }
 0x337   : > { %v1296_v21 = vmax.f32 %v1222_v15, 0.0  ;;  %v3810_v22 = vadd.f32 %v3809_v19, %v3808_v17  ;;  %v4310_v15 = vpack.c.bf16 %v1502_v6, %v1501_v5  ;;  %v1485_v17 = vld [vmem:[#allocation14 + $0x30] sm:$0xff]  ;;  %v1486_v19 = vld [vmem:[#allocation14 + $0x38] sm:$0xff] }
 0x338   : > { %v4312_v27 = vpack.c.bf16 %v1486_v19, %v1485_v17 }
 0x339   : > { %v1227_v29 = vadd.f32 %v3810_v22, %v5629_v49  ;;  %v3811_v31 = vpop.f32.mrb[38].mxu0  ;;  %4027 = vmatmul.mubr.f32.vlgmr.msra.gmra.mrb[32].mxu1 %v1296_v21  ;;  %v1504_v21 = vld [vmem:[#allocation14 + $0xc8] sm:$0xff] }
 0x33a   : > { %v3812_v2 = vpop.f32.mrb[39].mxu0  ;;  %4301 = vmatpush3.bf16.msra.mxu1 %v4300_v20  ;;  %v1503_v20 = vld [vmem:[#allocation14 + $0xc0] sm:$0xff] }
 0x33b   : > { %v1297_v53 = vmax.f32 %v1227_v29, 0.0  ;;  %v3813_v47 = vadd.f32 %v3812_v2, %v3811_v31  ;;  %4303 = vmatprep.subr.bf16.mxu1 %v4302_v23  ;;  %v4314_v29 = vpack.c.bf16 %v1504_v21, %v1503_v20  ;;  %v1487_v31 = vld [vmem:[#allocation14 + $0x40] sm:$0xff]  ;;  %v1488_v2 = vld [vmem:[#allocation14 + $0x48] sm:$0xff] }
 0x33c   : > { %v4316_v4 = vpack.c.bf16 %v1488_v2, %v1487_v31 }
 0x33d   : > { %v1232_v7 = vadd.f32 %v3813_v47, %v5629_v49  ;;  %v3814_v9 = vpop.f32.mrb[40].mxu0  ;;  %4029 = vmatprep.mubr.f32.mxu1 %v1297_v53  ;;  %v1506_v53 = vld [vmem:[#allocation14 + $0xd8] sm:$0xff] }
 0x33e   : > { %v3815_v11 = vpop.f32.mrb[41].mxu0  ;;  %4305 = vmatpush3.bf16.msra.mxu1 %v4304_v52  ;;  %v1505_v52 = vld [vmem:[#allocation14 + $0xd0] sm:$0xff] }
 0x33f   : > { %v1298_v13 = vmax.f32 %v1232_v7, 0.0  ;;  %v3816_v14 = vadd.f32 %v3815_v11, %v3814_v9  ;;  %4307 = vmatprep.subr.bf16.mxu1 %v4306_v51  ;;  %v4318_v7 = vpack.c.bf16 %v1506_v53, %v1505_v52  ;;  %v1489_v9 = vld [vmem:[#allocation14 + $0x50] sm:$0xff]  ;;  %v1490_v11 = vld [vmem:[#allocation14 + $0x58] sm:$0xff] }
 0x340   : > { %v4320_v19 = vpack.c.bf16 %v1490_v11, %v1489_v9 }
 0x341   : > { %v1237_v22 = vadd.f32 %v3816_v14, %v5629_v49  ;;  %v3817_v23 = vpop.f32.mrb[42].mxu0  ;;  %4030 = vmatmul.mubr.f32.gmra.mrb[34].mxu1 %v1298_v13  ;;  %v1508_v13 = vld [vmem:[#allocation14 + $0xe8] sm:$0xff] }
 0x342   : > { %v3818_v25 = vpop.f32.mrb[43].mxu0  ;;  %4309 = vmatpush3.bf16.msra.mxu1 %v4308_v12  ;;  %v1507_v12 = vld [vmem:[#allocation14 + $0xe0] sm:$0xff] }
 0x343   : > { %v1299_v28 = vmax.f32 %v1237_v22, 0.0  ;;  %v3819_v0 = vadd.f32 %v3818_v25, %v3817_v23  ;;  %4311 = vmatprep.subr.bf16.mxu1 %v4310_v15  ;;  %v4322_v22 = vpack.c.bf16 %v1508_v13, %v1507_v12  ;;  %v1491_v23 = vld [vmem:[#allocation14 + $0x60] sm:$0xff]  ;;  %v1492_v25 = vld [vmem:[#allocation14 + $0x68] sm:$0xff] }
 0x344   : > { %v4324_v2 = vpack.c.bf16 %v1492_v25, %v1491_v23 }
 0x345   : > { %v1242_v47 = vadd.f32 %v3819_v0, %v5629_v49  ;;  %v3820_v51 = vpop.f32.mrb[44].mxu0  ;;  %4032 = vmatprep.mubr.f32.mxu1 %v1299_v28  ;;  %v1510_v28 = vld [vmem:[#allocation14 + $0xf8] sm:$0xff] }
 0x346   : > { %v3821_v3 = vpop.f32.mrb[45].mxu0  ;;  %4313 = vmatpush3.bf16.msra.mxu1 %v4312_v27  ;;  %v1509_v27 = vld [vmem:[#allocation14 + $0xf0] sm:$0xff] }
 0x347   : > { %v1300_v5 = vmax.f32 %v1242_v47, 0.0  ;;  %v3822_v6 = vadd.f32 %v3821_v3, %v3820_v51  ;;  %4315 = vmatprep.subr.bf16.mxu1 %v4314_v29  ;;  %v4326_v47 = vpack.c.bf16 %v1510_v28, %v1509_v27  ;;  %v1493_v51 = vld [vmem:[#allocation14 + $0x70] sm:$0xff]  ;;  %v1494_v3 = vld [vmem:[#allocation14 + $0x78] sm:$0xff] }
 0x349   : > { %v1247_v14 = vadd.f32 %v3822_v6, %v5629_v49  ;;  %v3823_v15 = vpop.f32.mrb[46].mxu0  ;;  %4033 = vmatmul.mubr.f32.gmra.mrb[36].mxu1 %v1300_v5 }
 0x34a   : > { %v3824_v17 = vpop.f32.mrb[47].mxu0  ;;  %4317 = vmatpush3.bf16.msra.mxu1 %v4316_v4 }
 0x34b   : > { %v1301_v20 = vmax.f32 %v1247_v14, 0.0  ;;  %v3825_v21 = vadd.f32 %v3824_v17, %v3823_v15  ;;  %4319 = vmatprep.subr.bf16.mxu1 %v4318_v7  ;;  %v4328_v7 = vpack.c.bf16 %v1494_v3, %v1493_v51 }
 0x34d   : > { %v1252_v0 = vadd.f32 %v3825_v21, %v5629_v49  ;;  %v3826_v29 = vpop.f32.mrb[48].mxu0  ;;  %4035 = vmatprep.mubr.f32.mxu1 %v1301_v20 }
 0x34e   : > { %v3827_v31 = vpop.f32.mrb[49].mxu0  ;;  %4321 = vmatpush3.bf16.msra.mxu1 %v4320_v19 }
 0x34f   : > { %v1302_v52 = vmax.f32 %v1252_v0, 0.0  ;;  %v3828_v53 = vadd.f32 %v3827_v31, %v3826_v29  ;;  %4323 = vmatprep.subr.bf16.mxu1 %v4322_v22 }
 0x351   : > { %v1257_v4 = vadd.f32 %v3828_v53, %v5629_v49  ;;  %v3829_v5 = vpop.f32.mrb[50].mxu0  ;;  %4036 = vmatmul.mubr.f32.gmra.mrb[38].mxu1 %v1302_v52  ;;  %v719_v53 = vsub.s32 3, %v5511_v48 }
 0x352   : > { %v3830_v6 = vpop.f32.mrb[51].mxu0  ;;  %4325 = vmatpush3.bf16.msra.mxu1 %v4324_v2 }
 0x353   : > { %v1303_v9 = vmax.f32 %v1257_v4, 0.0  ;;  %v3831_v11 = vadd.f32 %v3830_v6, %v3829_v5  ;;  %4327 = vmatprep.subr.bf16.mxu1 %v4326_v47  ;;  %v5647_v6 = vrot.slane %v5518_v56, %v719_v53 }
 0x355   : > { %v1262_v12 = vadd.f32 %v3831_v11, %v5629_v49  ;;  %v3832_v13 = vpop.f32.mrb[52].mxu0  ;;  %4038 = vmatprep.mubr.f32.mxu1 %v1303_v9  ;;  %v715_v11 = vsub.s32 2, %v5511_v48 }
 0x356   : > { %v3833_v14 = vpop.f32.mrb[53].mxu0  ;;  %4329 = vmatpush3.bf16.msra.mxu1 %v4328_v7 }
 0x357   : > { %v1304_v15 = vmax.f32 %v1262_v12, 0.0  ;;  %v3834_v17 = vadd.f32 %v3833_v14, %v3832_v13 }
 0x359   : > { %v1267_v19 = vadd.f32 %v3834_v17, %v5629_v49  ;;  %v3835_v20 = vpop.f32.mrb[54].mxu0  ;;  %4039 = vmatmul.mubr.f32.gmra.mrb[40].mxu1 %v1304_v15  ;;  %v955_v15 = vadd.f32 %v5567_v55, %v5647_v6  ;;  %v967_v55 = vadd.f32 %v5575_v61, %v5647_v6  ;;  %v979_v61 = vadd.f32 %v5583_v40, %v5647_v6 }
 0x35a   : > { %v3836_v21 = vpop.f32.mrb[55].mxu0  ;;  %v991_v40 = vadd.f32 %v5591_v10, %v5647_v6  ;;  %v1003_v10 = vadd.f32 %v5599_v26, %v5647_v6  ;;  %v1015_v26 = vadd.f32 %v5607_v34, %v5647_v6  ;;  %v1027_v34 = vadd.f32 %v5615_v38, %v5647_v6 }
 0x35b   : > { %v1305_v22 = vmax.f32 %v1267_v19, 0.0  ;;  %v3837_v23 = vadd.f32 %v3836_v21, %v3835_v20  ;;  %v5654_v20 = vrot.slane %v5518_v56, %v715_v11  ;;  %v1039_v38 = vadd.f32 %v5623_v44, %v5647_v6 }
 0x35d   : > { %v1272_v25 = vadd.f32 %v3837_v23, %v5629_v49  ;;  %v3838_v27 = vpop.f32.mrb[56].mxu0  ;;  %4041 = vmatprep.mubr.f32.mxu1 %v1305_v22  ;;  %v1050_v22 = vmax.f32 %v955_v15, 0.0  ;;  %v961_v23 = vadd.f32 %v5571_v59, %v5647_v6  ;;  %v959_v56 = vadd.f32 %v5569_v57, %v5654_v20 }
 0x35e   : > { %v3839_v28 = vpop.f32.mrb[57].mxu0  ;;  %v973_v59 = vadd.f32 %v5579_v63, %v5647_v6  ;;  %v971_v57 = vadd.f32 %v5577_v62, %v5654_v20  ;;  %v985_v63 = vadd.f32 %v5587_v58, %v5647_v6  ;;  %v983_v62 = vadd.f32 %v5585_v42, %v5654_v20 }
 0x35f   : > { %v1306_v0 = vmax.f32 %v1272_v25, 0.0  ;;  %v3840_v29 = vadd.f32 %v3839_v28, %v3838_v27  ;;  %v953_v27 = vadd.f32 %v5565_v54, %v5654_v20  ;;  %v1054_v28 = vmax.f32 %v961_v23, 0.0 }
 0x360   : > { %v965_v54 = vadd.f32 %v5573_v60, %v5654_v20  ;;  %v1061_v53 = vmax.f32 %v971_v57, 0.0  ;;  %v977_v60 = vadd.f32 %v5581_v1, %v5654_v20  ;;  %v997_v58 = vadd.f32 %v5595_v18, %v5647_v6  ;;  %v1688_v57 = vld [vmem:[#allocation17 + $0x48] sm:$0xff] }
 0x361   : > { %v1277_v31 = vadd.f32 %v3840_v29, %v5629_v49  ;;  %v3841_v2 = vpop.f32.mrb[58].mxu0  ;;  %4042 = vmatmul.mubr.f32.gmra.mrb[42].mxu1 %v1306_v0  ;;  %v1049_v0 = vmax.f32 %v953_v27, 0.0  ;;  %v1053_v29 = vmax.f32 %v959_v56, 0.0  ;;  %v989_v1 = vadd.f32 %v5589_v8, %v5654_v20  ;;  %v1679_v56 = vld [vmem:[#allocation17] sm:$0xff] }
 0x362   : > { %v3842_v52 = vpop.f32.mrb[59].mxu0  ;;  %v995_v42 = vadd.f32 %v5593_v16, %v5654_v20  ;;  %v1009_v18 = vadd.f32 %v5603_v32, %v5647_v6  ;;  %v1001_v8 = vadd.f32 %v5597_v24, %v5654_v20  ;;  %v1007_v16 = vadd.f32 %v5601_v30, %v5654_v20 }
 0x363   : > { %v1307_v47 = vmax.f32 %v1277_v31, 0.0  ;;  %v3843_v51 = vadd.f32 %v3842_v52, %v3841_v2  ;;  %v1062_v31 = vmax.f32 %v973_v59, 0.0  ;;  %v1057_v2 = vmax.f32 %v965_v54, 0.0  ;;  %v1684_v54 = vld [vmem:[#allocation17 + $0x28] sm:$0xff] }
 0x364   : > { %v1066_v52 = vmax.f32 %v979_v61, 0.0  ;;  %v1077_v11 = vmax.f32 %v995_v42, 0.0  ;;  %v1021_v32 = vadd.f32 %v5611_v36, %v5647_v6  ;;  %v1085_v15 = vmax.f32 %v1007_v16, 0.0 }
 0x365   : > { %v1282_v3 = vadd.f32 %v3843_v51, %v5629_v49  ;;  %v3844_v4 = vpop.f32.mrb[60].mxu0  ;;  %4044 = vmatprep.mubr.f32.mxu1 %v1307_v47  ;;  %v1070_v47 = vmax.f32 %v985_v63, 0.0  ;;  %v1065_v51 = vmax.f32 %v977_v60, 0.0  ;;  %v1013_v24 = vadd.f32 %v5605_v33, %v5654_v20  ;;  %v1689_v63 = vld [vmem:[#allocation17 + $0x50] sm:$0xff] }
 0x366   : > { %v3845_v5 = vpop.f32.mrb[61].mxu0  ;;  %v1019_v30 = vadd.f32 %v5609_v35, %v5654_v20  ;;  %v1033_v36 = vadd.f32 %v5619_v41, %v5647_v6  ;;  %v1025_v33 = vadd.f32 %v5613_v37, %v5654_v20  ;;  %v1031_v35 = vadd.f32 %v5617_v39, %v5654_v20 }
 0x367   : > { %v1308_v7 = vmax.f32 %v1282_v3, 0.0  ;;  %v3846_v9 = vadd.f32 %v3845_v5, %v3844_v4  ;;  %v1074_v3 = vmax.f32 %v991_v40, 0.0  ;;  %v1069_v4 = vmax.f32 %v983_v62, 0.0  ;;  %v1692_v40 = vld [vmem:[#allocation17 + $0x68] sm:$0xff]  ;;  %v1693_v62 = vld [vmem:[#allocation17 + $0x70] sm:$0xff] }
 0x368   : > { %v1078_v5 = vmax.f32 %v997_v58, 0.0  ;;  %v1102_v23 = vmax.f32 %v1033_v36, 0.0  ;;  %v1106_v27 = vmax.f32 %v1039_v38, 0.0  ;;  %v1045_v41 = vadd.f32 %v5627_v46, %v5647_v6  ;;  %v1681_v46 = vld [vmem:[#allocation17 + $0x10] sm:$0xff]  ;;  %v1682_v6 = vld [vmem:[#allocation17 + $0x18] sm:$0xff] }
 0x369   : > { %v1287_v12 = vadd.f32 %v3846_v9, %v5629_v49  ;;  %v3847_v13 = vpop.f32.mrb[62].mxu0  ;;  %4045 = vmatmul.mubr.f32.gmra.mrb[44].mxu1 %v1308_v7  ;;  %v1073_v7 = vmax.f32 %v989_v1, 0.0  ;;  %v1082_v9 = vmax.f32 %v1003_v10, 0.0  ;;  %v1037_v37 = vadd.f32 %v5621_v43, %v5654_v20  ;;  %v1683_v43 = vld [vmem:[#allocation17 + $0x20] sm:$0xff]  ;;  %v5719_v10 = vld [vmem:[#allocation13] ss:$0 sm:$0xff] }
 0x36a   : > { %v3848_v14 = vpop.f32.mrb[63].mxu0  ;;  %v1043_v44 = vadd.f32 %v5625_v45, %v5654_v20  ;;  %v1685_v45 = vld [vmem:[#allocation17 + $0x30] sm:$0xff]  ;;  %v1686_v20 = vld [vmem:[#allocation17 + $0x38] sm:$0xff] }
 0x36b   : > { %v1309_v17 = vmax.f32 %v1287_v12, 0.0  ;;  %v3849_v19 = vadd.f32 %v3848_v14, %v3847_v13  ;;  %v1086_v12 = vmax.f32 %v1009_v18, 0.0  ;;  %v1081_v13 = vmax.f32 %v1001_v8, 0.0 }
 0x36c   : > { %v1090_v14 = vmax.f32 %v1015_v26, 0.0  ;;  %v1109_v39 = vmax.f32 %v1043_v44, 0.0  ;;  %v4342_v61 = vpack.c.bf16 %v1686_v20, %v1685_v45 }
 0x36d   : > { %v1292_v21 = vadd.f32 %v3849_v19, %v5629_v49  ;;  %4047 = vmatprep.mubr.f32.mxu1 %v1309_v17  ;;  %v1058_v49 = vmax.f32 %v967_v55, 0.0  ;;  %v1094_v17 = vmax.f32 %v1021_v32, 0.0  ;;  %v1089_v19 = vmax.f32 %v1013_v24, 0.0 }
 0x36e   : > { %v1110_v55 = vmax.f32 %v1045_v41, 0.0 }
 0x36f   : > { %v1310_v25 = vmax.f32 %v1292_v21, 0.0  ;;  %v1098_v21 = vmax.f32 %v1027_v34, 0.0 }
 0x371   : > { %4048 = vmatmul.mubr.f32.gmra.mrb[46].mxu1 %v1310_v25  ;;  %v1097_v25 = vmax.f32 %v1025_v33, 0.0 }
 0x372   : > { %1582 = vmatprep.mubr.f32.mxu1 %v1050_v22  ;;  %v1093_v22 = vmax.f32 %v1019_v30, 0.0 }
 0x375   : > { %1583 = vmatmul.mubr.f32.vlgmr.msra.gmra.mrb[48].mxu1 %v1049_v0  ;;  %v1105_v0 = vmax.f32 %v1037_v37, 0.0 }
 0x376   : > { %1587 = vmatprep.mubr.f32.mxu1 %v1054_v28  ;;  %v1101_v28 = vmax.f32 %v1031_v35, 0.0 }
 0x379   : > { %1588 = vmatmul.mubr.f32.gmra.mrb[50].mxu1 %v1053_v29  ;;  %v4334_v29 = vpack.c.bf16 %v1682_v6, %v1681_v46 }
 0x37a   : > { %1592 = vmatprep.mubr.f32.mxu1 %v1058_v49  ;;  %v1680_v49 = vld [vmem:[#allocation17 + $0x8] sm:$0xff] }
 0x37b   : > { %v4330_v59 = vpack.c.bf16 %v1680_v49, %v1679_v56 }
 0x37d   : > { %1593 = vmatmul.mubr.f32.gmra.mrb[52].mxu1 %v1057_v2  ;;  %4331 = vmatprep.subr.bf16.mxu0 %v4330_v59  ;;  %v1687_v2 = vld [vmem:[#allocation17 + $0x40] sm:$0xff] }
 0x37e   : > { %1597 = vmatprep.mubr.f32.mxu1 %v1062_v31  ;;  %4333 = vmatpush3.bf16.msra.mxu0 %v4330_v59  ;;  %v4338_v31 = vpack.c.bf16 %v1684_v54, %v1683_v43 }
 0x37f   : > { %4335 = vmatprep.subr.bf16.mxu0 %v4334_v29 }
 0x381   : > { %1598 = vmatmul.mubr.f32.gmra.mrb[54].mxu1 %v1061_v53  ;;  %v1690_v53 = vld [vmem:[#allocation17 + $0x58] sm:$0xff] }
 0x382   : > { %1602 = vmatprep.mubr.f32.mxu1 %v1066_v52  ;;  %4337 = vmatpush3.bf16.msra.mxu0 %v4334_v29  ;;  %v4346_v52 = vpack.c.bf16 %v1688_v57, %v1687_v2  ;;  %v4350_v60 = vpack.c.bf16 %v1690_v53, %v1689_v63 }
 0x383   : > { %4339 = vmatprep.subr.bf16.mxu0 %v4338_v31 }
 0x385   : > { %1603 = vmatmul.mubr.f32.gmra.mrb[56].mxu1 %v1065_v51 }
 0x386   : > { %1607 = vmatprep.mubr.f32.mxu1 %v1070_v47  ;;  %4341 = vmatpush3.bf16.msra.mxu0 %v4338_v31  ;;  %v1691_v47 = vld [vmem:[#allocation17 + $0x60] sm:$0xff] }
 0x387   : > { %4343 = vmatprep.subr.bf16.mxu0 %v4342_v61  ;;  %v4354_v51 = vpack.c.bf16 %v1692_v40, %v1691_v47 }
 0x389   : > { %1608 = vmatmul.mubr.f32.gmra.mrb[58].mxu1 %v1069_v4  ;;  %v4933_v4 = vmov 1966171168  }
 0x38a   : > { %1612 = vmatprep.mubr.f32.mxu1 %v1074_v3  ;;  %4345 = vmatpush3.bf16.msra.mxu0 %v4342_v61  ;;  %v1694_v3 = vld [vmem:[#allocation17 + $0x78] sm:$0xff]  ;;  %v1865_v1 = vunpack.c.l.s4 %v4933_v4 }
 0x38b   : > { %4347 = vmatprep.subr.bf16.mxu0 %v4346_v52  ;;  %v4358_v58 = vpack.c.bf16 %v1694_v3, %v1693_v62 }
 0x38d   : > { %1613 = vmatmul.mubr.f32.gmra.mrb[60].mxu1 %v1073_v7 }
 0x38e   : > { %1617 = vmatprep.mubr.f32.mxu1 %v1078_v5  ;;  %4349 = vmatpush3.bf16.msra.mxu0 %v4346_v52  ;;  %v1866_v5 = vunpack.c.0.s8 %v1865_v1 }
 0x38f   : > { %4351 = vmatprep.subr.bf16.mxu0 %v4350_v60 }
 0x390   : > { %v5722_v7 = vsub.s32 %v1866_v5, %v5511_v48 }
 0x391   : > { %1618 = vmatmul.mubr.f32.gmra.mrb[62].mxu1 %v1077_v11 }
 0x392   : > { %1622 = vmatprep.mubr.f32.mxu1 %v1082_v9  ;;  %4353 = vmatpush3.bf16.msra.mxu0 %v4350_v60 }
 0x393   : > { %4355 = vmatprep.subr.bf16.mxu0 %v4354_v51 }
 0x395   : > { %1623 = vmatmul.mubr.f32.gmra.mrb[64].mxu1 %v1081_v13 }
 0x396   : > { %1627 = vmatprep.mubr.f32.mxu1 %v1086_v12  ;;  %4357 = vmatpush3.bf16.msra.mxu0 %v4354_v51 }
 0x397   : > { %4359 = vmatprep.subr.bf16.mxu0 %v4358_v58 }
 0x399   : > { %1628 = vmatmul.mubr.f32.gmra.mrb[66].mxu1 %v1085_v15 }
 0x39a   : > { %1632 = vmatprep.mubr.f32.mxu1 %v1090_v14  ;;  %4361 = vmatpush3.bf16.msra.mxu0 %v4358_v58 }
 0x39d   : > { %1633 = vmatmul.mubr.f32.gmra.mrb[68].mxu1 %v1089_v19 }
 0x39e   : > { %1637 = vmatprep.mubr.f32.mxu1 %v1094_v17 }
 0x3a1   : > { %1638 = vmatmul.mubr.f32.gmra.mrb[70].mxu1 %v1093_v22 }
 0x3a2   : > { %1642 = vmatprep.mubr.f32.mxu1 %v1098_v21 }
 0x3a5   : > { %1643 = vmatmul.mubr.f32.gmra.mrb[72].mxu1 %v1097_v25 }
 0x3a6   : > { %1647 = vmatprep.mubr.f32.mxu1 %v1102_v23 }
 0x3a9   : > { %1648 = vmatmul.mubr.f32.gmra.mrb[74].mxu1 %v1101_v28 }
 0x3aa   : > { %1652 = vmatprep.mubr.f32.mxu1 %v1106_v27 }
 0x3ad   : > { %1653 = vmatmul.mubr.f32.gmra.mrb[76].mxu1 %v1105_v0 }
 0x3ae   : > { %1657 = vmatprep.mubr.f32.mxu1 %v1110_v55 }
 0x3b1   : > { %1658 = vmatmul.mubr.f32.gmra.mrb[78].mxu1 %v1109_v39 }
 0x40c   : > { %v4028_v42 = vpop.f32.mrb[32].mxu1 }
 0x40d   : > { %v1406_v9 = vadd.f32 %v4028_v42, %v5719_v10  ;;  %v1400_v18 = vpop.f32.mrb[33].mxu1 }
 0x40e   : > { %v1401_v11 = vadd.f32 %v5719_v10, %v1400_v18 }
 0x40f   : > { %v1912_v8 = vcombine.high %v1406_v9, %v1406_v9  ;;  %v1919_v12 = vrot.slane %v1406_v9, %v5722_v7 }
 0x410   : > { %v1863_v26 = vcombine.high %v1401_v11, %v1401_v11  ;;  %v1870_v13 = vrot.slane %v1401_v11, %v5722_v7 }
 0x411   : > { %v1926_v16 = vrot.slane %v1912_v8, %v5722_v7  ;;  %v1927_v14 = vcombine.high %v1919_v12, %v1919_v12  ;;  %v1935_v32 = vrot.slane %v1919_v12, %v5722_v7 }
 0x412   : > { %v1877_v48 = vrot.slane %v1863_v26, %v5722_v7  ;;  %v1878_v15 = vcombine.high %v1870_v13, %v1870_v13  ;;  %v1886_v24 = vrot.slane %v1870_v13, %v5722_v7 }
 0x413   : > { %v1928_v17 = vcombine.high %v1926_v16, %v1926_v16  ;;  %v1942_v34 = vrot.slane %v1926_v16, %v5722_v7  ;;  %v1949_v19 = vrot.slane %v1927_v14, %v5722_v7  ;;  %v1957_v30 = vcombine.high %v1935_v32, %v1935_v32 }
 0x414   : > { %v2682_v21 = vrot.slane %v1935_v32, %v5516_v50  ;;  %v1879_v36 = vcombine.high %v1877_v48, %v1877_v48  ;;  %v1893_v22 = vrot.slane %v1877_v48, %v5722_v7  ;;  %v1900_v33 = vrot.slane %v1878_v15, %v5722_v7  ;;  %v4031_v23 = vpop.f32.mrb[34].mxu1 }
 0x415   : > { %v1956_v38 = vrot.slane %v1928_v17, %v5722_v7  ;;  %v1958_v25 = vcombine.high %v1942_v34, %v1942_v34  ;;  %v1959_v35 = vcombine.high %v1949_v19, %v1949_v19  ;;  %v2686_v27 = vrot.slane %v1949_v19, %v5516_v50  ;;  %v1410_v41 = vpop.f32.mrb[35].mxu1 }
 0x416   : > { %v2690_v28 = vrot.slane %v1957_v30, %v5516_v50  ;;  %v2698_v37 = vrot.slane %v1942_v34, %v5516_v50  ;;  %3295 = vst [vmem:[%s5742_s28 + $0x80] sm:$0xff] %v2682_v21  ;;  %v1907_v55 = vrot.slane %v1879_v36, %v5722_v7  ;;  %v1908_v0 = vcombine.high %v1886_v24, %v1886_v24 }
 0x417   : > { %v1960_v44 = vcombine.high %v1956_v38, %v1956_v38  ;;  %v2694_v39 = vrot.slane %v1959_v35, %v5516_v50  ;;  %v2702_v56 = vrot.slane %v1956_v38, %v5516_v50  ;;  %v2706_v49 = vrot.slane %v1958_v25, %v5516_v50  ;;  %3296 = vst [vmem:[%s5742_s28 + $0x90] sm:$0xff] %v2686_v27 }
 0x418   : > { %3297 = vst [vmem:[%s5742_s28 + $0xa0] sm:$0xff] %v2690_v28  ;;  %3299 = vst [vmem:[%s5742_s28 + $0xc0] sm:$0xff] %v2698_v37  ;;  %v1909_v59 = vcombine.high %v1893_v22, %v1893_v22  ;;  %v1910_v46 = vcombine.high %v1900_v33, %v1900_v33  ;;  %v1911_v6 = vcombine.high %v1907_v55, %v1907_v55 }
 0x419   : > { %v2650_v29 = vrot.slane %v1886_v24, %v5516_v50  ;;  %v2710_v43 = vrot.slane %v1960_v44, %v5516_v50  ;;  %3298 = vst [vmem:[%s5742_s28 + $0xb0] sm:$0xff] %v2694_v39  ;;  %3300 = vst [vmem:[%s5742_s28 + $0xd0] sm:$0xff] %v2702_v56  ;;  %v2654_v54 = vrot.slane %v1900_v33, %v5516_v50 }
 0x41a   : > { %3301 = vst [vmem:[%s5742_s28 + $0xe0] sm:$0xff] %v2706_v49  ;;  %v2658_v31 = vrot.slane %v1908_v0, %v5516_v50  ;;  %v2666_v45 = vrot.slane %v1893_v22, %v5516_v50  ;;  %v2662_v20 = vrot.slane %v1910_v46, %v5516_v50  ;;  %v2670_v61 = vrot.slane %v1907_v55, %v5516_v50 }
 0x41b   : > { %v2674_v2 = vrot.slane %v1909_v59, %v5516_v50  ;;  %v2678_v57 = vrot.slane %v1911_v6, %v5516_v50  ;;  %3287 = vst [vmem:[%s5742_s28] sm:$0xff] %v2650_v29  ;;  %3302 = vst [vmem:[%s5742_s28 + $0xf0] sm:$0xff] %v2710_v43  ;;  %v1416_v52 = vadd.f32 %v4031_v23, %v5719_v10 }
 0x41c   : > { %3288 = vst [vmem:[%s5742_s28 + $0x10] sm:$0xff] %v2654_v54  ;;  %3289 = vst [vmem:[%s5742_s28 + $0x20] sm:$0xff] %v2658_v31  ;;  %v1411_v63 = vadd.f32 %v5719_v10, %v1410_v41  ;;  %v4034_v53 = vpop.f32.mrb[36].mxu1 }
 0x41d   : > { %3291 = vst [vmem:[%s5742_s28 + $0x40] sm:$0xff] %v2666_v45  ;;  %3290 = vst [vmem:[%s5742_s28 + $0x30] sm:$0xff] %v2662_v20  ;;  %v2010_v60 = vcombine.high %v1416_v52, %v1416_v52  ;;  %v2017_v47 = vrot.slane %v1416_v52, %v5722_v7  ;;  %v1420_v62 = vpop.f32.mrb[37].mxu1  ;;  %v1426_v3 = vadd.f32 %v4034_v53, %v5719_v10 }
 0x41e   : > { %3292 = vst [vmem:[%s5742_s28 + $0x50] sm:$0xff] %v2670_v61  ;;  %3293 = vst [vmem:[%s5742_s28 + $0x60] sm:$0xff] %v2674_v2  ;;  %v1961_v40 = vcombine.high %v1411_v63, %v1411_v63  ;;  %v1968_v51 = vrot.slane %v1411_v63, %v5722_v7  ;;  %v5779_v58 = vadd.f32 %v5719_v10, %v1420_v62 }
 0x41f   : > { %3294 = vst [vmem:[%s5742_s28 + $0x70] sm:$0xff] %v2678_v57  ;;  %v2024_v4 = vrot.slane %v2010_v60, %v5722_v7  ;;  %v2025_v1 = vcombine.high %v2017_v47, %v2017_v47  ;;  %v2033_v5 = vrot.slane %v2017_v47, %v5722_v7  ;;  %v2108_v11 = vcombine.high %v1426_v3, %v1426_v3 }
 0x420   : > { %v1975_v42 = vrot.slane %v1961_v40, %v5722_v7  ;;  %v1976_v9 = vcombine.high %v1968_v51, %v1968_v51  ;;  %v1984_v18 = vrot.slane %v1968_v51, %v5722_v7  ;;  %v2115_v8 = vrot.slane %v1426_v3, %v5722_v7 }
 0x421   : > { %v2026_v12 = vcombine.high %v2024_v4, %v2024_v4  ;;  %v2040_v26 = vrot.slane %v2024_v4, %v5722_v7  ;;  %v2047_v13 = vrot.slane %v2025_v1, %v5722_v7  ;;  %v2055_v16 = vcombine.high %v2033_v5, %v2033_v5 }
 0x422   : > { %v2746_v14 = vrot.slane %v2033_v5, %v5516_v50  ;;  %v1977_v32 = vcombine.high %v1975_v42, %v1975_v42  ;;  %v1991_v48 = vrot.slane %v1975_v42, %v5722_v7  ;;  %v1998_v15 = vrot.slane %v1976_v9, %v5722_v7 }
 0x423   : > { %v2054_v24 = vrot.slane %v2026_v12, %v5722_v7  ;;  %v2056_v17 = vcombine.high %v2040_v26, %v2040_v26  ;;  %v2057_v34 = vcombine.high %v2047_v13, %v2047_v13  ;;  %v2750_v19 = vrot.slane %v2047_v13, %v5516_v50 }
 0x424   : > { %v2754_v30 = vrot.slane %v2055_v16, %v5516_v50  ;;  %v2762_v21 = vrot.slane %v2040_v26, %v5516_v50  ;;  %3311 = vst [vmem:[%s5742_s28 + $0x180] sm:$0xff] %v2746_v14  ;;  %v2005_v36 = vrot.slane %v1977_v32, %v5722_v7  ;;  %v2006_v22 = vcombine.high %v1984_v18, %v1984_v18  ;;  %v4037_v33 = vpop.f32.mrb[38].mxu1 }
 0x425   : > { %v2058_v23 = vcombine.high %v2054_v24, %v2054_v24  ;;  %v2758_v38 = vrot.slane %v2057_v34, %v5516_v50  ;;  %v2766_v25 = vrot.slane %v2054_v24, %v5516_v50  ;;  %v2770_v35 = vrot.slane %v2056_v17, %v5516_v50  ;;  %3312 = vst [vmem:[%s5742_s28 + $0x190] sm:$0xff] %v2750_v19  ;;  %v1430_v27 = vpop.f32.mrb[39].mxu1 }
 0x426   : > { %3313 = vst [vmem:[%s5742_s28 + $0x1a0] sm:$0xff] %v2754_v30  ;;  %3315 = vst [vmem:[%s5742_s28 + $0x1c0] sm:$0xff] %v2762_v21  ;;  %v2007_v41 = vcombine.high %v1991_v48, %v1991_v48  ;;  %v2008_v28 = vcombine.high %v1998_v15, %v1998_v15  ;;  %v2009_v37 = vcombine.high %v2005_v36, %v2005_v36 }
 0x427   : > { %v2714_v55 = vrot.slane %v1984_v18, %v5516_v50  ;;  %v2774_v0 = vrot.slane %v2058_v23, %v5516_v50  ;;  %3314 = vst [vmem:[%s5742_s28 + $0x1b0] sm:$0xff] %v2758_v38  ;;  %3316 = vst [vmem:[%s5742_s28 + $0x1d0] sm:$0xff] %v2766_v25  ;;  %v2718_v44 = vrot.slane %v1998_v15, %v5516_v50 }
 0x428   : > { %3317 = vst [vmem:[%s5742_s28 + $0x1e0] sm:$0xff] %v2770_v35  ;;  %v2722_v39 = vrot.slane %v2006_v22, %v5516_v50  ;;  %v2730_v56 = vrot.slane %v1991_v48, %v5516_v50  ;;  %v2726_v49 = vrot.slane %v2008_v28, %v5516_v50  ;;  %v2734_v59 = vrot.slane %v2005_v36, %v5516_v50 }
 0x429   : > { %v2738_v46 = vrot.slane %v2007_v41, %v5516_v50  ;;  %v2742_v6 = vrot.slane %v2009_v37, %v5516_v50  ;;  %3303 = vst [vmem:[%s5742_s28 + $0x100] sm:$0xff] %v2714_v55  ;;  %3318 = vst [vmem:[%s5742_s28 + $0x1f0] sm:$0xff] %v2774_v0  ;;  %v2122_v29 = vrot.slane %v2108_v11, %v5722_v7 }
 0x42a   : > { %3304 = vst [vmem:[%s5742_s28 + $0x110] sm:$0xff] %v2718_v44  ;;  %3305 = vst [vmem:[%s5742_s28 + $0x120] sm:$0xff] %v2722_v39  ;;  %v2123_v43 = vcombine.high %v2115_v8, %v2115_v8  ;;  %v2131_v54 = vrot.slane %v2115_v8, %v5722_v7  ;;  %v2059_v31 = vcombine.high %v5779_v58, %v5779_v58 }
 0x42b   : > { %3307 = vst [vmem:[%s5742_s28 + $0x140] sm:$0xff] %v2730_v56  ;;  %3306 = vst [vmem:[%s5742_s28 + $0x130] sm:$0xff] %v2726_v49  ;;  %v2066_v45 = vrot.slane %v5779_v58, %v5722_v7  ;;  %v1436_v20 = vadd.f32 %v4037_v33, %v5719_v10  ;;  %v5832_v61 = vadd.f32 %v5719_v10, %v1430_v27 }
 0x42c   : > { %3308 = vst [vmem:[%s5742_s28 + $0x150] sm:$0xff] %v2734_v59  ;;  %3309 = vst [vmem:[%s5742_s28 + $0x160] sm:$0xff] %v2738_v46  ;;  %v2124_v2 = vcombine.high %v2122_v29, %v2122_v29  ;;  %v2138_v57 = vrot.slane %v2122_v29, %v5722_v7  ;;  %v2145_v52 = vrot.slane %v2123_v43, %v5722_v7  ;;  %v4040_v51 = vpop.f32.mrb[40].mxu1 }
 0x42d   : > { %3310 = vst [vmem:[%s5742_s28 + $0x170] sm:$0xff] %v2742_v6  ;;  %v2153_v63 = vcombine.high %v2131_v54, %v2131_v54  ;;  %v2810_v53 = vrot.slane %v2131_v54, %v5516_v50  ;;  %v2073_v60 = vrot.slane %v2059_v31, %v5722_v7  ;;  %v2074_v47 = vcombine.high %v2066_v45, %v2066_v45  ;;  %v5841_v1 = vpop.f32.mrb[41].mxu1 }
 0x42e   : > { %v2082_v40 = vrot.slane %v2066_v45, %v5722_v7  ;;  %v2152_v62 = vrot.slane %v2124_v2, %v5722_v7  ;;  %v2154_v3 = vcombine.high %v2138_v57, %v2138_v57  ;;  %v2155_v58 = vcombine.high %v2145_v52, %v2145_v52 }
 0x42f   : > { %v2814_v4 = vrot.slane %v2145_v52, %v5516_v50  ;;  %v2818_v5 = vrot.slane %v2153_v63, %v5516_v50  ;;  %v2826_v42 = vrot.slane %v2138_v57, %v5516_v50  ;;  %3327 = vst [vmem:[%s5742_s28 + $0x280] sm:$0xff] %v2810_v53  ;;  %v2075_v9 = vcombine.high %v2073_v60, %v2073_v60 }
 0x430   : > { %v2089_v18 = vrot.slane %v2073_v60, %v5722_v7  ;;  %v2156_v11 = vcombine.high %v2152_v62, %v2152_v62  ;;  %v2822_v8 = vrot.slane %v2155_v58, %v5516_v50  ;;  %v2830_v12 = vrot.slane %v2152_v62, %v5516_v50 }
 0x431   : > { %v2834_v26 = vrot.slane %v2154_v3, %v5516_v50  ;;  %3328 = vst [vmem:[%s5742_s28 + $0x290] sm:$0xff] %v2814_v4  ;;  %3329 = vst [vmem:[%s5742_s28 + $0x2a0] sm:$0xff] %v2818_v5  ;;  %v2096_v13 = vrot.slane %v2074_v47, %v5722_v7  ;;  %v2103_v16 = vrot.slane %v2075_v9, %v5722_v7 }
 0x432   : > { %3331 = vst [vmem:[%s5742_s28 + $0x2c0] sm:$0xff] %v2826_v42  ;;  %v2104_v14 = vcombine.high %v2082_v40, %v2082_v40  ;;  %v2105_v32 = vcombine.high %v2089_v18, %v2089_v18  ;;  %v2838_v48 = vrot.slane %v2156_v11, %v5516_v50  ;;  %3330 = vst [vmem:[%s5742_s28 + $0x2b0] sm:$0xff] %v2822_v8 }
 0x433   : > { %3332 = vst [vmem:[%s5742_s28 + $0x2d0] sm:$0xff] %v2830_v12  ;;  %3333 = vst [vmem:[%s5742_s28 + $0x2e0] sm:$0xff] %v2834_v26  ;;  %v2778_v15 = vrot.slane %v2082_v40, %v5516_v50  ;;  %v2794_v24 = vrot.slane %v2089_v18, %v5516_v50  ;;  %v2206_v17 = vcombine.high %v1436_v20, %v1436_v20 }
 0x434   : > { %v2106_v34 = vcombine.high %v2096_v13, %v2096_v13  ;;  %v2107_v19 = vcombine.high %v2103_v16, %v2103_v16  ;;  %v2782_v30 = vrot.slane %v2096_v13, %v5516_v50  ;;  %v2786_v21 = vrot.slane %v2104_v14, %v5516_v50  ;;  %3334 = vst [vmem:[%s5742_s28 + $0x2f0] sm:$0xff] %v2838_v48  ;;  %v5878_v41 = vpop.f32.mrb[42].mxu1 }
 0x435   : > { %v2798_v36 = vrot.slane %v2103_v16, %v5516_v50  ;;  %v2802_v22 = vrot.slane %v2105_v32, %v5516_v50  ;;  %3319 = vst [vmem:[%s5742_s28 + $0x200] sm:$0xff] %v2778_v15  ;;  %3323 = vst [vmem:[%s5742_s28 + $0x240] sm:$0xff] %v2794_v24  ;;  %v2213_v33 = vrot.slane %v1436_v20, %v5722_v7  ;;  %v1450_v44 = vpop.f32.mrb[43].mxu1 }
 0x436   : > { %v2220_v23 = vrot.slane %v2206_v17, %v5722_v7  ;;  %v2790_v38 = vrot.slane %v2106_v34, %v5516_v50  ;;  %v2806_v25 = vrot.slane %v2107_v19, %v5516_v50  ;;  %3320 = vst [vmem:[%s5742_s28 + $0x210] sm:$0xff] %v2782_v30  ;;  %3321 = vst [vmem:[%s5742_s28 + $0x220] sm:$0xff] %v2786_v21 }
 0x437   : > { %v2157_v35 = vcombine.high %v5832_v61, %v5832_v61  ;;  %v2164_v27 = vrot.slane %v5832_v61, %v5722_v7  ;;  %3324 = vst [vmem:[%s5742_s28 + $0x250] sm:$0xff] %v2798_v36  ;;  %3325 = vst [vmem:[%s5742_s28 + $0x260] sm:$0xff] %v2802_v22  ;;  %v2221_v28 = vcombine.high %v2213_v33, %v2213_v33 }
 0x438   : > { %v2222_v37 = vcombine.high %v2220_v23, %v2220_v23  ;;  %v2229_v55 = vrot.slane %v2213_v33, %v5722_v7  ;;  %v2236_v0 = vrot.slane %v2220_v23, %v5722_v7  ;;  %3322 = vst [vmem:[%s5742_s28 + $0x230] sm:$0xff] %v2790_v38  ;;  %3326 = vst [vmem:[%s5742_s28 + $0x270] sm:$0xff] %v2806_v25 }
 0x439   : > { %v2171_v39 = vrot.slane %v2157_v35, %v5722_v7  ;;  %v2172_v56 = vcombine.high %v2164_v27, %v2164_v27  ;;  %v2180_v49 = vrot.slane %v2164_v27, %v5722_v7  ;;  %v1446_v59 = vadd.f32 %v4040_v51, %v5719_v10 }
 0x43a   : > { %v2243_v46 = vrot.slane %v2221_v28, %v5722_v7  ;;  %v2250_v6 = vrot.slane %v2222_v37, %v5722_v7  ;;  %v2251_v29 = vcombine.high %v2229_v55, %v2229_v55  ;;  %v2252_v43 = vcombine.high %v2236_v0, %v2236_v0 }
 0x43b   : > { %v2874_v54 = vrot.slane %v2229_v55, %v5516_v50  ;;  %v2890_v31 = vrot.slane %v2236_v0, %v5516_v50  ;;  %v2173_v45 = vcombine.high %v2171_v39, %v2171_v39  ;;  %v2187_v20 = vrot.slane %v2171_v39, %v5722_v7 }
 0x43c   : > { %v2253_v61 = vcombine.high %v2243_v46, %v2243_v46  ;;  %v2254_v2 = vcombine.high %v2250_v6, %v2250_v6  ;;  %v2878_v57 = vrot.slane %v2243_v46, %v5516_v50  ;;  %v2882_v52 = vrot.slane %v2251_v29, %v5516_v50  ;;  %v4046_v9 = vpop.f32.mrb[44].mxu1 }
 0x43d   : > { %v2894_v63 = vrot.slane %v2250_v6, %v5516_v50  ;;  %v2898_v53 = vrot.slane %v2252_v43, %v5516_v50  ;;  %3343 = vst [vmem:[%s5742_s28 + $0x380] sm:$0xff] %v2874_v54  ;;  %3347 = vst [vmem:[%s5742_s28 + $0x3c0] sm:$0xff] %v2890_v31  ;;  %v2194_v60 = vrot.slane %v2172_v56, %v5722_v7  ;;  %v1460_v26 = vpop.f32.mrb[45].mxu1 }
 0x43e   : > { %v2201_v47 = vrot.slane %v2173_v45, %v5722_v7  ;;  %v2886_v40 = vrot.slane %v2253_v61, %v5516_v50  ;;  %v2902_v51 = vrot.slane %v2254_v2, %v5516_v50  ;;  %3344 = vst [vmem:[%s5742_s28 + $0x390] sm:$0xff] %v2878_v57  ;;  %3345 = vst [vmem:[%s5742_s28 + $0x3a0] sm:$0xff] %v2882_v52 }
 0x43f   : > { %v2202_v62 = vcombine.high %v2180_v49, %v2180_v49  ;;  %v2203_v3 = vcombine.high %v2187_v20, %v2187_v20  ;;  %3348 = vst [vmem:[%s5742_s28 + $0x3d0] sm:$0xff] %v2894_v63  ;;  %3349 = vst [vmem:[%s5742_s28 + $0x3e0] sm:$0xff] %v2898_v53  ;;  %v2204_v58 = vcombine.high %v2194_v60, %v2194_v60 }
 0x440   : > { %v2205_v4 = vcombine.high %v2201_v47, %v2201_v47  ;;  %v2842_v5 = vrot.slane %v2180_v49, %v5516_v50  ;;  %v2846_v42 = vrot.slane %v2194_v60, %v5516_v50  ;;  %3346 = vst [vmem:[%s5742_s28 + $0x3b0] sm:$0xff] %v2886_v40  ;;  %3350 = vst [vmem:[%s5742_s28 + $0x3f0] sm:$0xff] %v2902_v51 }
 0x441   : > { %v2850_v18 = vrot.slane %v2202_v62, %v5516_v50  ;;  %v2858_v11 = vrot.slane %v2187_v20, %v5516_v50  ;;  %v2862_v8 = vrot.slane %v2201_v47, %v5516_v50  ;;  %v2866_v12 = vrot.slane %v2203_v3, %v5516_v50 }
 0x442   : > { %v2854_v13 = vrot.slane %v2204_v58, %v5516_v50  ;;  %v2870_v16 = vrot.slane %v2205_v4, %v5516_v50  ;;  %3335 = vst [vmem:[%s5742_s28 + $0x300] sm:$0xff] %v2842_v5  ;;  %3336 = vst [vmem:[%s5742_s28 + $0x310] sm:$0xff] %v2846_v42  ;;  %v2304_v14 = vcombine.high %v1446_v59, %v1446_v59 }
 0x443   : > { %v2311_v32 = vrot.slane %v1446_v59, %v5722_v7  ;;  %3337 = vst [vmem:[%s5742_s28 + $0x320] sm:$0xff] %v2850_v18  ;;  %3339 = vst [vmem:[%s5742_s28 + $0x340] sm:$0xff] %v2858_v11  ;;  %v1441_v48 = vadd.f32 %v5719_v10, %v5841_v1  ;;  %v1456_v15 = vadd.f32 %v5878_v41, %v5719_v10 }
 0x444   : > { %3340 = vst [vmem:[%s5742_s28 + $0x350] sm:$0xff] %v2862_v8  ;;  %3341 = vst [vmem:[%s5742_s28 + $0x360] sm:$0xff] %v2866_v12  ;;  %v5930_v24 = vadd.f32 %v5719_v10, %v1450_v44  ;;  %v5933_v17 = vadd.f32 %v4046_v9, %v5719_v10  ;;  %v2318_v34 = vrot.slane %v2304_v14, %v5722_v7  ;;  %v5951_v56 = vpop.f32.mrb[46].mxu1 }
 0x445   : > { %3338 = vst [vmem:[%s5742_s28 + $0x330] sm:$0xff] %v2854_v13  ;;  %3342 = vst [vmem:[%s5742_s28 + $0x370] sm:$0xff] %v2870_v16  ;;  %v2319_v19 = vcombine.high %v2311_v32, %v2311_v32  ;;  %v2327_v30 = vrot.slane %v2311_v32, %v5722_v7  ;;  %v5940_v21 = vadd.f32 %v5719_v10, %v1460_v26  ;;  %v5957_v29 = vpop.f32.mrb[47].mxu1 }
 0x446   : > { %v2255_v1 = vcombine.high %v1441_v48, %v1441_v48  ;;  %v2262_v36 = vrot.slane %v1441_v48, %v5722_v7  ;;  %v2402_v22 = vcombine.high %v1456_v15, %v1456_v15  ;;  %v2409_v33 = vrot.slane %v1456_v15, %v5722_v7 }
 0x447   : > { %v2320_v23 = vcombine.high %v2318_v34, %v2318_v34  ;;  %v2334_v38 = vrot.slane %v2318_v34, %v5722_v7  ;;  %v2341_v25 = vrot.slane %v2319_v19, %v5722_v7  ;;  %v2349_v35 = vcombine.high %v2327_v30, %v2327_v30 }
 0x448   : > { %v2938_v27 = vrot.slane %v2327_v30, %v5516_v50  ;;  %v2269_v41 = vrot.slane %v2255_v1, %v5722_v7  ;;  %v2270_v28 = vcombine.high %v2262_v36, %v2262_v36  ;;  %v2278_v37 = vrot.slane %v2262_v36, %v5722_v7  ;;  %v5974_v47 = vpop.f32.mrb[48].mxu1 }
 0x449   : > { %v2348_v55 = vrot.slane %v2320_v23, %v5722_v7  ;;  %v2350_v0 = vcombine.high %v2334_v38, %v2334_v38  ;;  %v2351_v44 = vcombine.high %v2341_v25, %v2341_v25  ;;  %v2942_v39 = vrot.slane %v2341_v25, %v5516_v50  ;;  %v5978_v58 = vpop.f32.mrb[49].mxu1 }
 0x44a   : > { %v2946_v49 = vrot.slane %v2349_v35, %v5516_v50  ;;  %v2954_v59 = vrot.slane %v2334_v38, %v5516_v50  ;;  %3359 = vst [vmem:[%s5742_s28 + $0x480] sm:$0xff] %v2938_v27  ;;  %v2271_v46 = vcombine.high %v2269_v41, %v2269_v41  ;;  %v2285_v6 = vrot.slane %v2269_v41, %v5722_v7 }
 0x44b   : > { %v2352_v43 = vcombine.high %v2348_v55, %v2348_v55  ;;  %v2950_v54 = vrot.slane %v2351_v44, %v5516_v50  ;;  %v2958_v31 = vrot.slane %v2348_v55, %v5516_v50  ;;  %v2962_v45 = vrot.slane %v2350_v0, %v5516_v50  ;;  %3360 = vst [vmem:[%s5742_s28 + $0x490] sm:$0xff] %v2942_v39 }
 0x44c   : > { %3361 = vst [vmem:[%s5742_s28 + $0x4a0] sm:$0xff] %v2946_v49  ;;  %3363 = vst [vmem:[%s5742_s28 + $0x4c0] sm:$0xff] %v2954_v59  ;;  %v2292_v20 = vrot.slane %v2270_v28, %v5722_v7  ;;  %v2299_v61 = vrot.slane %v2271_v46, %v5722_v7  ;;  %v2300_v2 = vcombine.high %v2278_v37, %v2278_v37  ;;  %v5999_v32 = vpop.f32.mrb[50].mxu1 }
 0x44d   : > { %v2301_v57 = vcombine.high %v2285_v6, %v2285_v6  ;;  %v2966_v52 = vrot.slane %v2352_v43, %v5516_v50  ;;  %3362 = vst [vmem:[%s5742_s28 + $0x4b0] sm:$0xff] %v2950_v54  ;;  %3364 = vst [vmem:[%s5742_s28 + $0x4d0] sm:$0xff] %v2958_v31  ;;  %v2906_v63 = vrot.slane %v2278_v37, %v5516_v50  ;;  %v6005_v30 = vpop.f32.mrb[51].mxu1 }
 0x44e   : > { %3365 = vst [vmem:[%s5742_s28 + $0x4e0] sm:$0xff] %v2962_v45  ;;  %v2922_v53 = vrot.slane %v2285_v6, %v5516_v50  ;;  %v2416_v60 = vrot.slane %v2402_v22, %v5722_v7  ;;  %v2302_v40 = vcombine.high %v2292_v20, %v2292_v20  ;;  %v2303_v51 = vcombine.high %v2299_v61, %v2299_v61 }
 0x44f   : > { %v2910_v62 = vrot.slane %v2292_v20, %v5516_v50  ;;  %v2914_v3 = vrot.slane %v2300_v2, %v5516_v50  ;;  %3366 = vst [vmem:[%s5742_s28 + $0x4f0] sm:$0xff] %v2966_v52  ;;  %v2926_v4 = vrot.slane %v2299_v61, %v5516_v50  ;;  %v2930_v5 = vrot.slane %v2301_v57, %v5516_v50 }
 0x450   : > { %3351 = vst [vmem:[%s5742_s28 + $0x400] sm:$0xff] %v2906_v63  ;;  %3355 = vst [vmem:[%s5742_s28 + $0x440] sm:$0xff] %v2922_v53  ;;  %v2417_v42 = vcombine.high %v2409_v33, %v2409_v33  ;;  %v2418_v9 = vcombine.high %v2416_v60, %v2416_v60  ;;  %v2918_v18 = vrot.slane %v2302_v40, %v5516_v50  ;;  %v6021_v37 = vpop.f32.mrb[52].mxu1 }
 0x451   : > { %v2934_v11 = vrot.slane %v2303_v51, %v5516_v50  ;;  %3352 = vst [vmem:[%s5742_s28 + $0x410] sm:$0xff] %v2910_v62  ;;  %3353 = vst [vmem:[%s5742_s28 + $0x420] sm:$0xff] %v2914_v3  ;;  %v2425_v8 = vrot.slane %v2409_v33, %v5722_v7  ;;  %v2432_v12 = vrot.slane %v2416_v60, %v5722_v7  ;;  %v6029_v49 = vpop.f32.mrb[53].mxu1 }
 0x452   : > { %3356 = vst [vmem:[%s5742_s28 + $0x450] sm:$0xff] %v2926_v4  ;;  %3357 = vst [vmem:[%s5742_s28 + $0x460] sm:$0xff] %v2930_v5  ;;  %v2439_v26 = vrot.slane %v2417_v42, %v5722_v7  ;;  %v2446_v13 = vrot.slane %v2418_v9, %v5722_v7  ;;  %v2353_v16 = vcombine.high %v5930_v24, %v5930_v24 }
 0x453   : > { %v2360_v14 = vrot.slane %v5930_v24, %v5722_v7  ;;  %3354 = vst [vmem:[%s5742_s28 + $0x430] sm:$0xff] %v2918_v18  ;;  %3358 = vst [vmem:[%s5742_s28 + $0x470] sm:$0xff] %v2934_v11  ;;  %v2447_v48 = vcombine.high %v2425_v8, %v2425_v8  ;;  %v2448_v15 = vcombine.high %v2432_v12, %v2432_v12 }
 0x454   : > { %v3002_v34 = vrot.slane %v2425_v8, %v5516_v50  ;;  %v3018_v19 = vrot.slane %v2432_v12, %v5516_v50  ;;  %v2449_v1 = vcombine.high %v2439_v26, %v2439_v26  ;;  %v2450_v36 = vcombine.high %v2446_v13, %v2446_v13  ;;  %v6042_v52 = vpop.f32.mrb[54].mxu1 }
 0x455   : > { %v3006_v24 = vrot.slane %v2439_v26, %v5516_v50  ;;  %v3022_v22 = vrot.slane %v2446_v13, %v5516_v50  ;;  %v3010_v33 = vrot.slane %v2447_v48, %v5516_v50  ;;  %v3026_v23 = vrot.slane %v2448_v15, %v5516_v50  ;;  %v6048_v51 = vpop.f32.mrb[55].mxu1 }
 0x456   : > { %3375 = vst [vmem:[%s5742_s28 + $0x580] sm:$0xff] %v3002_v34  ;;  %3379 = vst [vmem:[%s5742_s28 + $0x5c0] sm:$0xff] %v3018_v19  ;;  %v2367_v38 = vrot.slane %v2353_v16, %v5722_v7  ;;  %v2368_v25 = vcombine.high %v2360_v14, %v2360_v14  ;;  %v3014_v35 = vrot.slane %v2449_v1, %v5516_v50 }
 0x457   : > { %v3030_v27 = vrot.slane %v2450_v36, %v5516_v50  ;;  %3376 = vst [vmem:[%s5742_s28 + $0x590] sm:$0xff] %v3006_v24  ;;  %3380 = vst [vmem:[%s5742_s28 + $0x5d0] sm:$0xff] %v3022_v22  ;;  %v2376_v41 = vrot.slane %v2360_v14, %v5722_v7  ;;  %v2500_v28 = vcombine.high %v5933_v17, %v5933_v17 }
 0x458   : > { %3377 = vst [vmem:[%s5742_s28 + $0x5a0] sm:$0xff] %v3010_v33  ;;  %3381 = vst [vmem:[%s5742_s28 + $0x5e0] sm:$0xff] %v3026_v23  ;;  %v2369_v55 = vcombine.high %v2367_v38, %v2367_v38  ;;  %v2383_v0 = vrot.slane %v2367_v38, %v5722_v7  ;;  %v2390_v44 = vrot.slane %v2368_v25, %v5722_v7  ;;  %v6065_v16 = vpop.f32.mrb[56].mxu1 }
 0x459   : > { %v2507_v39 = vrot.slane %v5933_v17, %v5722_v7  ;;  %3378 = vst [vmem:[%s5742_s28 + $0x5b0] sm:$0xff] %v3014_v35  ;;  %3382 = vst [vmem:[%s5742_s28 + $0x5f0] sm:$0xff] %v3030_v27  ;;  %v2398_v59 = vcombine.high %v2376_v41, %v2376_v41  ;;  %v2970_v46 = vrot.slane %v2376_v41, %v5516_v50  ;;  %v6072_v15 = vpop.f32.mrb[57].mxu1 }
 0x45a   : > { %v2514_v6 = vrot.slane %v2500_v28, %v5722_v7  ;;  %v2451_v43 = vcombine.high %v5940_v21, %v5940_v21  ;;  %v2397_v54 = vrot.slane %v2369_v55, %v5722_v7  ;;  %v2399_v31 = vcombine.high %v2383_v0, %v2383_v0 }
 0x45b   : > { %v2400_v45 = vcombine.high %v2390_v44, %v2390_v44  ;;  %v2974_v17 = vrot.slane %v2390_v44, %v5516_v50  ;;  %v2978_v20 = vrot.slane %v2398_v59, %v5516_v50  ;;  %v2986_v61 = vrot.slane %v2383_v0, %v5516_v50  ;;  %3367 = vst [vmem:[%s5742_s28 + $0x500] sm:$0xff] %v2970_v46 }
 0x45c   : > { %v2515_v2 = vcombine.high %v2507_v39, %v2507_v39  ;;  %v2516_v57 = vcombine.high %v2514_v6, %v2514_v6  ;;  %v2401_v63 = vcombine.high %v2397_v54, %v2397_v54  ;;  %v2990_v60 = vrot.slane %v2397_v54, %v5516_v50  ;;  %v6093_v41 = vpop.f32.mrb[58].mxu1 }
 0x45d   : > { %v2982_v53 = vrot.slane %v2400_v45, %v5516_v50  ;;  %v2994_v40 = vrot.slane %v2399_v31, %v5516_v50  ;;  %3368 = vst [vmem:[%s5742_s28 + $0x510] sm:$0xff] %v2974_v17  ;;  %3369 = vst [vmem:[%s5742_s28 + $0x520] sm:$0xff] %v2978_v20  ;;  %v2523_v62 = vrot.slane %v2507_v39, %v5722_v7  ;;  %v6097_v39 = vpop.f32.mrb[59].mxu1 }
 0x45e   : > { %3371 = vst [vmem:[%s5742_s28 + $0x540] sm:$0xff] %v2986_v61  ;;  %v2530_v3 = vrot.slane %v2514_v6, %v5722_v7  ;;  %v2537_v4 = vrot.slane %v2515_v2, %v5722_v7  ;;  %v2544_v5 = vrot.slane %v2516_v57, %v5722_v7  ;;  %v2998_v42 = vrot.slane %v2401_v63, %v5516_v50 }
 0x45f   : > { %3370 = vst [vmem:[%s5742_s28 + $0x530] sm:$0xff] %v2982_v53  ;;  %3372 = vst [vmem:[%s5742_s28 + $0x550] sm:$0xff] %v2990_v60  ;;  %v2458_v9 = vrot.slane %v5940_v21, %v5722_v7  ;;  %v2465_v18 = vrot.slane %v2451_v43, %v5722_v7  ;;  %v1476_v11 = vadd.f32 %v5951_v56, %v5719_v10 }
 0x460   : > { %3373 = vst [vmem:[%s5742_s28 + $0x560] sm:$0xff] %v2994_v40  ;;  %v2545_v8 = vcombine.high %v2523_v62, %v2523_v62  ;;  %v2546_v12 = vcombine.high %v2530_v3, %v2530_v3  ;;  %v2547_v26 = vcombine.high %v2537_v4, %v2537_v4  ;;  %v2548_v13 = vcombine.high %v2544_v5, %v2544_v5  ;;  %v6109_v20 = vpop.f32.mrb[60].mxu1 }
 0x461   : > { %3374 = vst [vmem:[%s5742_s28 + $0x570] sm:$0xff] %v2998_v42  ;;  %v3066_v14 = vrot.slane %v2523_v62, %v5516_v50  ;;  %v3070_v21 = vrot.slane %v2537_v4, %v5516_v50  ;;  %v3082_v48 = vrot.slane %v2530_v3, %v5516_v50  ;;  %v3086_v56 = vrot.slane %v2544_v5, %v5516_v50  ;;  %v6117_v53 = vpop.f32.mrb[61].mxu1  ;;  %v6123_v4 = vld [vmem:[#allocation16] ss:$0 sm:$0xff] }
 0x462   : > { %v3074_v34 = vrot.slane %v2545_v8, %v5516_v50  ;;  %v3078_v19 = vrot.slane %v2547_v26, %v5516_v50  ;;  %v3090_v1 = vrot.slane %v2546_v12, %v5516_v50  ;;  %v3094_v36 = vrot.slane %v2548_v13, %v5516_v50 }
 0x463   : > { %3391 = vst [vmem:[%s5742_s28 + $0x680] sm:$0xff] %v3066_v14  ;;  %3392 = vst [vmem:[%s5742_s28 + $0x690] sm:$0xff] %v3070_v21  ;;  %v2466_v24 = vcombine.high %v2458_v9, %v2458_v9  ;;  %v2467_v22 = vcombine.high %v2465_v18, %v2465_v18  ;;  %v2474_v33 = vrot.slane %v2458_v9, %v5722_v7 }
 0x464   : > { %3395 = vst [vmem:[%s5742_s28 + $0x6c0] sm:$0xff] %v3082_v48  ;;  %3396 = vst [vmem:[%s5742_s28 + $0x6d0] sm:$0xff] %v3086_v56  ;;  %v2481_v23 = vrot.slane %v2465_v18, %v5722_v7  ;;  %v2598_v38 = vcombine.high %v1476_v11, %v1476_v11  ;;  %v2605_v25 = vrot.slane %v1476_v11, %v5722_v7  ;;  %v3935_v13 = vpop.f32.mrb[62].mxu1 }
 0x465   : > { %3393 = vst [vmem:[%s5742_s28 + $0x6a0] sm:$0xff] %v3074_v34  ;;  %3394 = vst [vmem:[%s5742_s28 + $0x6b0] sm:$0xff] %v3078_v19  ;;  %v1471_v35 = vadd.f32 %v5719_v10, %v5957_v29  ;;  %v3916_v27 = vadd.f32 %v5978_v58, %v5974_v47  ;;  %v2488_v28 = vrot.slane %v2466_v24, %v5722_v7  ;;  %v3936_v34 = vpop.f32.mrb[63].mxu1 }
 0x466   : > { %3397 = vst [vmem:[%s5742_s28 + $0x6e0] sm:$0xff] %v3090_v1  ;;  %3398 = vst [vmem:[%s5742_s28 + $0x6f0] sm:$0xff] %v3094_v36  ;;  %v2495_v55 = vrot.slane %v2467_v22, %v5722_v7  ;;  %v2496_v0 = vcombine.high %v2474_v33, %v2474_v33  ;;  %v2497_v44 = vcombine.high %v2481_v23, %v2481_v23 }
 0x467   : > { %v3034_v59 = vrot.slane %v2474_v33, %v5516_v50  ;;  %v3050_v46 = vrot.slane %v2481_v23, %v5516_v50  ;;  %v2612_v10 = vrot.slane %v2598_v38, %v5722_v7  ;;  %v2613_v29 = vcombine.high %v2605_v25, %v2605_v25 }
 0x468   : > { %v2498_v47 = vcombine.high %v2488_v28, %v2488_v28  ;;  %v2499_v58 = vcombine.high %v2495_v55, %v2495_v55  ;;  %v3038_v6 = vrot.slane %v2488_v28, %v5516_v50  ;;  %v3042_v43 = vrot.slane %v2496_v0, %v5516_v50 }
 0x469   : > { %v3054_v54 = vrot.slane %v2495_v55, %v5516_v50  ;;  %v3058_v31 = vrot.slane %v2497_v44, %v5516_v50  ;;  %3383 = vst [vmem:[%s5742_s28 + $0x600] sm:$0xff] %v3034_v59  ;;  %3387 = vst [vmem:[%s5742_s28 + $0x640] sm:$0xff] %v3050_v46  ;;  %v2614_v45 = vcombine.high %v2612_v10, %v2612_v10 }
 0x46a   : > { %v2621_v17 = vrot.slane %v2605_v25, %v5722_v7  ;;  %v3046_v61 = vrot.slane %v2498_v47, %v5516_v50  ;;  %v3062_v2 = vrot.slane %v2499_v58, %v5516_v50  ;;  %3384 = vst [vmem:[%s5742_s28 + $0x610] sm:$0xff] %v3038_v6  ;;  %3385 = vst [vmem:[%s5742_s28 + $0x620] sm:$0xff] %v3042_v43 }
 0x46b   : > { %v2628_v57 = vrot.slane %v2612_v10, %v5722_v7  ;;  %v2635_v63 = vrot.slane %v2613_v29, %v5722_v7  ;;  %3388 = vst [vmem:[%s5742_s28 + $0x650] sm:$0xff] %v3054_v54  ;;  %3389 = vst [vmem:[%s5742_s28 + $0x660] sm:$0xff] %v3058_v31  ;;  %v2642_v60 = vrot.slane %v2614_v45, %v5722_v7 }
 0x46c   : > { %v2643_v40 = vcombine.high %v2621_v17, %v2621_v17  ;;  %v3130_v62 = vrot.slane %v2621_v17, %v5516_v50  ;;  %v2549_v3 = vcombine.high %v1471_v35, %v1471_v35  ;;  %3386 = vst [vmem:[%s5742_s28 + $0x630] sm:$0xff] %v3046_v61  ;;  %3390 = vst [vmem:[%s5742_s28 + $0x670] sm:$0xff] %v3062_v2 }
 0x46d   : > { %v2644_v5 = vcombine.high %v2628_v57, %v2628_v57  ;;  %v2645_v42 = vcombine.high %v2635_v63, %v2635_v63  ;;  %v3134_v9 = vrot.slane %v2635_v63, %v5516_v50  ;;  %v3146_v18 = vrot.slane %v2628_v57, %v5516_v50 }
 0x46e   : > { %v2646_v11 = vcombine.high %v2642_v60, %v2642_v60  ;;  %v3138_v8 = vrot.slane %v2643_v40, %v5516_v50  ;;  %v3150_v12 = vrot.slane %v2642_v60, %v5516_v50  ;;  %3407 = vst [vmem:[%s5742_s28 + $0x780] sm:$0xff] %v3130_v62  ;;  %v2556_v26 = vrot.slane %v1471_v35, %v5722_v7 }
 0x46f   : > { %v3142_v14 = vrot.slane %v2645_v42, %v5516_v50  ;;  %v3154_v21 = vrot.slane %v2644_v5, %v5516_v50  ;;  %3408 = vst [vmem:[%s5742_s28 + $0x790] sm:$0xff] %v3134_v9  ;;  %3411 = vst [vmem:[%s5742_s28 + $0x7c0] sm:$0xff] %v3146_v18  ;;  %v2563_v48 = vrot.slane %v2549_v3, %v5722_v7 }
 0x470   : > { %v1585_v56 = vadd.f32 %v3916_v27, %v6123_v4  ;;  %v3158_v19 = vrot.slane %v2646_v11, %v5516_v50  ;;  %3409 = vst [vmem:[%s5742_s28 + $0x7a0] sm:$0xff] %v3138_v8  ;;  %3412 = vst [vmem:[%s5742_s28 + $0x7d0] sm:$0xff] %v3150_v12  ;;  %v2564_v1 = vcombine.high %v2556_v26, %v2556_v26 }
 0x471   : > { %v2572_v36 = vrot.slane %v2556_v26, %v5722_v7  ;;  %v3919_v24 = vadd.f32 %v6005_v30, %v5999_v32  ;;  %3410 = vst [vmem:[%s5742_s28 + $0x7b0] sm:$0xff] %v3142_v14  ;;  %3413 = vst [vmem:[%s5742_s28 + $0x7e0] sm:$0xff] %v3154_v21  ;;  %v2565_v22 = vcombine.high %v2563_v48, %v2563_v48  ;;  %v3938_v32 = vpop.f32.mrb[64].mxu1 }
 0x472   : > { %v2579_v33 = vrot.slane %v2563_v48, %v5722_v7  ;;  %v1663_v23 = vmax.f32 %v1585_v56, 0.0  ;;  %v3922_v38 = vadd.f32 %v6029_v49, %v6021_v37  ;;  %3414 = vst [vmem:[%s5742_s28 + $0x7f0] sm:$0xff] %v3158_v19  ;;  %v2586_v25 = vrot.slane %v2564_v1, %v5722_v7  ;;  %v3939_v49 = vpop.f32.mrb[65].mxu1 }
 0x473   : > { %v2594_v35 = vcombine.high %v2572_v36, %v2572_v36  ;;  %v3098_v27 = vrot.slane %v2572_v36, %v5516_v50  ;;  %v1590_v28 = vadd.f32 %v3919_v24, %v6123_v4  ;;  %v2593_v30 = vrot.slane %v2565_v22, %v5722_v7  ;;  %v3941_v45 = vpop.f32.mrb[66].mxu1 }
 0x474   : > { %v2595_v55 = vcombine.high %v2579_v33, %v2579_v33  ;;  %v3114_v0 = vrot.slane %v2579_v33, %v5516_v50  ;;  %4082 = vmatprep.mubr.f32.mxu0 %v1663_v23  ;;  %v1595_v37 = vadd.f32 %v3922_v38, %v6123_v4  ;;  %v2596_v44 = vcombine.high %v2586_v25, %v2586_v25  ;;  %v3942_v63 = vpop.f32.mrb[67].mxu1 }
 0x475   : > { %v3102_v59 = vrot.slane %v2586_v25, %v5516_v50  ;;  %v3106_v46 = vrot.slane %v2594_v35, %v5516_v50  ;;  %3399 = vst [vmem:[%s5742_s28 + $0x700] sm:$0xff] %v3098_v27  ;;  %v1664_v10 = vmax.f32 %v1590_v28, 0.0  ;;  %v2597_v29 = vcombine.high %v2593_v30, %v2593_v30  ;;  %v3944_v60 = vpop.f32.mrb[68].mxu1 }
 0x476   : > { %v3118_v7 = vrot.slane %v2593_v30, %v5516_v50  ;;  %v3122_v47 = vrot.slane %v2595_v55, %v5516_v50  ;;  %3403 = vst [vmem:[%s5742_s28 + $0x740] sm:$0xff] %v3114_v0  ;;  %v1665_v58 = vmax.f32 %v1595_v37, 0.0  ;;  %v3110_v6 = vrot.slane %v2596_v44, %v5516_v50  ;;  %v3945_v40 = vpop.f32.mrb[69].mxu1  ;;  %v6192_v44 = vld [vmem:[#allocation19] ss:$0 sm:$0xff] }
 0x477   : > { %3400 = vst [vmem:[%s5742_s28 + $0x710] sm:$0xff] %v3102_v59  ;;  %3401 = vst [vmem:[%s5742_s28 + $0x720] sm:$0xff] %v3106_v46  ;;  %4083 = vmatmul.mubr.f32.vlgmr.msra.gmra.mrb[64].mxu0 %v1664_v10  ;;  %v3925_v43 = vadd.f32 %v6048_v51, %v6042_v52  ;;  %v3928_v54 = vadd.f32 %v6072_v15, %v6065_v16  ;;  %v3931_v31 = vadd.f32 %v6097_v39, %v6093_v41  ;;  %v3947_v42 = vpop.f32.mrb[70].mxu1 }
 0x478   : > { %v3126_v17 = vrot.slane %v2597_v29, %v5516_v50  ;;  %3404 = vst [vmem:[%s5742_s28 + $0x750] sm:$0xff] %v3118_v7  ;;  %3405 = vst [vmem:[%s5742_s28 + $0x760] sm:$0xff] %v3122_v47  ;;  %4085 = vmatprep.mubr.f32.mxu0 %v1665_v58  ;;  %v3934_v61 = vadd.f32 %v6117_v53, %v6109_v20  ;;  %v3937_v2 = vadd.f32 %v3936_v34, %v3935_v13  ;;  %v3948_v9 = vpop.f32.mrb[71].mxu1 }
 0x479   : > { %v3940_v57 = vadd.f32 %v3939_v49, %v3938_v32  ;;  %3402 = vst [vmem:[%s5742_s28 + $0x730] sm:$0xff] %v3110_v6  ;;  %v1600_v52 = vadd.f32 %v3925_v43, %v6123_v4  ;;  %v1605_v51 = vadd.f32 %v3928_v54, %v6123_v4  ;;  %v1610_v16 = vadd.f32 %v3931_v31, %v6123_v4  ;;  %v3950_v13 = vpop.f32.mrb[72].mxu1 }
 0x47a   : > { %v3943_v15 = vadd.f32 %v3942_v63, %v3941_v45  ;;  %3406 = vst [vmem:[%s5742_s28 + $0x770] sm:$0xff] %v3126_v17  ;;  %v1615_v50 = vadd.f32 %v3934_v61, %v6123_v4  ;;  %v1620_v53 = vadd.f32 %v3937_v2, %v6123_v4  ;;  %v3946_v62 = vadd.f32 %v3945_v40, %v3944_v60  ;;  %v3951_v14 = vpop.f32.mrb[73].mxu1 }
 0x47b   : > { %v1666_v41 = vmax.f32 %v1600_v52, 0.0  ;;  %v1667_v39 = vmax.f32 %v1605_v51, 0.0  ;;  %v1668_v20 = vmax.f32 %v1610_v16, 0.0  ;;  %v1625_v5 = vadd.f32 %v3940_v57, %v6123_v4 }
 0x47c   : > { %v1669_v3 = vmax.f32 %v1615_v50, 0.0  ;;  %v1670_v18 = vmax.f32 %v1620_v53, 0.0  ;;  %v1630_v11 = vadd.f32 %v3943_v15, %v6123_v4  ;;  %v3949_v8 = vadd.f32 %v3948_v9, %v3947_v42  ;;  %v3953_v1 = vpop.f32.mrb[74].mxu1 }
 0x47d   : > { %4086 = vmatmul.mubr.f32.gmra.mrb[66].mxu0 %v1666_v41  ;;  %v1671_v12 = vmax.f32 %v1625_v5, 0.0  ;;  %v1635_v26 = vadd.f32 %v3946_v62, %v6123_v4  ;;  %v3952_v56 = vadd.f32 %v3951_v14, %v3950_v13  ;;  %v3954_v36 = vpop.f32.mrb[75].mxu1 }
 0x47e   : > { %4088 = vmatprep.mubr.f32.mxu0 %v1667_v39  ;;  %v1672_v21 = vmax.f32 %v1630_v11, 0.0  ;;  %v1640_v48 = vadd.f32 %v3949_v8, %v6123_v4  ;;  %v3955_v22 = vadd.f32 %v3954_v36, %v3953_v1 }
 0x47f   : > { %v1673_v34 = vmax.f32 %v1635_v26, 0.0  ;;  %v1645_v19 = vadd.f32 %v3952_v56, %v6123_v4 }
 0x480   : > { %v1674_v24 = vmax.f32 %v1640_v48, 0.0  ;;  %v1650_v23 = vadd.f32 %v3955_v22, %v6123_v4  ;;  %v3956_v38 = vpop.f32.mrb[76].mxu1 }
 0x481   : > { %4089 = vmatmul.mubr.f32.gmra.mrb[68].mxu0 %v1668_v20  ;;  %v1675_v33 = vmax.f32 %v1645_v19, 0.0  ;;  %v3957_v25 = vpop.f32.mrb[77].mxu1 }
 0x482   : > { %4091 = vmatprep.mubr.f32.mxu0 %v1669_v3  ;;  %v1676_v35 = vmax.f32 %v1650_v23, 0.0  ;;  %v3958_v27 = vadd.f32 %v3957_v25, %v3956_v38 }
 0x484   : > { %v1655_v28 = vadd.f32 %v3958_v27, %v6123_v4  ;;  %v3959_v32 = vpop.f32.mrb[78].mxu1 }
 0x485   : > { %4092 = vmatmul.mubr.f32.gmra.mrb[70].mxu0 %v1670_v18  ;;  %v3960_v30 = vpop.f32.mrb[79].mxu1 }
 0x486   : > { %4094 = vmatprep.mubr.f32.mxu0 %v1671_v12  ;;  %v1677_v55 = vmax.f32 %v1655_v28, 0.0  ;;  %v3961_v0 = vadd.f32 %v3960_v30, %v3959_v32 }
 0x488   : > { %v1660_v37 = vadd.f32 %v3961_v0, %v6123_v4 }
 0x489   : > { %4095 = vmatmul.mubr.f32.gmra.mrb[72].mxu0 %v1672_v21 }
 0x48a   : > { %4097 = vmatprep.mubr.f32.mxu0 %v1673_v34  ;;  %v1678_v49 = vmax.f32 %v1660_v37, 0.0 }
 0x48d   : > { %4098 = vmatmul.mubr.f32.gmra.mrb[74].mxu0 %v1674_v24 }
 0x48e   : > { %4100 = vmatprep.mubr.f32.mxu0 %v1675_v33 }
 0x491   : > { %4101 = vmatmul.mubr.f32.gmra.mrb[76].mxu0 %v1676_v35 }
 0x492   : > { %4103 = vmatprep.mubr.f32.mxu0 %v1677_v55 }
 0x495   : > { %4104 = vmatmul.mubr.f32.gmra.mrb[78].mxu0 %v1678_v49 }
 0x54a   : > { %v4084_v59 = vpop.f32.mrb[64].mxu0 }
 0x54b   : > { %v1774_v46 = vadd.f32 %v4084_v59, %v6192_v44  ;;  %v1768_v10 = vpop.f32.mrb[65].mxu0 }
 0x54c   : > { %v1769_v29 = vadd.f32 %v6192_v44, %v1768_v10 }
 0x54d   : > { %3423 = vst [vmem:[%s5742_s28 + $0x88] sm:$0xff] %v1774_v46  ;;  %3424 = vst [vmem:[%s5742_s28 + $0x98] sm:$0xff] %v1774_v46 }
 0x54e   : > { %3425 = vst [vmem:[%s5742_s28 + $0xa8] sm:$0xff] %v1774_v46  ;;  %3426 = vst [vmem:[%s5742_s28 + $0xb8] sm:$0xff] %v1774_v46 }
 0x54f   : > { %3427 = vst [vmem:[%s5742_s28 + $0xc8] sm:$0xff] %v1774_v46  ;;  %3428 = vst [vmem:[%s5742_s28 + $0xd8] sm:$0xff] %v1774_v46 }
 0x550   : > { %3429 = vst [vmem:[%s5742_s28 + $0xe8] sm:$0xff] %v1774_v46  ;;  %3430 = vst [vmem:[%s5742_s28 + $0xf8] sm:$0xff] %v1774_v46  ;;  %v4087_v4 = vpop.f32.mrb[66].mxu0 }
 0x551   : > { %3415 = vst [vmem:[%s5742_s28 + $0x8] sm:$0xff] %v1769_v29  ;;  %3416 = vst [vmem:[%s5742_s28 + $0x18] sm:$0xff] %v1769_v29  ;;  %v1784_v7 = vadd.f32 %v4087_v4, %v6192_v44  ;;  %v1778_v47 = vpop.f32.mrb[67].mxu0 }
 0x552   : > { %3417 = vst [vmem:[%s5742_s28 + $0x28] sm:$0xff] %v1769_v29  ;;  %3418 = vst [vmem:[%s5742_s28 + $0x38] sm:$0xff] %v1769_v29  ;;  %v1779_v58 = vadd.f32 %v6192_v44, %v1778_v47 }
 0x553   : > { %3419 = vst [vmem:[%s5742_s28 + $0x48] sm:$0xff] %v1769_v29  ;;  %3420 = vst [vmem:[%s5742_s28 + $0x58] sm:$0xff] %v1769_v29 }
 0x554   : > { %3421 = vst [vmem:[%s5742_s28 + $0x68] sm:$0xff] %v1769_v29  ;;  %3422 = vst [vmem:[%s5742_s28 + $0x78] sm:$0xff] %v1769_v29  ;;  %v4090_v6 = vpop.f32.mrb[68].mxu0 }
 0x555   : > { %3439 = vst [vmem:[%s5742_s28 + $0x188] sm:$0xff] %v1784_v7  ;;  %3440 = vst [vmem:[%s5742_s28 + $0x198] sm:$0xff] %v1784_v7  ;;  %v1794_v43 = vadd.f32 %v4090_v6, %v6192_v44  ;;  %v1788_v54 = vpop.f32.mrb[69].mxu0 }
 0x556   : > { %3441 = vst [vmem:[%s5742_s28 + $0x1a8] sm:$0xff] %v1784_v7  ;;  %3442 = vst [vmem:[%s5742_s28 + $0x1b8] sm:$0xff] %v1784_v7  ;;  %v1789_v31 = vadd.f32 %v6192_v44, %v1788_v54 }
 0x557   : > { %3443 = vst [vmem:[%s5742_s28 + $0x1c8] sm:$0xff] %v1784_v7  ;;  %3444 = vst [vmem:[%s5742_s28 + $0x1d8] sm:$0xff] %v1784_v7 }
 0x558   : > { %3445 = vst [vmem:[%s5742_s28 + $0x1e8] sm:$0xff] %v1784_v7  ;;  %3446 = vst [vmem:[%s5742_s28 + $0x1f8] sm:$0xff] %v1784_v7  ;;  %v4093_v45 = vpop.f32.mrb[70].mxu0 }
 0x559   : > { %3431 = vst [vmem:[%s5742_s28 + $0x108] sm:$0xff] %v1779_v58  ;;  %3432 = vst [vmem:[%s5742_s28 + $0x118] sm:$0xff] %v1779_v58  ;;  %v1804_v17 = vadd.f32 %v4093_v45, %v6192_v44  ;;  %v1798_v61 = vpop.f32.mrb[71].mxu0 }
 0x55a   : > { %3433 = vst [vmem:[%s5742_s28 + $0x128] sm:$0xff] %v1779_v58  ;;  %3434 = vst [vmem:[%s5742_s28 + $0x138] sm:$0xff] %v1779_v58  ;;  %v1799_v2 = vadd.f32 %v6192_v44, %v1798_v61 }
 0x55b   : > { %3435 = vst [vmem:[%s5742_s28 + $0x148] sm:$0xff] %v1779_v58  ;;  %3436 = vst [vmem:[%s5742_s28 + $0x158] sm:$0xff] %v1779_v58 }
 0x55c   : > { %3437 = vst [vmem:[%s5742_s28 + $0x168] sm:$0xff] %v1779_v58  ;;  %3438 = vst [vmem:[%s5742_s28 + $0x178] sm:$0xff] %v1779_v58  ;;  %v4096_v57 = vpop.f32.mrb[72].mxu0 }
 0x55d   : > { %3455 = vst [vmem:[%s5742_s28 + $0x288] sm:$0xff] %v1794_v43  ;;  %3456 = vst [vmem:[%s5742_s28 + $0x298] sm:$0xff] %v1794_v43  ;;  %v1814_v63 = vadd.f32 %v4096_v57, %v6192_v44  ;;  %v1808_v52 = vpop.f32.mrb[73].mxu0 }
 0x55e   : > { %3457 = vst [vmem:[%s5742_s28 + $0x2a8] sm:$0xff] %v1794_v43  ;;  %3458 = vst [vmem:[%s5742_s28 + $0x2b8] sm:$0xff] %v1794_v43  ;;  %v1809_v51 = vadd.f32 %v6192_v44, %v1808_v52 }
 0x55f   : > { %3459 = vst [vmem:[%s5742_s28 + $0x2c8] sm:$0xff] %v1794_v43  ;;  %3460 = vst [vmem:[%s5742_s28 + $0x2d8] sm:$0xff] %v1794_v43 }
 0x560   : > { %3461 = vst [vmem:[%s5742_s28 + $0x2e8] sm:$0xff] %v1794_v43  ;;  %3462 = vst [vmem:[%s5742_s28 + $0x2f8] sm:$0xff] %v1794_v43  ;;  %v4099_v16 = vpop.f32.mrb[74].mxu0 }
 0x561   : > { %3447 = vst [vmem:[%s5742_s28 + $0x208] sm:$0xff] %v1789_v31  ;;  %3448 = vst [vmem:[%s5742_s28 + $0x218] sm:$0xff] %v1789_v31  ;;  %v1824_v15 = vadd.f32 %v4099_v16, %v6192_v44  ;;  %v1818_v50 = vpop.f32.mrb[75].mxu0 }
 0x562   : > { %3449 = vst [vmem:[%s5742_s28 + $0x228] sm:$0xff] %v1789_v31  ;;  %3450 = vst [vmem:[%s5742_s28 + $0x238] sm:$0xff] %v1789_v31  ;;  %v1819_v41 = vadd.f32 %v6192_v44, %v1818_v50 }
 0x563   : > { %3451 = vst [vmem:[%s5742_s28 + $0x248] sm:$0xff] %v1789_v31  ;;  %3452 = vst [vmem:[%s5742_s28 + $0x258] sm:$0xff] %v1789_v31 }
 0x564   : > { %3453 = vst [vmem:[%s5742_s28 + $0x268] sm:$0xff] %v1789_v31  ;;  %3454 = vst [vmem:[%s5742_s28 + $0x278] sm:$0xff] %v1789_v31  ;;  %v4102_v39 = vpop.f32.mrb[76].mxu0 }
 0x565   : > { %3471 = vst [vmem:[%s5742_s28 + $0x388] sm:$0xff] %v1804_v17  ;;  %3472 = vst [vmem:[%s5742_s28 + $0x398] sm:$0xff] %v1804_v17  ;;  %v1834_v60 = vadd.f32 %v4102_v39, %v6192_v44  ;;  %v1828_v40 = vpop.f32.mrb[77].mxu0 }
 0x566   : > { %3473 = vst [vmem:[%s5742_s28 + $0x3a8] sm:$0xff] %v1804_v17  ;;  %3474 = vst [vmem:[%s5742_s28 + $0x3b8] sm:$0xff] %v1804_v17  ;;  %v1829_v20 = vadd.f32 %v6192_v44, %v1828_v40 }
 0x567   : > { %3475 = vst [vmem:[%s5742_s28 + $0x3c8] sm:$0xff] %v1804_v17  ;;  %3476 = vst [vmem:[%s5742_s28 + $0x3d8] sm:$0xff] %v1804_v17 }
 0x568   : > { %3477 = vst [vmem:[%s5742_s28 + $0x3e8] sm:$0xff] %v1804_v17  ;;  %3478 = vst [vmem:[%s5742_s28 + $0x3f8] sm:$0xff] %v1804_v17  ;;  %v4105_v53 = vpop.f32.mrb[78].mxu0 }
 0x569   : > { %3463 = vst [vmem:[%s5742_s28 + $0x308] sm:$0xff] %v1799_v2  ;;  %3464 = vst [vmem:[%s5742_s28 + $0x318] sm:$0xff] %v1799_v2  ;;  %v1844_v62 = vadd.f32 %v4105_v53, %v6192_v44  ;;  %v1838_v3 = vpop.f32.mrb[79].mxu0 }
 0x56a   : > { %3465 = vst [vmem:[%s5742_s28 + $0x328] sm:$0xff] %v1799_v2  ;;  %3466 = vst [vmem:[%s5742_s28 + $0x338] sm:$0xff] %v1799_v2  ;;  %v1839_v5 = vadd.f32 %v6192_v44, %v1838_v3 }
 0x56b   : > { %3467 = vst [vmem:[%s5742_s28 + $0x348] sm:$0xff] %v1799_v2  ;;  %3468 = vst [vmem:[%s5742_s28 + $0x358] sm:$0xff] %v1799_v2 }
 0x56c   : > { %3469 = vst [vmem:[%s5742_s28 + $0x368] sm:$0xff] %v1799_v2  ;;  %3470 = vst [vmem:[%s5742_s28 + $0x378] sm:$0xff] %v1799_v2 }
 0x56d   : > { %3487 = vst [vmem:[%s5742_s28 + $0x488] sm:$0xff] %v1814_v63  ;;  %3488 = vst [vmem:[%s5742_s28 + $0x498] sm:$0xff] %v1814_v63 }
 0x56e   : > { %3489 = vst [vmem:[%s5742_s28 + $0x4a8] sm:$0xff] %v1814_v63  ;;  %3490 = vst [vmem:[%s5742_s28 + $0x4b8] sm:$0xff] %v1814_v63 }
 0x56f   : > { %3491 = vst [vmem:[%s5742_s28 + $0x4c8] sm:$0xff] %v1814_v63  ;;  %3492 = vst [vmem:[%s5742_s28 + $0x4d8] sm:$0xff] %v1814_v63 }
 0x570   : > { %3493 = vst [vmem:[%s5742_s28 + $0x4e8] sm:$0xff] %v1814_v63  ;;  %3494 = vst [vmem:[%s5742_s28 + $0x4f8] sm:$0xff] %v1814_v63 }
 0x571   : > { %3479 = vst [vmem:[%s5742_s28 + $0x408] sm:$0xff] %v1809_v51  ;;  %3480 = vst [vmem:[%s5742_s28 + $0x418] sm:$0xff] %v1809_v51 }
 0x572   : > { %3481 = vst [vmem:[%s5742_s28 + $0x428] sm:$0xff] %v1809_v51  ;;  %3482 = vst [vmem:[%s5742_s28 + $0x438] sm:$0xff] %v1809_v51 }
 0x573   : > { %3483 = vst [vmem:[%s5742_s28 + $0x448] sm:$0xff] %v1809_v51  ;;  %3484 = vst [vmem:[%s5742_s28 + $0x458] sm:$0xff] %v1809_v51 }
 0x574   : > { %3485 = vst [vmem:[%s5742_s28 + $0x468] sm:$0xff] %v1809_v51  ;;  %3486 = vst [vmem:[%s5742_s28 + $0x478] sm:$0xff] %v1809_v51 }
 0x575   : > { %3503 = vst [vmem:[%s5742_s28 + $0x588] sm:$0xff] %v1824_v15  ;;  %3504 = vst [vmem:[%s5742_s28 + $0x598] sm:$0xff] %v1824_v15 }
 0x576   : > { %3505 = vst [vmem:[%s5742_s28 + $0x5a8] sm:$0xff] %v1824_v15  ;;  %3506 = vst [vmem:[%s5742_s28 + $0x5b8] sm:$0xff] %v1824_v15 }
 0x577   : > { %3507 = vst [vmem:[%s5742_s28 + $0x5c8] sm:$0xff] %v1824_v15  ;;  %3508 = vst [vmem:[%s5742_s28 + $0x5d8] sm:$0xff] %v1824_v15 }
 0x578   : > { %3509 = vst [vmem:[%s5742_s28 + $0x5e8] sm:$0xff] %v1824_v15  ;;  %3510 = vst [vmem:[%s5742_s28 + $0x5f8] sm:$0xff] %v1824_v15 }
 0x579   : > { %3495 = vst [vmem:[%s5742_s28 + $0x508] sm:$0xff] %v1819_v41  ;;  %3496 = vst [vmem:[%s5742_s28 + $0x518] sm:$0xff] %v1819_v41 }
 0x57a   : > { %3497 = vst [vmem:[%s5742_s28 + $0x528] sm:$0xff] %v1819_v41  ;;  %3498 = vst [vmem:[%s5742_s28 + $0x538] sm:$0xff] %v1819_v41 }
 0x57b   : > { %3499 = vst [vmem:[%s5742_s28 + $0x548] sm:$0xff] %v1819_v41  ;;  %3500 = vst [vmem:[%s5742_s28 + $0x558] sm:$0xff] %v1819_v41 }
 0x57c   : > { %3501 = vst [vmem:[%s5742_s28 + $0x568] sm:$0xff] %v1819_v41  ;;  %3502 = vst [vmem:[%s5742_s28 + $0x578] sm:$0xff] %v1819_v41 }
 0x57d   : > { %3519 = vst [vmem:[%s5742_s28 + $0x688] sm:$0xff] %v1834_v60  ;;  %3520 = vst [vmem:[%s5742_s28 + $0x698] sm:$0xff] %v1834_v60 }
 0x57e   : > { %3521 = vst [vmem:[%s5742_s28 + $0x6a8] sm:$0xff] %v1834_v60  ;;  %3522 = vst [vmem:[%s5742_s28 + $0x6b8] sm:$0xff] %v1834_v60 }
 0x57f   : > { %3523 = vst [vmem:[%s5742_s28 + $0x6c8] sm:$0xff] %v1834_v60  ;;  %3524 = vst [vmem:[%s5742_s28 + $0x6d8] sm:$0xff] %v1834_v60 }
 0x580   : > { %3525 = vst [vmem:[%s5742_s28 + $0x6e8] sm:$0xff] %v1834_v60  ;;  %3526 = vst [vmem:[%s5742_s28 + $0x6f8] sm:$0xff] %v1834_v60 }
 0x581   : > { %3511 = vst [vmem:[%s5742_s28 + $0x608] sm:$0xff] %v1829_v20  ;;  %3512 = vst [vmem:[%s5742_s28 + $0x618] sm:$0xff] %v1829_v20 }
 0x582   : > { %3513 = vst [vmem:[%s5742_s28 + $0x628] sm:$0xff] %v1829_v20  ;;  %3514 = vst [vmem:[%s5742_s28 + $0x638] sm:$0xff] %v1829_v20 }
 0x583   : > { %3515 = vst [vmem:[%s5742_s28 + $0x648] sm:$0xff] %v1829_v20  ;;  %3516 = vst [vmem:[%s5742_s28 + $0x658] sm:$0xff] %v1829_v20 }
 0x584   : > { %3517 = vst [vmem:[%s5742_s28 + $0x668] sm:$0xff] %v1829_v20  ;;  %3518 = vst [vmem:[%s5742_s28 + $0x678] sm:$0xff] %v1829_v20 }
 0x585   : > { %3535 = vst [vmem:[%s5742_s28 + $0x788] sm:$0xff] %v1844_v62  ;;  %3536 = vst [vmem:[%s5742_s28 + $0x798] sm:$0xff] %v1844_v62 }
 0x586   : > { %3537 = vst [vmem:[%s5742_s28 + $0x7a8] sm:$0xff] %v1844_v62  ;;  %3538 = vst [vmem:[%s5742_s28 + $0x7b8] sm:$0xff] %v1844_v62 }
 0x587   : > { %3539 = vst [vmem:[%s5742_s28 + $0x7c8] sm:$0xff] %v1844_v62  ;;  %3540 = vst [vmem:[%s5742_s28 + $0x7d8] sm:$0xff] %v1844_v62 }
 0x588   : > { %3541 = vst [vmem:[%s5742_s28 + $0x7e8] sm:$0xff] %v1844_v62  ;;  %3542 = vst [vmem:[%s5742_s28 + $0x7f8] sm:$0xff] %v1844_v62 }
 0x589   : > { %3527 = vst [vmem:[%s5742_s28 + $0x708] sm:$0xff] %v1839_v5  ;;  %3528 = vst [vmem:[%s5742_s28 + $0x718] sm:$0xff] %v1839_v5 }
 0x58a   : > { %3529 = vst [vmem:[%s5742_s28 + $0x728] sm:$0xff] %v1839_v5  ;;  %3530 = vst [vmem:[%s5742_s28 + $0x738] sm:$0xff] %v1839_v5 }
 0x58b   : > { %3531 = vst [vmem:[%s5742_s28 + $0x748] sm:$0xff] %v1839_v5  ;;  %3532 = vst [vmem:[%s5742_s28 + $0x758] sm:$0xff] %v1839_v5 }
 0x58c   : > { %3533 = vst [vmem:[%s5742_s28 + $0x768] sm:$0xff] %v1839_v5  ;;  %3534 = vst [vmem:[%s5742_s28 + $0x778] sm:$0xff] %v1839_v5 }
 0x58d   : > { %4841 = shalt.err (!%p4838_p3)
}
 0x58e   : > { %s4842_s28 = scalar_lea.hbm %s6326_s0, 32768  ;;  %s4846_s21 = scalar_lea.hbm %s6434_s12, 65536 }
 0x58f   : > { %p4843_p0 = scmp.ne.s32.totalorder %s6326_s0, %s4842_s28  ;;  %p4847_p5 = scmp.lt.u32.totalorder %s6326_s0, %s6434_s12 }
 0x590   : > { %p4848_p10 = scmp.lt.u32.totalorder %s4846_s21, %s4842_s28  ;;  %p4850_p11 = scmp.lt.u32.totalorder %s4842_s28, %s6326_s0 }
 0x591   : > { %p4844_p2 = pnand %p4843_p0, %p6435_p12 }
 0x592   : > { %p4849_p1 = por %p4848_p10, %p4847_p5 }
 0x593   : > { %p4845_p6 = pneg %p4844_p2 }
 0x594   : > { %p4851_p13 = por %p4850_p11, %p4849_p1 }
 0x596   : > { %p4852_p8 = pnand %p4851_p13, %p4845_p6 }
 0x598   : > { %4855 = shalt.err (!%p4852_p8)
}
 0x599   : > { %s4935_s11 = smov 256   ;;  %s4936_s26 = smov 16  }
 0x59a   : > { %4404 = dma.vmem_to_hbm [thread:$0]  (%p6435_p12), %s6328_s22, 32768, %s6326_s0, %s3544_s23, %s4935_s11, %s4935_s11, %s4936_s26  }
 0x59b PF: > { %s3573_s16 = sand.u32 1, %s4902_s17   ;;  %p6436_p7 = scmp.ne.s32.totalorder %s6419_s1, 0 }
 0x59c   : > { %p6437_p9 = scmp.ge.s32.totalorder %s4914_s20, 2  ;;  %s3574_s28 = scalar_lea.sflag [#allocation4], %s3573_s16 }
 0x59e   : > { %p4442_p4 = pnand %p6437_p9, %p6436_p7 }
 0x5a0   : > { %4897 = dma.done.wait (!%p4442_p4), %s3574_s28, 32768  }
 0x5a1   : > { %4899 = vsyncadd (!%p4442_p4), %s3574_s28, 4294934528  ;;  %p29_p3 = scmp.ge.s32.totalorder %s5253_s27, 4   ;;  %s6438_s17 = smov %s4906_s18 }
 0x5a2   : > { %s6439_s18 = smov %s4910_s19  ;;  %s6440_s19 = smov %s5264_s24 }
 0x5a3   : > { %s6441_s20 = smov %s5253_s27  ;;  %31 = sbr.rel (!%p29_p3) target bundleno = 14 (0xe), region = 149 }
 0x5aa   :  { %3579 = vsyncpa [#allocation3], 1 }
 0x5ab   :  { %3581 = vsyncpa [#allocation3 + $0x1], 1 }
 0x5ac   :  { %3582 = vsyncpa [#allocation6], 1 }
 0x5ad   :  { %3583 = vsyncpa [#allocation9], 1 }
 0x5ae   :  { %3584 = vsyncpa [#allocation12], 1 }
 0x5af   :  { %3585 = vsyncpa [#allocation15], 1 }
 0x5b0   :  { %3586 = vsyncpa [#allocation18], 1 }
 0x5b1   :  { %3587 = vsyncpa [#allocation4], 1 }
 0x5b2   :  { %3589 = vsyncpa [#allocation4 + $0x1], 1 }

</bundles_post_ra>
